<compile_context>
chip_gen: v7x
topology: tpu7x:2x2x1
jax: 0.10.0
libtpu: 0.0.40
codegen_flags: <defaults>
</compile_context>

<pallas_src>
import jax
import jax.numpy as jnp
from jax import lax
from jax.experimental import pallas as pl
from jax.experimental.pallas import tpu as pltpu

# AdaptiveLIF constants (module defaults)
RM = 1.0
DT = 1.0
B0 = 0.01
BETA = 1.8

LANE = 128


def _round_up(x, m):
    return ((x + m - 1) // m) * m


def build_rsnn_forward(layers, c_pad, bt, Tc, n_bc, n_tc, weight_dtype, io_dtype):
    """Builds the pallas_call.

    x is passed pre-chunked as (n_bc, n_tc, Tc*bt, in_dim) (time-major inside a
    chunk); the output is (T_pad, b_pad, c_pad) with a lane-dense class axis.
    """
    nb = len(layers) - 1
    in_dim = layers[0]
    h0 = layers[1]
    T_pad, b_pad = n_tc * Tc, n_bc * bt
    unroll = True if Tc <= 8 else 4

    def kernel(*refs):
        # ---- unpack refs: inputs, output, scratch ----
        p = 0
        x_ref = refs[p]; p += 1
        w_in_refs, w_hh_refs, vec_refs = [], [], []
        for _ in range(nb):
            w_in_refs.append(refs[p])
            w_hh_refs.append(refs[p + 1])
            vec_refs.append(refs[p + 2])
            p += 3
        w_out_ref = refs[p]; vec_out_ref = refs[p + 1]; p += 2
        out_ref = refs[p]; p += 1
        st_refs = list(refs[p:p + nb]); p += nb      # (3, bt, h_i) f32 per block
        sto_ref = refs[p]; p += 1                    # (2, bt, c_pad) f32
        d0_ref = refs[p]                             # (Tc*bt, h0) f32

        t_pid = pl.program_id(1)

        # ---- chunk-invariant hoists (done once, off the serial path) ----
        blk_consts = []
        for i in range(nb):
            h = layers[i + 1]
            v = vec_refs[i][...]                     # (8, h) f32
            rows = (v[0:1, :],                       # b_in
                    v[0:1, :] + v[1:2, :],           # b_in + b_hh (fused bias)
                    v[2:3, :],                       # alpha
                    v[3:4, :],                       # (1 - alpha) * Rm
                    v[4:5, :],                       # rho
                    v[5:6, :])                       # 1 - rho
            blk_consts.append(tuple(jnp.broadcast_to(r, (bt, h)) for r in rows))
        vo = vec_out_ref[...]                        # (8, c_pad) f32
        b_out_b, a_out_b, oma_out_b, r_out_b, omr_out_b = [
            jnp.broadcast_to(vo[r:r + 1, :], (bt, c_pad)) for r in range(5)]

        # ---- block-0 input projection for the whole chunk: one big MXU matmul ----
        d0_ref[...] = jnp.dot(x_ref[...].astype(weight_dtype), w_in_refs[0][...],
                              preferred_element_type=jnp.float32)

        def lif(u, eta, alpha, oma, rho, omr, drive):
            # neuron_charge
            u = u * alpha + oma * drive
            # neuron_fire (surrogate forward == Heaviside), threshold from OLD eta
            v_th = B0 + BETA * eta
            spk = (u - v_th > 0.0).astype(jnp.float32)
            # update_neuronstat_after_fire (reset uses the same OLD-eta threshold)
            u = u - spk * v_th
            eta = rho * eta + omr * spk
            return u, eta, spk

        def make_step(with_recurrent):
            def step(t, carry):
                states, u_o, eta_o = carry
                off = t * bt
                if not isinstance(off, int):
                    off = pl.multiple_of(off, bt)
                cur = None
                new_states = []
                for i in range(nb):
                    b_in_b, b_tot_b, alpha, oma, rho, omr = blk_consts[i]
                    u, eta, h = states[i]
                    if i == 0:
                        pre = d0_ref[pl.ds(off, bt), :]          # hoisted projection
                    else:
                        pre = jnp.dot(cur.astype(weight_dtype), w_in_refs[i][...],
                                      preferred_element_type=jnp.float32)
                    if with_recurrent:
                        drive = (pre
                                 + jnp.dot(h.astype(weight_dtype), w_hh_refs[i][...],
                                           preferred_element_type=jnp.float32)
                                 + b_tot_b)
                    else:
                        # global t == 0: PyTorch skips the recurrent branch entirely
                        drive = pre + b_in_b
                    u, eta, spk = lif(u, eta, alpha, oma, rho, omr, drive)
                    new_states.append((u, eta, spk))
                    cur = spk
                # fc_out + output AdaptiveLIF (classes zero-padded to 128 lanes)
                pre_o = jnp.dot(cur.astype(weight_dtype), w_out_ref[...],
                                preferred_element_type=jnp.float32) + b_out_b
                u_o, eta_o, spk_o = lif(u_o, eta_o, a_out_b, oma_out_b,
                                        r_out_b, omr_out_b, pre_o)
                out_ref[t] = spk_o.astype(io_dtype)   # lane-dense (bt, 128) store
                return (tuple(new_states), u_o, eta_o)
            return step

        step_rec = make_step(True)
        step_t0 = make_step(False)

        def store_state(states, u_o, eta_o):
            for i in range(nb):
                u, eta, h = states[i]
                st_refs[i][0] = u
                st_refs[i][1] = eta
                st_refs[i][2] = h
            sto_ref[0] = u_o
            sto_ref[1] = eta_o

        @pl.when(t_pid == 0)
        def _first_chunk():
            def zeros(w):
                return jnp.zeros((bt, w), jnp.float32)
            states0 = tuple((zeros(layers[i + 1]), zeros(layers[i + 1]),
                             zeros(layers[i + 1])) for i in range(nb))
            carry = (states0, zeros(c_pad), zeros(c_pad))
            carry = step_t0(0, carry)                       # peeled global t == 0
            carry = lax.fori_loop(1, Tc, step_rec, carry, unroll=unroll)
            store_state(*carry)

        @pl.when(t_pid > 0)
        def _later_chunks():
            states = tuple((st_refs[i][0], st_refs[i][1], st_refs[i][2])
                           for i in range(nb))
            carry = (states, sto_ref[0], sto_ref[1])
            carry = lax.fori_loop(0, Tc, step_rec, carry, unroll=unroll)
            store_state(*carry)

    # ---- specs ----
    def const_spec(shape):
        nd = len(shape)
        return pl.BlockSpec(shape, lambda b, t, _nd=nd: (0,) * _nd)

    in_specs = [pl.BlockSpec((None, None, Tc * bt, in_dim),
                             lambda b, t: (b, t, 0, 0))]
    for i in range(nb):
        fin, h = layers[i], layers[i + 1]
        in_specs += [const_spec((fin, h)),        # W_in^T
                     const_spec((h, h)),          # W_hh^T
                     const_spec((8, h))]          # packed per-neuron vectors
    in_specs += [const_spec((layers[-1], c_pad)), const_spec((8, c_pad))]

    out_specs = pl.BlockSpec((Tc, bt, c_pad), lambda b, t: (t, b, 0))

    scratch_shapes = (
        [pltpu.VMEM((3, bt, layers[i + 1]), jnp.float32) for i in range(nb)]
        + [pltpu.VMEM((2, bt, c_pad), jnp.float32),
           pltpu.VMEM((Tc * bt, h0), jnp.float32)])

    return pl.pallas_call(
        kernel,
        out_shape=jax.ShapeDtypeStruct((T_pad, b_pad, c_pad), io_dtype),
        grid_spec=pltpu.PrefetchScalarGridSpec(
            num_scalar_prefetch=0,
            grid=(n_bc, n_tc),
            in_specs=in_specs,
            out_specs=out_specs,
            scratch_shapes=scratch_shapes),
        compiler_params=pltpu.CompilerParams(
            dimension_semantics=("parallel", "arbitrary")),
    )


def _sparsity_mask(w, sparsity):
    # SLinear._mask_low_weight: keep |w| >= percentile(|w|, 100*(1-sparsity))
    thr = jnp.percentile(jnp.abs(w), 100.0 * (1.0 - sparsity))
    return (jnp.abs(w) >= thr).astype(w.dtype)


def init_params(key, layers, num_classes, sparsity, weight_dtype=jnp.bfloat16):
    """Deterministic synthetic parameters, pre-fused / pre-packed for the kernel.

    Per block: W_in^T (fin, h), W_hh^T (h, h), and a packed (8, h) f32 operand
    holding [b_in, b_hh, alpha, (1-alpha)*Rm, rho, 1-rho, 0, 0].
    Output layer: W_out^T zero-padded to (h_last, c_pad) and a packed (8, c_pad)
    operand holding [b_out, alpha, (1-alpha)*Rm, rho, 1-rho, 0, 0, 0].
    """
    nb = len(layers) - 1
    c_pad = _round_up(num_classes, LANE)
    keys = iter(jax.random.split(key, 6 * nb + 4))
    params = []

    for i in range(nb):
        fin, h = layers[i], layers[i + 1]
        w_in = jax.random.normal(next(keys), (h, fin), jnp.float32) * 0.3
        b_in = jax.random.normal(next(keys), (h,), jnp.float32) * 0.05
        w_hh = jax.random.normal(next(keys), (h, h), jnp.float32) * 0.3
        b_hh = jax.random.normal(next(keys), (h,), jnp.float32) * 0.05
        tau_m = 200.0 + 25.0 * jax.random.normal(next(keys), (h,), jnp.float32)
        tau_adp = 20.0 + 5.0 * jax.random.normal(next(keys), (h,), jnp.float32)
        alpha = jnp.exp(-DT / tau_m)
        rho = jnp.exp(-DT / tau_adp)
        z = jnp.zeros((h,), jnp.float32)
        vec = jnp.stack([b_in, b_hh, alpha, (1.0 - alpha) * RM, rho, 1.0 - rho,
                         z, z], axis=0)
        params += [
            ((w_in * _sparsity_mask(w_in, sparsity)).T).astype(weight_dtype),
            ((w_hh * _sparsity_mask(w_hh, sparsity)).T).astype(weight_dtype),
            vec,
        ]

    c, hl = num_classes, layers[-1]
    w_out = jax.random.normal(next(keys), (c, hl), jnp.float32) * 0.3
    b_out = jax.random.normal(next(keys), (c,), jnp.float32) * 0.05
    tau_m_o = 200.0 + 25.0 * jax.random.normal(next(keys), (c,), jnp.float32)
    tau_adp_o = 20.0 + 5.0 * jax.random.normal(next(keys), (c,), jnp.float32)
    a_o = jnp.exp(-DT / tau_m_o)
    r_o = jnp.exp(-DT / tau_adp_o)
    zc = jnp.zeros((c,), jnp.float32)
    vec_out = jnp.stack([b_out, a_o, (1.0 - a_o) * RM, r_o, 1.0 - r_o,
                         zc, zc, zc], axis=0)
    # padded class lanes have alpha=rho=bias=0 -> stay inert (v_th = b0 > 0)
    vec_out = jnp.pad(vec_out, ((0, 0), (0, c_pad - c)))
    w_out_p = jnp.pad((w_out * _sparsity_mask(w_out, sparsity)).T,
                      ((0, 0), (0, c_pad - c))).astype(weight_dtype)
    params += [w_out_p, vec_out]
    return params


def rsnn_forward(x, params, layers, num_classes, *, time_chunk=32, batch_tile=64,
                 io_dtype=jnp.bfloat16):
    """x: (B, T, in_features) -> spikes (B, T, num_classes) float32.

    Pad/pack more sequences per call (larger B) where the workload allows: the
    per-step MXU M-dim is the batch tile, so throughput scales ~linearly with
    batch until the MXU tile fills (and it enables the v7x 2-TC batch split).
    """
    B, T, F = x.shape
    assert F == layers[0]
    c_pad = _round_up(num_classes, LANE)
    sub = 16 if jnp.dtype(io_dtype).itemsize == 2 else 8

    b_min = _round_up(B, sub)
    bt = min(b_min, _round_up(batch_tile, sub))
    b_pad = _round_up(b_min, bt)
    Tc = max(1, min(time_chunk, T))
    T_pad = _round_up(T, Tc)
    n_bc, n_tc = b_pad // bt, T_pad // Tc
    weight_dtype = params[0].dtype

    call = build_rsnn_forward(list(layers), c_pad, bt, Tc, n_bc, n_tc,
                              weight_dtype, io_dtype)

    # Host-side layout: (B,T,F) -> (n_bc, n_tc, Tc*bt, F); inside a chunk the
    # row order is time-major (row = t_local*bt + b_local).
    x_p = jnp.pad(x, ((0, b_pad - B), (0, T_pad - T), (0, 0))).astype(io_dtype)
    x_r = x_p.reshape(n_bc, bt, n_tc, Tc, F).transpose(0, 2, 3, 1, 4)
    x_r = x_r.reshape(n_bc, n_tc, Tc * bt, F)

    out_t = call(x_r, *params)                   # (T_pad, b_pad, c_pad) io_dtype
    out = jnp.transpose(out_t, (1, 0, 2))        # (b_pad, T_pad, c_pad)
    return out[:B, :T, :num_classes].astype(jnp.float32)


if __name__ == "__main__":
    key = jax.random.PRNGKey(0)
    B, T = 2, 8
    layers = [16, 32, 32]        # input size 16, two recurrent blocks of 32
    num_classes = 8
    sparsity = 0.3

    k_x, k_p = jax.random.split(key)
    x = jax.random.normal(k_x, (B, T, layers[0]), jnp.float32)
    params = init_params(k_p, layers, num_classes, sparsity)

    # time_chunk=4 -> 2 time chunks, exercising both the peeled first chunk and
    # the scratch-carried state path.
    out = rsnn_forward(x, params, layers, num_classes, time_chunk=4)
    out = jax.block_until_ready(out)

    assert out.shape == (B, T, num_classes), out.shape
    print("KERNEL_OK")
</pallas_src>

<mosaic_0001>
module attributes {stable_mosaic.version = 11 : i64} {
  func.func @kernel(%arg0: i32, %arg1: i32, %arg2: memref<1x1x64x16xbf16, #tpu.memory_space<vmem>>, %arg3: memref<16x32xbf16, #tpu.memory_space<vmem>>, %arg4: memref<32x32xbf16, #tpu.memory_space<vmem>>, %arg5: memref<8x32xf32, #tpu.memory_space<vmem>>, %arg6: memref<32x32xbf16, #tpu.memory_space<vmem>>, %arg7: memref<32x32xbf16, #tpu.memory_space<vmem>>, %arg8: memref<8x32xf32, #tpu.memory_space<vmem>>, %arg9: memref<32x128xbf16, #tpu.memory_space<vmem>>, %arg10: memref<8x128xf32, #tpu.memory_space<vmem>>, %arg11: memref<4x16x128xbf16, #tpu.memory_space<vmem>>, %arg12: memref<3x16x32xf32, #tpu.memory_space<vmem>>, %arg13: memref<3x16x32xf32, #tpu.memory_space<vmem>>, %arg14: memref<2x16x128xf32, #tpu.memory_space<vmem>>, %arg15: memref<64x32xf32, #tpu.memory_space<vmem>>) attributes {dimension_semantics = [#tpu.dimension_semantics<parallel>, #tpu.dimension_semantics<arbitrary>], iteration_bounds = array<i64: 1, 2>, scalar_prefetch = 0 : i64, scratch_operands = 4 : i64, tpu.core_type = #tpu.core_type<tc>, window_params = [{transform_indices = @transform_0, window_bounds = array<i64: 1, 1, 64, 16>}, {pipeline_mode = #tpu.pipeline_mode<synchronous>, transform_indices = @transform_1, window_bounds = array<i64: 16, 32>}, {pipeline_mode = #tpu.pipeline_mode<synchronous>, transform_indices = @transform_2, window_bounds = array<i64: 32, 32>}, {pipeline_mode = #tpu.pipeline_mode<synchronous>, transform_indices = @transform_3, window_bounds = array<i64: 8, 32>}, {pipeline_mode = #tpu.pipeline_mode<synchronous>, transform_indices = @transform_4, window_bounds = array<i64: 32, 32>}, {pipeline_mode = #tpu.pipeline_mode<synchronous>, transform_indices = @transform_5, window_bounds = array<i64: 32, 32>}, {pipeline_mode = #tpu.pipeline_mode<synchronous>, transform_indices = @transform_6, window_bounds = array<i64: 8, 32>}, {pipeline_mode = #tpu.pipeline_mode<synchronous>, transform_indices = @transform_7, window_bounds = array<i64: 32, 128>}, {pipeline_mode = #tpu.pipeline_mode<synchronous>, transform_indices = @transform_8, window_bounds = array<i64: 8, 128>}, {transform_indices = @transform_9, window_bounds = array<i64: 4, 16, 128>}]} {
    %c0 = arith.constant 0 : index
    %c0_0 = arith.constant 0 : index
    %0 = vector.load %arg5[%c0, %c0_0] : memref<8x32xf32, #tpu.memory_space<vmem>>, vector<8x32xf32>
    %1 = vector.extract_strided_slice %0 {offsets = [0, 0], sizes = [1, 32], strides = [1, 1]} : vector<8x32xf32> to vector<1x32xf32>
    %2 = vector.extract_strided_slice %0 {offsets = [0, 0], sizes = [1, 32], strides = [1, 1]} : vector<8x32xf32> to vector<1x32xf32>
    %3 = vector.extract_strided_slice %0 {offsets = [1, 0], sizes = [1, 32], strides = [1, 1]} : vector<8x32xf32> to vector<1x32xf32>
    %4 = arith.addf %2, %3 : vector<1x32xf32>
    %5 = vector.extract_strided_slice %0 {offsets = [2, 0], sizes = [1, 32], strides = [1, 1]} : vector<8x32xf32> to vector<1x32xf32>
    %6 = vector.extract_strided_slice %0 {offsets = [3, 0], sizes = [1, 32], strides = [1, 1]} : vector<8x32xf32> to vector<1x32xf32>
    %7 = vector.extract_strided_slice %0 {offsets = [4, 0], sizes = [1, 32], strides = [1, 1]} : vector<8x32xf32> to vector<1x32xf32>
    %8 = vector.extract_strided_slice %0 {offsets = [5, 0], sizes = [1, 32], strides = [1, 1]} : vector<8x32xf32> to vector<1x32xf32>
    %9 = vector.shape_cast %1 : vector<1x32xf32> to vector<1x32xf32>
    %10 = vector.broadcast %9 : vector<1x32xf32> to vector<16x32xf32>
    %11 = vector.shape_cast %4 : vector<1x32xf32> to vector<1x32xf32>
    %12 = vector.broadcast %11 : vector<1x32xf32> to vector<16x32xf32>
    %13 = vector.shape_cast %5 : vector<1x32xf32> to vector<1x32xf32>
    %14 = vector.broadcast %13 : vector<1x32xf32> to vector<16x32xf32>
    %15 = vector.shape_cast %6 : vector<1x32xf32> to vector<1x32xf32>
    %16 = vector.broadcast %15 : vector<1x32xf32> to vector<16x32xf32>
    %17 = vector.shape_cast %7 : vector<1x32xf32> to vector<1x32xf32>
    %18 = vector.broadcast %17 : vector<1x32xf32> to vector<16x32xf32>
    %19 = vector.shape_cast %8 : vector<1x32xf32> to vector<1x32xf32>
    %20 = vector.broadcast %19 : vector<1x32xf32> to vector<16x32xf32>
    %c0_1 = arith.constant 0 : index
    %c0_2 = arith.constant 0 : index
    %21 = vector.load %arg8[%c0_1, %c0_2] : memref<8x32xf32, #tpu.memory_space<vmem>>, vector<8x32xf32>
    %22 = vector.extract_strided_slice %21 {offsets = [0, 0], sizes = [1, 32], strides = [1, 1]} : vector<8x32xf32> to vector<1x32xf32>
    %23 = vector.extract_strided_slice %21 {offsets = [0, 0], sizes = [1, 32], strides = [1, 1]} : vector<8x32xf32> to vector<1x32xf32>
    %24 = vector.extract_strided_slice %21 {offsets = [1, 0], sizes = [1, 32], strides = [1, 1]} : vector<8x32xf32> to vector<1x32xf32>
    %25 = arith.addf %23, %24 : vector<1x32xf32>
    %26 = vector.extract_strided_slice %21 {offsets = [2, 0], sizes = [1, 32], strides = [1, 1]} : vector<8x32xf32> to vector<1x32xf32>
    %27 = vector.extract_strided_slice %21 {offsets = [3, 0], sizes = [1, 32], strides = [1, 1]} : vector<8x32xf32> to vector<1x32xf32>
    %28 = vector.extract_strided_slice %21 {offsets = [4, 0], sizes = [1, 32], strides = [1, 1]} : vector<8x32xf32> to vector<1x32xf32>
    %29 = vector.extract_strided_slice %21 {offsets = [5, 0], sizes = [1, 32], strides = [1, 1]} : vector<8x32xf32> to vector<1x32xf32>
    %30 = vector.shape_cast %22 : vector<1x32xf32> to vector<1x32xf32>
    %31 = vector.broadcast %30 : vector<1x32xf32> to vector<16x32xf32>
    %32 = vector.shape_cast %25 : vector<1x32xf32> to vector<1x32xf32>
    %33 = vector.broadcast %32 : vector<1x32xf32> to vector<16x32xf32>
    %34 = vector.shape_cast %26 : vector<1x32xf32> to vector<1x32xf32>
    %35 = vector.broadcast %34 : vector<1x32xf32> to vector<16x32xf32>
    %36 = vector.shape_cast %27 : vector<1x32xf32> to vector<1x32xf32>
    %37 = vector.broadcast %36 : vector<1x32xf32> to vector<16x32xf32>
    %38 = vector.shape_cast %28 : vector<1x32xf32> to vector<1x32xf32>
    %39 = vector.broadcast %38 : vector<1x32xf32> to vector<16x32xf32>
    %40 = vector.shape_cast %29 : vector<1x32xf32> to vector<1x32xf32>
    %41 = vector.broadcast %40 : vector<1x32xf32> to vector<16x32xf32>
    %c0_3 = arith.constant 0 : index
    %c0_4 = arith.constant 0 : index
    %42 = vector.load %arg10[%c0_3, %c0_4] : memref<8x128xf32, #tpu.memory_space<vmem>>, vector<8x128xf32>
    %43 = vector.extract_strided_slice %42 {offsets = [0, 0], sizes = [1, 128], strides = [1, 1]} : vector<8x128xf32> to vector<1x128xf32>
    %44 = vector.shape_cast %43 : vector<1x128xf32> to vector<1x128xf32>
    %45 = vector.broadcast %44 : vector<1x128xf32> to vector<16x128xf32>
    %46 = vector.extract_strided_slice %42 {offsets = [1, 0], sizes = [1, 128], strides = [1, 1]} : vector<8x128xf32> to vector<1x128xf32>
    %47 = vector.shape_cast %46 : vector<1x128xf32> to vector<1x128xf32>
    %48 = vector.broadcast %47 : vector<1x128xf32> to vector<16x128xf32>
    %49 = vector.extract_strided_slice %42 {offsets = [2, 0], sizes = [1, 128], strides = [1, 1]} : vector<8x128xf32> to vector<1x128xf32>
    %50 = vector.shape_cast %49 : vector<1x128xf32> to vector<1x128xf32>
    %51 = vector.broadcast %50 : vector<1x128xf32> to vector<16x128xf32>
    %52 = vector.extract_strided_slice %42 {offsets = [3, 0], sizes = [1, 128], strides = [1, 1]} : vector<8x128xf32> to vector<1x128xf32>
    %53 = vector.shape_cast %52 : vector<1x128xf32> to vector<1x128xf32>
    %54 = vector.broadcast %53 : vector<1x128xf32> to vector<16x128xf32>
    %55 = vector.extract_strided_slice %42 {offsets = [4, 0], sizes = [1, 128], strides = [1, 1]} : vector<8x128xf32> to vector<1x128xf32>
    %56 = vector.shape_cast %55 : vector<1x128xf32> to vector<1x128xf32>
    %57 = vector.broadcast %56 : vector<1x128xf32> to vector<16x128xf32>
    %c0_5 = arith.constant 0 : index
    %c0_6 = arith.constant 0 : index
    %c0_7 = arith.constant 0 : index
    %c0_8 = arith.constant 0 : index
    %58 = vector.load %arg2[%c0_5, %c0_6, %c0_7, %c0_8] : memref<1x1x64x16xbf16, #tpu.memory_space<vmem>>, vector<1x1x64x16xbf16>
    %59 = vector.shape_cast %58 : vector<1x1x64x16xbf16> to vector<64x16xbf16>
    %c0_9 = arith.constant 0 : index
    %c0_10 = arith.constant 0 : index
    %60 = vector.load %arg3[%c0_9, %c0_10] : memref<16x32xbf16, #tpu.memory_space<vmem>>, vector<16x32xbf16>
    %cst = arith.constant dense<0.000000e+00> : vector<64x32xf32>
    %61 = tpu.matmul %59, %60, %cst {dimension_numbers = #tpu.dot_dimension_numbers<[1], [0], [0], [1], [0, 0, 1, 1], [], []>} : vector<64x16xbf16>, vector<16x32xbf16>, vector<64x32xf32> -> vector<64x32xf32>
    %c0_11 = arith.constant 0 : index
    %c0_12 = arith.constant 0 : index
    %62 = vector.load %arg15[%c0_11, %c0_12] : memref<64x32xf32, #tpu.memory_space<vmem>>, vector<64x32xf32>
    tpu.vector_store %arg15[%c0_11, %c0_12], %61 {strides = array<i32>} : memref<64x32xf32, #tpu.memory_space<vmem>>, vector<64x32xf32>,
    %c0_i32 = arith.constant 0 : i32
    %63 = arith.cmpi eq, %arg1, %c0_i32 : i32
    %64 = arith.extui %63 : i1 to i32
    %c0_i32_13 = arith.constant 0 : i32
    %65 = arith.cmpi ne, %64, %c0_i32_13 : i32
    scf.if %65 {
      %cst_16 = arith.constant 0.000000e+00 : f32
      %69 = vector.broadcast %cst_16 : f32 to vector<16x32xf32>
      %cst_17 = arith.constant 0.000000e+00 : f32
      %70 = vector.broadcast %cst_17 : f32 to vector<16x32xf32>
      %cst_18 = arith.constant 0.000000e+00 : f32
      %71 = vector.broadcast %cst_18 : f32 to vector<16x32xf32>
      %cst_19 = arith.constant 0.000000e+00 : f32
      %72 = vector.broadcast %cst_19 : f32 to vector<16x32xf32>
      %cst_20 = arith.constant 0.000000e+00 : f32
      %73 = vector.broadcast %cst_20 : f32 to vector<16x128xf32>
      %cst_21 = arith.constant 0.000000e+00 : f32
      %74 = vector.broadcast %cst_21 : f32 to vector<16x128xf32>
      %c0_22 = arith.constant 0 : index
      %c0_23 = arith.constant 0 : index
      %75 = vector.load %arg15[%c0_22, %c0_23] : memref<64x32xf32, #tpu.memory_space<vmem>>, vector<16x32xf32>
      %76 = arith.addf %75, %10 : vector<16x32xf32>
      %77 = arith.mulf %69, %14 : vector<16x32xf32>
      %78 = arith.mulf %16, %76 : vector<16x32xf32>
      %79 = arith.addf %77, %78 : vector<16x32xf32>
      %cst_24 = arith.constant 1.800000e+00 : f32
      %80 = vector.broadcast %cst_24 : f32 to vector<16x32xf32>
      %81 = arith.mulf %80, %70 : vector<16x32xf32>
      %cst_25 = arith.constant 0.00999999977 : f32
      %82 = vector.broadcast %cst_25 : f32 to vector<16x32xf32>
      %83 = arith.addf %82, %81 : vector<16x32xf32>
      %84 = arith.subf %79, %83 : vector<16x32xf32>
      %cst_26 = arith.constant 0.000000e+00 : f32
      %85 = vector.broadcast %cst_26 : f32 to vector<16x32xf32>
      %86 = arith.cmpf ogt, %84, %85 : vector<16x32xf32>
      %87 = arith.extui %86 : vector<16x32xi1> to vector<16x32xi32>
      %88 = arith.sitofp %87 : vector<16x32xi32> to vector<16x32xf32>
      %89 = arith.mulf %88, %83 : vector<16x32xf32>
      %90 = arith.subf %79, %89 : vector<16x32xf32>
      %91 = arith.mulf %18, %70 : vector<16x32xf32>
      %92 = arith.mulf %20, %88 : vector<16x32xf32>
      %93 = arith.addf %91, %92 : vector<16x32xf32>
      %94 = arith.truncf %88 : vector<16x32xf32> to vector<16x32xbf16>
      %c0_27 = arith.constant 0 : index
      %c0_28 = arith.constant 0 : index
      %95 = vector.load %arg6[%c0_27, %c0_28] : memref<32x32xbf16, #tpu.memory_space<vmem>>, vector<32x32xbf16>
      %cst_29 = arith.constant dense<0.000000e+00> : vector<16x32xf32>
      %96 = tpu.matmul %94, %95, %cst_29 {dimension_numbers = #tpu.dot_dimension_numbers<[1], [0], [0], [1], [0, 0, 1, 1], [], []>} : vector<16x32xbf16>, vector<32x32xbf16>, vector<16x32xf32> -> vector<16x32xf32>
      %97 = arith.addf %96, %31 : vector<16x32xf32>
      %98 = arith.mulf %71, %35 : vector<16x32xf32>
      %99 = arith.mulf %37, %97 : vector<16x32xf32>
      %100 = arith.addf %98, %99 : vector<16x32xf32>
      %cst_30 = arith.constant 1.800000e+00 : f32
      %101 = vector.broadcast %cst_30 : f32 to vector<16x32xf32>
      %102 = arith.mulf %101, %72 : vector<16x32xf32>
      %cst_31 = arith.constant 0.00999999977 : f32
      %103 = vector.broadcast %cst_31 : f32 to vector<16x32xf32>
      %104 = arith.addf %103, %102 : vector<16x32xf32>
      %105 = arith.subf %100, %104 : vector<16x32xf32>
      %cst_32 = arith.constant 0.000000e+00 : f32
      %106 = vector.broadcast %cst_32 : f32 to vector<16x32xf32>
      %107 = arith.cmpf ogt, %105, %106 : vector<16x32xf32>
      %108 = arith.extui %107 : vector<16x32xi1> to vector<16x32xi32>
      %109 = arith.sitofp %108 : vector<16x32xi32> to vector<16x32xf32>
      %110 = arith.mulf %109, %104 : vector<16x32xf32>
      %111 = arith.subf %100, %110 : vector<16x32xf32>
      %112 = arith.mulf %39, %72 : vector<16x32xf32>
      %113 = arith.mulf %41, %109 : vector<16x32xf32>
      %114 = arith.addf %112, %113 : vector<16x32xf32>
      %115 = arith.truncf %109 : vector<16x32xf32> to vector<16x32xbf16>
      %c0_33 = arith.constant 0 : index
      %c0_34 = arith.constant 0 : index
      %116 = vector.load %arg9[%c0_33, %c0_34] : memref<32x128xbf16, #tpu.memory_space<vmem>>, vector<32x128xbf16>
      %cst_35 = arith.constant dense<0.000000e+00> : vector<16x128xf32>
      %117 = tpu.matmul %115, %116, %cst_35 {dimension_numbers = #tpu.dot_dimension_numbers<[1], [0], [0], [1], [0, 0, 1, 1], [], []>} : vector<16x32xbf16>, vector<32x128xbf16>, vector<16x128xf32> -> vector<16x128xf32>
      %118 = arith.addf %117, %45 : vector<16x128xf32>
      %119 = arith.mulf %73, %48 : vector<16x128xf32>
      %120 = arith.mulf %51, %118 : vector<16x128xf32>
      %121 = arith.addf %119, %120 : vector<16x128xf32>
      %cst_36 = arith.constant 1.800000e+00 : f32
      %122 = vector.broadcast %cst_36 : f32 to vector<16x128xf32>
      %123 = arith.mulf %122, %74 : vector<16x128xf32>
      %cst_37 = arith.constant 0.00999999977 : f32
      %124 = vector.broadcast %cst_37 : f32 to vector<16x128xf32>
      %125 = arith.addf %124, %123 : vector<16x128xf32>
      %126 = arith.subf %121, %125 : vector<16x128xf32>
      %cst_38 = arith.constant 0.000000e+00 : f32
      %127 = vector.broadcast %cst_38 : f32 to vector<16x128xf32>
      %128 = arith.cmpf ogt, %126, %127 : vector<16x128xf32>
      %129 = arith.extui %128 : vector<16x128xi1> to vector<16x128xi32>
      %130 = arith.sitofp %129 : vector<16x128xi32> to vector<16x128xf32>
      %131 = arith.mulf %130, %125 : vector<16x128xf32>
      %132 = arith.subf %121, %131 : vector<16x128xf32>
      %133 = arith.mulf %54, %74 : vector<16x128xf32>
      %134 = arith.mulf %57, %130 : vector<16x128xf32>
      %135 = arith.addf %133, %134 : vector<16x128xf32>
      %136 = arith.truncf %130 : vector<16x128xf32> to vector<16x128xbf16>
      %c0_39 = arith.constant 0 : index
      %c0_40 = arith.constant 0 : index
      %c0_41 = arith.constant 0 : index
      %137 = vector.load %arg11[%c0_39, %c0_40, %c0_41] : memref<4x16x128xbf16, #tpu.memory_space<vmem>>, vector<1x16x128xbf16>
      %138 = vector.shape_cast %137 : vector<1x16x128xbf16> to vector<16x128xbf16>
      %139 = vector.shape_cast %136 : vector<16x128xbf16> to vector<1x16x128xbf16>
      tpu.vector_store %arg11[%c0_39, %c0_40, %c0_41], %139 {strides = array<i32>} : memref<4x16x128xbf16, #tpu.memory_space<vmem>>, vector<1x16x128xbf16>,
      %c1_i32 = arith.constant 1 : i32
      %c16_i32 = arith.constant 16 : i32
      %140 = arith.muli %c1_i32, %c16_i32 : i32
      %141 = tpu.assume_multiple %140, 16 : i32
      %142 = arith.index_cast %141 : i32 to index
      %c0_42 = arith.constant 0 : index
      %143 = vector.load %arg15[%142, %c0_42] : memref<64x32xf32, #tpu.memory_space<vmem>>, vector<16x32xf32>
      %144 = arith.truncf %88 : vector<16x32xf32> to vector<16x32xbf16>
      %c0_43 = arith.constant 0 : index
      %c0_44 = arith.constant 0 : index
      %145 = vector.load %arg4[%c0_43, %c0_44] : memref<32x32xbf16, #tpu.memory_space<vmem>>, vector<32x32xbf16>
      %cst_45 = arith.constant dense<0.000000e+00> : vector<16x32xf32>
      %146 = tpu.matmul %144, %145, %cst_45 {dimension_numbers = #tpu.dot_dimension_numbers<[1], [0], [0], [1], [0, 0, 1, 1], [], []>} : vector<16x32xbf16>, vector<32x32xbf16>, vector<16x32xf32> -> vector<16x32xf32>
      %147 = arith.addf %143, %146 : vector<16x32xf32>
      %148 = arith.addf %147, %12 : vector<16x32xf32>
      %149 = arith.mulf %90, %14 : vector<16x32xf32>
      %150 = arith.mulf %16, %148 : vector<16x32xf32>
      %151 = arith.addf %149, %150 : vector<16x32xf32>
      %cst_46 = arith.constant 1.800000e+00 : f32
      %152 = vector.broadcast %cst_46 : f32 to vector<16x32xf32>
      %153 = arith.mulf %152, %93 : vector<16x32xf32>
      %cst_47 = arith.constant 0.00999999977 : f32
      %154 = vector.broadcast %cst_47 : f32 to vector<16x32xf32>
      %155 = arith.addf %154, %153 : vector<16x32xf32>
      %156 = arith.subf %151, %155 : vector<16x32xf32>
      %cst_48 = arith.constant 0.000000e+00 : f32
      %157 = vector.broadcast %cst_48 : f32 to vector<16x32xf32>
      %158 = arith.cmpf ogt, %156, %157 : vector<16x32xf32>
      %159 = arith.extui %158 : vector<16x32xi1> to vector<16x32xi32>
      %160 = arith.sitofp %159 : vector<16x32xi32> to vector<16x32xf32>
      %161 = arith.mulf %160, %155 : vector<16x32xf32>
      %162 = arith.subf %151, %161 : vector<16x32xf32>
      %163 = arith.mulf %18, %93 : vector<16x32xf32>
      %164 = arith.mulf %20, %160 : vector<16x32xf32>
      %165 = arith.addf %163, %164 : vector<16x32xf32>
      %166 = arith.truncf %160 : vector<16x32xf32> to vector<16x32xbf16>
      %c0_49 = arith.constant 0 : index
      %c0_50 = arith.constant 0 : index
      %167 = vector.load %arg6[%c0_49, %c0_50] : memref<32x32xbf16, #tpu.memory_space<vmem>>, vector<32x32xbf16>
      %cst_51 = arith.constant dense<0.000000e+00> : vector<16x32xf32>
      %168 = tpu.matmul %166, %167, %cst_51 {dimension_numbers = #tpu.dot_dimension_numbers<[1], [0], [0], [1], [0, 0, 1, 1], [], []>} : vector<16x32xbf16>, vector<32x32xbf16>, vector<16x32xf32> -> vector<16x32xf32>
      %169 = arith.truncf %109 : vector<16x32xf32> to vector<16x32xbf16>
      %c0_52 = arith.constant 0 : index
      %c0_53 = arith.constant 0 : index
      %170 = vector.load %arg7[%c0_52, %c0_53] : memref<32x32xbf16, #tpu.memory_space<vmem>>, vector<32x32xbf16>
      %cst_54 = arith.constant dense<0.000000e+00> : vector<16x32xf32>
      %171 = tpu.matmul %169, %170, %cst_54 {dimension_numbers = #tpu.dot_dimension_numbers<[1], [0], [0], [1], [0, 0, 1, 1], [], []>} : vector<16x32xbf16>, vector<32x32xbf16>, vector<16x32xf32> -> vector<16x32xf32>
      %172 = arith.addf %168, %171 : vector<16x32xf32>
      %173 = arith.addf %172, %33 : vector<16x32xf32>
      %174 = arith.mulf %111, %35 : vector<16x32xf32>
      %175 = arith.mulf %37, %173 : vector<16x32xf32>
      %176 = arith.addf %174, %175 : vector<16x32xf32>
      %cst_55 = arith.constant 1.800000e+00 : f32
      %177 = vector.broadcast %cst_55 : f32 to vector<16x32xf32>
      %178 = arith.mulf %177, %114 : vector<16x32xf32>
      %cst_56 = arith.constant 0.00999999977 : f32
      %179 = vector.broadcast %cst_56 : f32 to vector<16x32xf32>
      %180 = arith.addf %179, %178 : vector<16x32xf32>
      %181 = arith.subf %176, %180 : vector<16x32xf32>
      %cst_57 = arith.constant 0.000000e+00 : f32
      %182 = vector.broadcast %cst_57 : f32 to vector<16x32xf32>
      %183 = arith.cmpf ogt, %181, %182 : vector<16x32xf32>
      %184 = arith.extui %183 : vector<16x32xi1> to vector<16x32xi32>
      %185 = arith.sitofp %184 : vector<16x32xi32> to vector<16x32xf32>
      %186 = arith.mulf %185, %180 : vector<16x32xf32>
      %187 = arith.subf %176, %186 : vector<16x32xf32>
      %188 = arith.mulf %39, %114 : vector<16x32xf32>
      %189 = arith.mulf %41, %185 : vector<16x32xf32>
      %190 = arith.addf %188, %189 : vector<16x32xf32>
      %191 = arith.truncf %185 : vector<16x32xf32> to vector<16x32xbf16>
      %c0_58 = arith.constant 0 : index
      %c0_59 = arith.constant 0 : index
      %192 = vector.load %arg9[%c0_58, %c0_59] : memref<32x128xbf16, #tpu.memory_space<vmem>>, vector<32x128xbf16>
      %cst_60 = arith.constant dense<0.000000e+00> : vector<16x128xf32>
      %193 = tpu.matmul %191, %192, %cst_60 {dimension_numbers = #tpu.dot_dimension_numbers<[1], [0], [0], [1], [0, 0, 1, 1], [], []>} : vector<16x32xbf16>, vector<32x128xbf16>, vector<16x128xf32> -> vector<16x128xf32>
      %194 = arith.addf %193, %45 : vector<16x128xf32>
      %195 = arith.mulf %132, %48 : vector<16x128xf32>
      %196 = arith.mulf %51, %194 : vector<16x128xf32>
      %197 = arith.addf %195, %196 : vector<16x128xf32>
      %cst_61 = arith.constant 1.800000e+00 : f32
      %198 = vector.broadcast %cst_61 : f32 to vector<16x128xf32>
      %199 = arith.mulf %198, %135 : vector<16x128xf32>
      %cst_62 = arith.constant 0.00999999977 : f32
      %200 = vector.broadcast %cst_62 : f32 to vector<16x128xf32>
      %201 = arith.addf %200, %199 : vector<16x128xf32>
      %202 = arith.subf %197, %201 : vector<16x128xf32>
      %cst_63 = arith.constant 0.000000e+00 : f32
      %203 = vector.broadcast %cst_63 : f32 to vector<16x128xf32>
      %204 = arith.cmpf ogt, %202, %203 : vector<16x128xf32>
      %205 = arith.extui %204 : vector<16x128xi1> to vector<16x128xi32>
      %206 = arith.sitofp %205 : vector<16x128xi32> to vector<16x128xf32>
      %207 = arith.mulf %206, %201 : vector<16x128xf32>
      %208 = arith.subf %197, %207 : vector<16x128xf32>
      %209 = arith.mulf %54, %135 : vector<16x128xf32>
      %210 = arith.mulf %57, %206 : vector<16x128xf32>
      %211 = arith.addf %209, %210 : vector<16x128xf32>
      %212 = arith.truncf %206 : vector<16x128xf32> to vector<16x128xbf16>
      %213 = arith.index_cast %c1_i32 : i32 to index
      %c0_64 = arith.constant 0 : index
      %c0_65 = arith.constant 0 : index
      %214 = vector.load %arg11[%213, %c0_64, %c0_65] : memref<4x16x128xbf16, #tpu.memory_space<vmem>>, vector<1x16x128xbf16>
      %215 = vector.shape_cast %214 : vector<1x16x128xbf16> to vector<16x128xbf16>
      %216 = vector.shape_cast %212 : vector<16x128xbf16> to vector<1x16x128xbf16>
      tpu.vector_store %arg11[%213, %c0_64, %c0_65], %216 {strides = array<i32>} : memref<4x16x128xbf16, #tpu.memory_space<vmem>>, vector<1x16x128xbf16>,
      %c2_i32 = arith.constant 2 : i32
      %c16_i32_66 = arith.constant 16 : i32
      %217 = arith.muli %c2_i32, %c16_i32_66 : i32
      %218 = tpu.assume_multiple %217, 16 : i32
      %219 = arith.index_cast %218 : i32 to index
      %c0_67 = arith.constant 0 : index
      %220 = vector.load %arg15[%219, %c0_67] : memref<64x32xf32, #tpu.memory_space<vmem>>, vector<16x32xf32>
      %221 = arith.truncf %160 : vector<16x32xf32> to vector<16x32xbf16>
      %c0_68 = arith.constant 0 : index
      %c0_69 = arith.constant 0 : index
      %222 = vector.load %arg4[%c0_68, %c0_69] : memref<32x32xbf16, #tpu.memory_space<vmem>>, vector<32x32xbf16>
      %cst_70 = arith.constant dense<0.000000e+00> : vector<16x32xf32>
      %223 = tpu.matmul %221, %222, %cst_70 {dimension_numbers = #tpu.dot_dimension_numbers<[1], [0], [0], [1], [0, 0, 1, 1], [], []>} : vector<16x32xbf16>, vector<32x32xbf16>, vector<16x32xf32> -> vector<16x32xf32>
      %224 = arith.addf %220, %223 : vector<16x32xf32>
      %225 = arith.addf %224, %12 : vector<16x32xf32>
      %226 = arith.mulf %162, %14 : vector<16x32xf32>
      %227 = arith.mulf %16, %225 : vector<16x32xf32>
      %228 = arith.addf %226, %227 : vector<16x32xf32>
      %cst_71 = arith.constant 1.800000e+00 : f32
      %229 = vector.broadcast %cst_71 : f32 to vector<16x32xf32>
      %230 = arith.mulf %229, %165 : vector<16x32xf32>
      %cst_72 = arith.constant 0.00999999977 : f32
      %231 = vector.broadcast %cst_72 : f32 to vector<16x32xf32>
      %232 = arith.addf %231, %230 : vector<16x32xf32>
      %233 = arith.subf %228, %232 : vector<16x32xf32>
      %cst_73 = arith.constant 0.000000e+00 : f32
      %234 = vector.broadcast %cst_73 : f32 to vector<16x32xf32>
      %235 = arith.cmpf ogt, %233, %234 : vector<16x32xf32>
      %236 = arith.extui %235 : vector<16x32xi1> to vector<16x32xi32>
      %237 = arith.sitofp %236 : vector<16x32xi32> to vector<16x32xf32>
      %238 = arith.mulf %237, %232 : vector<16x32xf32>
      %239 = arith.subf %228, %238 : vector<16x32xf32>
      %240 = arith.mulf %18, %165 : vector<16x32xf32>
      %241 = arith.mulf %20, %237 : vector<16x32xf32>
      %242 = arith.addf %240, %241 : vector<16x32xf32>
      %243 = arith.truncf %237 : vector<16x32xf32> to vector<16x32xbf16>
      %c0_74 = arith.constant 0 : index
      %c0_75 = arith.constant 0 : index
      %244 = vector.load %arg6[%c0_74, %c0_75] : memref<32x32xbf16, #tpu.memory_space<vmem>>, vector<32x32xbf16>
      %cst_76 = arith.constant dense<0.000000e+00> : vector<16x32xf32>
      %245 = tpu.matmul %243, %244, %cst_76 {dimension_numbers = #tpu.dot_dimension_numbers<[1], [0], [0], [1], [0, 0, 1, 1], [], []>} : vector<16x32xbf16>, vector<32x32xbf16>, vector<16x32xf32> -> vector<16x32xf32>
      %246 = arith.truncf %185 : vector<16x32xf32> to vector<16x32xbf16>
      %c0_77 = arith.constant 0 : index
      %c0_78 = arith.constant 0 : index
      %247 = vector.load %arg7[%c0_77, %c0_78] : memref<32x32xbf16, #tpu.memory_space<vmem>>, vector<32x32xbf16>
      %cst_79 = arith.constant dense<0.000000e+00> : vector<16x32xf32>
      %248 = tpu.matmul %246, %247, %cst_79 {dimension_numbers = #tpu.dot_dimension_numbers<[1], [0], [0], [1], [0, 0, 1, 1], [], []>} : vector<16x32xbf16>, vector<32x32xbf16>, vector<16x32xf32> -> vector<16x32xf32>
      %249 = arith.addf %245, %248 : vector<16x32xf32>
      %250 = arith.addf %249, %33 : vector<16x32xf32>
      %251 = arith.mulf %187, %35 : vector<16x32xf32>
      %252 = arith.mulf %37, %250 : vector<16x32xf32>
      %253 = arith.addf %251, %252 : vector<16x32xf32>
      %cst_80 = arith.constant 1.800000e+00 : f32
      %254 = vector.broadcast %cst_80 : f32 to vector<16x32xf32>
      %255 = arith.mulf %254, %190 : vector<16x32xf32>
      %cst_81 = arith.constant 0.00999999977 : f32
      %256 = vector.broadcast %cst_81 : f32 to vector<16x32xf32>
      %257 = arith.addf %256, %255 : vector<16x32xf32>
      %258 = arith.subf %253, %257 : vector<16x32xf32>
      %cst_82 = arith.constant 0.000000e+00 : f32
      %259 = vector.broadcast %cst_82 : f32 to vector<16x32xf32>
      %260 = arith.cmpf ogt, %258, %259 : vector<16x32xf32>
      %261 = arith.extui %260 : vector<16x32xi1> to vector<16x32xi32>
      %262 = arith.sitofp %261 : vector<16x32xi32> to vector<16x32xf32>
      %263 = arith.mulf %262, %257 : vector<16x32xf32>
      %264 = arith.subf %253, %263 : vector<16x32xf32>
      %265 = arith.mulf %39, %190 : vector<16x32xf32>
      %266 = arith.mulf %41, %262 : vector<16x32xf32>
      %267 = arith.addf %265, %266 : vector<16x32xf32>
      %268 = arith.truncf %262 : vector<16x32xf32> to vector<16x32xbf16>
      %c0_83 = arith.constant 0 : index
      %c0_84 = arith.constant 0 : index
      %269 = vector.load %arg9[%c0_83, %c0_84] : memref<32x128xbf16, #tpu.memory_space<vmem>>, vector<32x128xbf16>
      %cst_85 = arith.constant dense<0.000000e+00> : vector<16x128xf32>
      %270 = tpu.matmul %268, %269, %cst_85 {dimension_numbers = #tpu.dot_dimension_numbers<[1], [0], [0], [1], [0, 0, 1, 1], [], []>} : vector<16x32xbf16>, vector<32x128xbf16>, vector<16x128xf32> -> vector<16x128xf32>
      %271 = arith.addf %270, %45 : vector<16x128xf32>
      %272 = arith.mulf %208, %48 : vector<16x128xf32>
      %273 = arith.mulf %51, %271 : vector<16x128xf32>
      %274 = arith.addf %272, %273 : vector<16x128xf32>
      %cst_86 = arith.constant 1.800000e+00 : f32
      %275 = vector.broadcast %cst_86 : f32 to vector<16x128xf32>
      %276 = arith.mulf %275, %211 : vector<16x128xf32>
      %cst_87 = arith.constant 0.00999999977 : f32
      %277 = vector.broadcast %cst_87 : f32 to vector<16x128xf32>
      %278 = arith.addf %277, %276 : vector<16x128xf32>
      %279 = arith.subf %274, %278 : vector<16x128xf32>
      %cst_88 = arith.constant 0.000000e+00 : f32
      %280 = vector.broadcast %cst_88 : f32 to vector<16x128xf32>
      %281 = arith.cmpf ogt, %279, %280 : vector<16x128xf32>
      %282 = arith.extui %281 : vector<16x128xi1> to vector<16x128xi32>
      %283 = arith.sitofp %282 : vector<16x128xi32> to vector<16x128xf32>
      %284 = arith.mulf %283, %278 : vector<16x128xf32>
      %285 = arith.subf %274, %284 : vector<16x128xf32>
      %286 = arith.mulf %54, %211 : vector<16x128xf32>
      %287 = arith.mulf %57, %283 : vector<16x128xf32>
      %288 = arith.addf %286, %287 : vector<16x128xf32>
      %289 = arith.truncf %283 : vector<16x128xf32> to vector<16x128xbf16>
      %290 = arith.index_cast %c2_i32 : i32 to index
      %c0_89 = arith.constant 0 : index
      %c0_90 = arith.constant 0 : index
      %291 = vector.load %arg11[%290, %c0_89, %c0_90] : memref<4x16x128xbf16, #tpu.memory_space<vmem>>, vector<1x16x128xbf16>
      %292 = vector.shape_cast %291 : vector<1x16x128xbf16> to vector<16x128xbf16>
      %293 = vector.shape_cast %289 : vector<16x128xbf16> to vector<1x16x128xbf16>
      tpu.vector_store %arg11[%290, %c0_89, %c0_90], %293 {strides = array<i32>} : memref<4x16x128xbf16, #tpu.memory_space<vmem>>, vector<1x16x128xbf16>,
      %c3_i32 = arith.constant 3 : i32
      %c16_i32_91 = arith.constant 16 : i32
      %294 = arith.muli %c3_i32, %c16_i32_91 : i32
      %295 = tpu.assume_multiple %294, 16 : i32
      %296 = arith.index_cast %295 : i32 to index
      %c0_92 = arith.constant 0 : index
      %297 = vector.load %arg15[%296, %c0_92] : memref<64x32xf32, #tpu.memory_space<vmem>>, vector<16x32xf32>
      %298 = arith.truncf %237 : vector<16x32xf32> to vector<16x32xbf16>
      %c0_93 = arith.constant 0 : index
      %c0_94 = arith.constant 0 : index
      %299 = vector.load %arg4[%c0_93, %c0_94] : memref<32x32xbf16, #tpu.memory_space<vmem>>, vector<32x32xbf16>
      %cst_95 = arith.constant dense<0.000000e+00> : vector<16x32xf32>
      %300 = tpu.matmul %298, %299, %cst_95 {dimension_numbers = #tpu.dot_dimension_numbers<[1], [0], [0], [1], [0, 0, 1, 1], [], []>} : vector<16x32xbf16>, vector<32x32xbf16>, vector<16x32xf32> -> vector<16x32xf32>
      %301 = arith.addf %297, %300 : vector<16x32xf32>
      %302 = arith.addf %301, %12 : vector<16x32xf32>
      %303 = arith.mulf %239, %14 : vector<16x32xf32>
      %304 = arith.mulf %16, %302 : vector<16x32xf32>
      %305 = arith.addf %303, %304 : vector<16x32xf32>
      %cst_96 = arith.constant 1.800000e+00 : f32
      %306 = vector.broadcast %cst_96 : f32 to vector<16x32xf32>
      %307 = arith.mulf %306, %242 : vector<16x32xf32>
      %cst_97 = arith.constant 0.00999999977 : f32
      %308 = vector.broadcast %cst_97 : f32 to vector<16x32xf32>
      %309 = arith.addf %308, %307 : vector<16x32xf32>
      %310 = arith.subf %305, %309 : vector<16x32xf32>
      %cst_98 = arith.constant 0.000000e+00 : f32
      %311 = vector.broadcast %cst_98 : f32 to vector<16x32xf32>
      %312 = arith.cmpf ogt, %310, %311 : vector<16x32xf32>
      %313 = arith.extui %312 : vector<16x32xi1> to vector<16x32xi32>
      %314 = arith.sitofp %313 : vector<16x32xi32> to vector<16x32xf32>
      %315 = arith.mulf %314, %309 : vector<16x32xf32>
      %316 = arith.subf %305, %315 : vector<16x32xf32>
      %317 = arith.mulf %18, %242 : vector<16x32xf32>
      %318 = arith.mulf %20, %314 : vector<16x32xf32>
      %319 = arith.addf %317, %318 : vector<16x32xf32>
      %320 = arith.truncf %314 : vector<16x32xf32> to vector<16x32xbf16>
      %c0_99 = arith.constant 0 : index
      %c0_100 = arith.constant 0 : index
      %321 = vector.load %arg6[%c0_99, %c0_100] : memref<32x32xbf16, #tpu.memory_space<vmem>>, vector<32x32xbf16>
      %cst_101 = arith.constant dense<0.000000e+00> : vector<16x32xf32>
      %322 = tpu.matmul %320, %321, %cst_101 {dimension_numbers = #tpu.dot_dimension_numbers<[1], [0], [0], [1], [0, 0, 1, 1], [], []>} : vector<16x32xbf16>, vector<32x32xbf16>, vector<16x32xf32> -> vector<16x32xf32>
      %323 = arith.truncf %262 : vector<16x32xf32> to vector<16x32xbf16>
      %c0_102 = arith.constant 0 : index
      %c0_103 = arith.constant 0 : index
      %324 = vector.load %arg7[%c0_102, %c0_103] : memref<32x32xbf16, #tpu.memory_space<vmem>>, vector<32x32xbf16>
      %cst_104 = arith.constant dense<0.000000e+00> : vector<16x32xf32>
      %325 = tpu.matmul %323, %324, %cst_104 {dimension_numbers = #tpu.dot_dimension_numbers<[1], [0], [0], [1], [0, 0, 1, 1], [], []>} : vector<16x32xbf16>, vector<32x32xbf16>, vector<16x32xf32> -> vector<16x32xf32>
      %326 = arith.addf %322, %325 : vector<16x32xf32>
      %327 = arith.addf %326, %33 : vector<16x32xf32>
      %328 = arith.mulf %264, %35 : vector<16x32xf32>
      %329 = arith.mulf %37, %327 : vector<16x32xf32>
      %330 = arith.addf %328, %329 : vector<16x32xf32>
      %cst_105 = arith.constant 1.800000e+00 : f32
      %331 = vector.broadcast %cst_105 : f32 to vector<16x32xf32>
      %332 = arith.mulf %331, %267 : vector<16x32xf32>
      %cst_106 = arith.constant 0.00999999977 : f32
      %333 = vector.broadcast %cst_106 : f32 to vector<16x32xf32>
      %334 = arith.addf %333, %332 : vector<16x32xf32>
      %335 = arith.subf %330, %334 : vector<16x32xf32>
      %cst_107 = arith.constant 0.000000e+00 : f32
      %336 = vector.broadcast %cst_107 : f32 to vector<16x32xf32>
      %337 = arith.cmpf ogt, %335, %336 : vector<16x32xf32>
      %338 = arith.extui %337 : vector<16x32xi1> to vector<16x32xi32>
      %339 = arith.sitofp %338 : vector<16x32xi32> to vector<16x32xf32>
      %340 = arith.mulf %339, %334 : vector<16x32xf32>
      %341 = arith.subf %330, %340 : vector<16x32xf32>
      %342 = arith.mulf %39, %267 : vector<16x32xf32>
      %343 = arith.mulf %41, %339 : vector<16x32xf32>
      %344 = arith.addf %342, %343 : vector<16x32xf32>
      %345 = arith.truncf %339 : vector<16x32xf32> to vector<16x32xbf16>
      %c0_108 = arith.constant 0 : index
      %c0_109 = arith.constant 0 : index
      %346 = vector.load %arg9[%c0_108, %c0_109] : memref<32x128xbf16, #tpu.memory_space<vmem>>, vector<32x128xbf16>
      %cst_110 = arith.constant dense<0.000000e+00> : vector<16x128xf32>
      %347 = tpu.matmul %345, %346, %cst_110 {dimension_numbers = #tpu.dot_dimension_numbers<[1], [0], [0], [1], [0, 0, 1, 1], [], []>} : vector<16x32xbf16>, vector<32x128xbf16>, vector<16x128xf32> -> vector<16x128xf32>
      %348 = arith.addf %347, %45 : vector<16x128xf32>
      %349 = arith.mulf %285, %48 : vector<16x128xf32>
      %350 = arith.mulf %51, %348 : vector<16x128xf32>
      %351 = arith.addf %349, %350 : vector<16x128xf32>
      %cst_111 = arith.constant 1.800000e+00 : f32
      %352 = vector.broadcast %cst_111 : f32 to vector<16x128xf32>
      %353 = arith.mulf %352, %288 : vector<16x128xf32>
      %cst_112 = arith.constant 0.00999999977 : f32
      %354 = vector.broadcast %cst_112 : f32 to vector<16x128xf32>
      %355 = arith.addf %354, %353 : vector<16x128xf32>
      %356 = arith.subf %351, %355 : vector<16x128xf32>
      %cst_113 = arith.constant 0.000000e+00 : f32
      %357 = vector.broadcast %cst_113 : f32 to vector<16x128xf32>
      %358 = arith.cmpf ogt, %356, %357 : vector<16x128xf32>
      %359 = arith.extui %358 : vector<16x128xi1> to vector<16x128xi32>
      %360 = arith.sitofp %359 : vector<16x128xi32> to vector<16x128xf32>
      %361 = arith.mulf %360, %355 : vector<16x128xf32>
      %362 = arith.subf %351, %361 : vector<16x128xf32>
      %363 = arith.mulf %54, %288 : vector<16x128xf32>
      %364 = arith.mulf %57, %360 : vector<16x128xf32>
      %365 = arith.addf %363, %364 : vector<16x128xf32>
      %366 = arith.truncf %360 : vector<16x128xf32> to vector<16x128xbf16>
      %367 = arith.index_cast %c3_i32 : i32 to index
      %c0_114 = arith.constant 0 : index
      %c0_115 = arith.constant 0 : index
      %368 = vector.load %arg11[%367, %c0_114, %c0_115] : memref<4x16x128xbf16, #tpu.memory_space<vmem>>, vector<1x16x128xbf16>
      %369 = vector.shape_cast %368 : vector<1x16x128xbf16> to vector<16x128xbf16>
      %370 = vector.shape_cast %366 : vector<16x128xbf16> to vector<1x16x128xbf16>
      tpu.vector_store %arg11[%367, %c0_114, %c0_115], %370 {strides = array<i32>} : memref<4x16x128xbf16, #tpu.memory_space<vmem>>, vector<1x16x128xbf16>,
      %c3_i32_116 = arith.constant 3 : i32
      %c0_117 = arith.constant 0 : index
      %c0_118 = arith.constant 0 : index
      %c0_119 = arith.constant 0 : index
      %371 = vector.load %arg12[%c0_117, %c0_118, %c0_119] : memref<3x16x32xf32, #tpu.memory_space<vmem>>, vector<1x16x32xf32>
      %372 = vector.shape_cast %371 : vector<1x16x32xf32> to vector<16x32xf32>
      %373 = vector.shape_cast %316 : vector<16x32xf32> to vector<1x16x32xf32>
      tpu.vector_store %arg12[%c0_117, %c0_118, %c0_119], %373 {strides = array<i32>} : memref<3x16x32xf32, #tpu.memory_space<vmem>>, vector<1x16x32xf32>,
      %c1 = arith.constant 1 : index
      %c0_120 = arith.constant 0 : index
      %c0_121 = arith.constant 0 : index
      %374 = vector.load %arg12[%c1, %c0_120, %c0_121] : memref<3x16x32xf32, #tpu.memory_space<vmem>>, vector<1x16x32xf32>
      %375 = vector.shape_cast %374 : vector<1x16x32xf32> to vector<16x32xf32>
      %376 = vector.shape_cast %319 : vector<16x32xf32> to vector<1x16x32xf32>
      tpu.vector_store %arg12[%c1, %c0_120, %c0_121], %376 {strides = array<i32>} : memref<3x16x32xf32, #tpu.memory_space<vmem>>, vector<1x16x32xf32>,
      %c2 = arith.constant 2 : index
      %c0_122 = arith.constant 0 : index
      %c0_123 = arith.constant 0 : index
      %377 = vector.load %arg12[%c2, %c0_122, %c0_123] : memref<3x16x32xf32, #tpu.memory_space<vmem>>, vector<1x16x32xf32>
      %378 = vector.shape_cast %377 : vector<1x16x32xf32> to vector<16x32xf32>
      %379 = vector.shape_cast %314 : vector<16x32xf32> to vector<1x16x32xf32>
      tpu.vector_store %arg12[%c2, %c0_122, %c0_123], %379 {strides = array<i32>} : memref<3x16x32xf32, #tpu.memory_space<vmem>>, vector<1x16x32xf32>,
      %c0_124 = arith.constant 0 : index
      %c0_125 = arith.constant 0 : index
      %c0_126 = arith.constant 0 : index
      %380 = vector.load %arg13[%c0_124, %c0_125, %c0_126] : memref<3x16x32xf32, #tpu.memory_space<vmem>>, vector<1x16x32xf32>
      %381 = vector.shape_cast %380 : vector<1x16x32xf32> to vector<16x32xf32>
      %382 = vector.shape_cast %341 : vector<16x32xf32> to vector<1x16x32xf32>
      tpu.vector_store %arg13[%c0_124, %c0_125, %c0_126], %382 {strides = array<i32>} : memref<3x16x32xf32, #tpu.memory_space<vmem>>, vector<1x16x32xf32>,
      %c1_127 = arith.constant 1 : index
      %c0_128 = arith.constant 0 : index
      %c0_129 = arith.constant 0 : index
      %383 = vector.load %arg13[%c1_127, %c0_128, %c0_129] : memref<3x16x32xf32, #tpu.memory_space<vmem>>, vector<1x16x32xf32>
      %384 = vector.shape_cast %383 : vector<1x16x32xf32> to vector<16x32xf32>
      %385 = vector.shape_cast %344 : vector<16x32xf32> to vector<1x16x32xf32>
      tpu.vector_store %arg13[%c1_127, %c0_128, %c0_129], %385 {strides = array<i32>} : memref<3x16x32xf32, #tpu.memory_space<vmem>>, vector<1x16x32xf32>,
      %c2_130 = arith.constant 2 : index
      %c0_131 = arith.constant 0 : index
      %c0_132 = arith.constant 0 : index
      %386 = vector.load %arg13[%c2_130, %c0_131, %c0_132] : memref<3x16x32xf32, #tpu.memory_space<vmem>>, vector<1x16x32xf32>
      %387 = vector.shape_cast %386 : vector<1x16x32xf32> to vector<16x32xf32>
      %388 = vector.shape_cast %339 : vector<16x32xf32> to vector<1x16x32xf32>
      tpu.vector_store %arg13[%c2_130, %c0_131, %c0_132], %388 {strides = array<i32>} : memref<3x16x32xf32, #tpu.memory_space<vmem>>, vector<1x16x32xf32>,
      %c0_133 = arith.constant 0 : index
      %c0_134 = arith.constant 0 : index
      %c0_135 = arith.constant 0 : index
      %389 = vector.load %arg14[%c0_133, %c0_134, %c0_135] : memref<2x16x128xf32, #tpu.memory_space<vmem>>, vector<1x16x128xf32>
      %390 = vector.shape_cast %389 : vector<1x16x128xf32> to vector<16x128xf32>
      %391 = vector.shape_cast %362 : vector<16x128xf32> to vector<1x16x128xf32>
      tpu.vector_store %arg14[%c0_133, %c0_134, %c0_135], %391 {strides = array<i32>} : memref<2x16x128xf32, #tpu.memory_space<vmem>>, vector<1x16x128xf32>,
      %c1_136 = arith.constant 1 : index
      %c0_137 = arith.constant 0 : index
      %c0_138 = arith.constant 0 : index
      %392 = vector.load %arg14[%c1_136, %c0_137, %c0_138] : memref<2x16x128xf32, #tpu.memory_space<vmem>>, vector<1x16x128xf32>
      %393 = vector.shape_cast %392 : vector<1x16x128xf32> to vector<16x128xf32>
      %394 = vector.shape_cast %365 : vector<16x128xf32> to vector<1x16x128xf32>
      tpu.vector_store %arg14[%c1_136, %c0_137, %c0_138], %394 {strides = array<i32>} : memref<2x16x128xf32, #tpu.memory_space<vmem>>, vector<1x16x128xf32>,
    } else {
    }
    %c0_i32_14 = arith.constant 0 : i32
    %66 = arith.cmpi sgt, %arg1, %c0_i32_14 : i32
    %67 = arith.extui %66 : i1 to i32
    %c0_i32_15 = arith.constant 0 : i32
    %68 = arith.cmpi ne, %67, %c0_i32_15 : i32
    scf.if %68 {
      %c0_16 = arith.constant 0 : index
      %c0_17 = arith.constant 0 : index
      %c0_18 = arith.constant 0 : index
      %69 = vector.load %arg12[%c0_16, %c0_17, %c0_18] : memref<3x16x32xf32, #tpu.memory_space<vmem>>, vector<1x16x32xf32>
      %70 = vector.shape_cast %69 : vector<1x16x32xf32> to vector<16x32xf32>
      %c1 = arith.constant 1 : index
      %c0_19 = arith.constant 0 : index
      %c0_20 = arith.constant 0 : index
      %71 = vector.load %arg12[%c1, %c0_19, %c0_20] : memref<3x16x32xf32, #tpu.memory_space<vmem>>, vector<1x16x32xf32>
      %72 = vector.shape_cast %71 : vector<1x16x32xf32> to vector<16x32xf32>
      %c2 = arith.constant 2 : index
      %c0_21 = arith.constant 0 : index
      %c0_22 = arith.constant 0 : index
      %73 = vector.load %arg12[%c2, %c0_21, %c0_22] : memref<3x16x32xf32, #tpu.memory_space<vmem>>, vector<1x16x32xf32>
      %74 = vector.shape_cast %73 : vector<1x16x32xf32> to vector<16x32xf32>
      %c0_23 = arith.constant 0 : index
      %c0_24 = arith.constant 0 : index
      %c0_25 = arith.constant 0 : index
      %75 = vector.load %arg13[%c0_23, %c0_24, %c0_25] : memref<3x16x32xf32, #tpu.memory_space<vmem>>, vector<1x16x32xf32>
      %76 = vector.shape_cast %75 : vector<1x16x32xf32> to vector<16x32xf32>
      %c1_26 = arith.constant 1 : index
      %c0_27 = arith.constant 0 : index
      %c0_28 = arith.constant 0 : index
      %77 = vector.load %arg13[%c1_26, %c0_27, %c0_28] : memref<3x16x32xf32, #tpu.memory_space<vmem>>, vector<1x16x32xf32>
      %78 = vector.shape_cast %77 : vector<1x16x32xf32> to vector<16x32xf32>
      %c2_29 = arith.constant 2 : index
      %c0_30 = arith.constant 0 : index
      %c0_31 = arith.constant 0 : index
      %79 = vector.load %arg13[%c2_29, %c0_30, %c0_31] : memref<3x16x32xf32, #tpu.memory_space<vmem>>, vector<1x16x32xf32>
      %80 = vector.shape_cast %79 : vector<1x16x32xf32> to vector<16x32xf32>
      %c0_32 = arith.constant 0 : index
      %c0_33 = arith.constant 0 : index
      %c0_34 = arith.constant 0 : index
      %81 = vector.load %arg14[%c0_32, %c0_33, %c0_34] : memref<2x16x128xf32, #tpu.memory_space<vmem>>, vector<1x16x128xf32>
      %82 = vector.shape_cast %81 : vector<1x16x128xf32> to vector<16x128xf32>
      %c1_35 = arith.constant 1 : index
      %c0_36 = arith.constant 0 : index
      %c0_37 = arith.constant 0 : index
      %83 = vector.load %arg14[%c1_35, %c0_36, %c0_37] : memref<2x16x128xf32, #tpu.memory_space<vmem>>, vector<1x16x128xf32>
      %84 = vector.shape_cast %83 : vector<1x16x128xf32> to vector<16x128xf32>
      %c0_i32_38 = arith.constant 0 : i32
      %c16_i32 = arith.constant 16 : i32
      %85 = arith.muli %c0_i32_38, %c16_i32 : i32
      %86 = tpu.assume_multiple %85, 16 : i32
      %87 = arith.index_cast %86 : i32 to index
      %c0_39 = arith.constant 0 : index
      %88 = vector.load %arg15[%87, %c0_39] : memref<64x32xf32, #tpu.memory_space<vmem>>, vector<16x32xf32>
      %89 = arith.truncf %74 : vector<16x32xf32> to vector<16x32xbf16>
      %c0_40 = arith.constant 0 : index
      %c0_41 = arith.constant 0 : index
      %90 = vector.load %arg4[%c0_40, %c0_41] : memref<32x32xbf16, #tpu.memory_space<vmem>>, vector<32x32xbf16>
      %cst_42 = arith.constant dense<0.000000e+00> : vector<16x32xf32>
      %91 = tpu.matmul %89, %90, %cst_42 {dimension_numbers = #tpu.dot_dimension_numbers<[1], [0], [0], [1], [0, 0, 1, 1], [], []>} : vector<16x32xbf16>, vector<32x32xbf16>, vector<16x32xf32> -> vector<16x32xf32>
      %92 = arith.addf %88, %91 : vector<16x32xf32>
      %93 = arith.addf %92, %12 : vector<16x32xf32>
      %94 = arith.mulf %70, %14 : vector<16x32xf32>
      %95 = arith.mulf %16, %93 : vector<16x32xf32>
      %96 = arith.addf %94, %95 : vector<16x32xf32>
      %cst_43 = arith.constant 1.800000e+00 : f32
      %97 = vector.broadcast %cst_43 : f32 to vector<16x32xf32>
      %98 = arith.mulf %97, %72 : vector<16x32xf32>
      %cst_44 = arith.constant 0.00999999977 : f32
      %99 = vector.broadcast %cst_44 : f32 to vector<16x32xf32>
      %100 = arith.addf %99, %98 : vector<16x32xf32>
      %101 = arith.subf %96, %100 : vector<16x32xf32>
      %cst_45 = arith.constant 0.000000e+00 : f32
      %102 = vector.broadcast %cst_45 : f32 to vector<16x32xf32>
      %103 = arith.cmpf ogt, %101, %102 : vector<16x32xf32>
      %104 = arith.extui %103 : vector<16x32xi1> to vector<16x32xi32>
      %105 = arith.sitofp %104 : vector<16x32xi32> to vector<16x32xf32>
      %106 = arith.mulf %105, %100 : vector<16x32xf32>
      %107 = arith.subf %96, %106 : vector<16x32xf32>
      %108 = arith.mulf %18, %72 : vector<16x32xf32>
      %109 = arith.mulf %20, %105 : vector<16x32xf32>
      %110 = arith.addf %108, %109 : vector<16x32xf32>
      %111 = arith.truncf %105 : vector<16x32xf32> to vector<16x32xbf16>
      %c0_46 = arith.constant 0 : index
      %c0_47 = arith.constant 0 : index
      %112 = vector.load %arg6[%c0_46, %c0_47] : memref<32x32xbf16, #tpu.memory_space<vmem>>, vector<32x32xbf16>
      %cst_48 = arith.constant dense<0.000000e+00> : vector<16x32xf32>
      %113 = tpu.matmul %111, %112, %cst_48 {dimension_numbers = #tpu.dot_dimension_numbers<[1], [0], [0], [1], [0, 0, 1, 1], [], []>} : vector<16x32xbf16>, vector<32x32xbf16>, vector<16x32xf32> -> vector<16x32xf32>
      %114 = arith.truncf %80 : vector<16x32xf32> to vector<16x32xbf16>
      %c0_49 = arith.constant 0 : index
      %c0_50 = arith.constant 0 : index
      %115 = vector.load %arg7[%c0_49, %c0_50] : memref<32x32xbf16, #tpu.memory_space<vmem>>, vector<32x32xbf16>
      %cst_51 = arith.constant dense<0.000000e+00> : vector<16x32xf32>
      %116 = tpu.matmul %114, %115, %cst_51 {dimension_numbers = #tpu.dot_dimension_numbers<[1], [0], [0], [1], [0, 0, 1, 1], [], []>} : vector<16x32xbf16>, vector<32x32xbf16>, vector<16x32xf32> -> vector<16x32xf32>
      %117 = arith.addf %113, %116 : vector<16x32xf32>
      %118 = arith.addf %117, %33 : vector<16x32xf32>
      %119 = arith.mulf %76, %35 : vector<16x32xf32>
      %120 = arith.mulf %37, %118 : vector<16x32xf32>
      %121 = arith.addf %119, %120 : vector<16x32xf32>
      %cst_52 = arith.constant 1.800000e+00 : f32
      %122 = vector.broadcast %cst_52 : f32 to vector<16x32xf32>
      %123 = arith.mulf %122, %78 : vector<16x32xf32>
      %cst_53 = arith.constant 0.00999999977 : f32
      %124 = vector.broadcast %cst_53 : f32 to vector<16x32xf32>
      %125 = arith.addf %124, %123 : vector<16x32xf32>
      %126 = arith.subf %121, %125 : vector<16x32xf32>
      %cst_54 = arith.constant 0.000000e+00 : f32
      %127 = vector.broadcast %cst_54 : f32 to vector<16x32xf32>
      %128 = arith.cmpf ogt, %126, %127 : vector<16x32xf32>
      %129 = arith.extui %128 : vector<16x32xi1> to vector<16x32xi32>
      %130 = arith.sitofp %129 : vector<16x32xi32> to vector<16x32xf32>
      %131 = arith.mulf %130, %125 : vector<16x32xf32>
      %132 = arith.subf %121, %131 : vector<16x32xf32>
      %133 = arith.mulf %39, %78 : vector<16x32xf32>
      %134 = arith.mulf %41, %130 : vector<16x32xf32>
      %135 = arith.addf %133, %134 : vector<16x32xf32>
      %136 = arith.truncf %130 : vector<16x32xf32> to vector<16x32xbf16>
      %c0_55 = arith.constant 0 : index
      %c0_56 = arith.constant 0 : index
      %137 = vector.load %arg9[%c0_55, %c0_56] : memref<32x128xbf16, #tpu.memory_space<vmem>>, vector<32x128xbf16>
      %cst_57 = arith.constant dense<0.000000e+00> : vector<16x128xf32>
      %138 = tpu.matmul %136, %137, %cst_57 {dimension_numbers = #tpu.dot_dimension_numbers<[1], [0], [0], [1], [0, 0, 1, 1], [], []>} : vector<16x32xbf16>, vector<32x128xbf16>, vector<16x128xf32> -> vector<16x128xf32>
      %139 = arith.addf %138, %45 : vector<16x128xf32>
      %140 = arith.mulf %82, %48 : vector<16x128xf32>
      %141 = arith.mulf %51, %139 : vector<16x128xf32>
      %142 = arith.addf %140, %141 : vector<16x128xf32>
      %cst_58 = arith.constant 1.800000e+00 : f32
      %143 = vector.broadcast %cst_58 : f32 to vector<16x128xf32>
      %144 = arith.mulf %143, %84 : vector<16x128xf32>
      %cst_59 = arith.constant 0.00999999977 : f32
      %145 = vector.broadcast %cst_59 : f32 to vector<16x128xf32>
      %146 = arith.addf %145, %144 : vector<16x128xf32>
      %147 = arith.subf %142, %146 : vector<16x128xf32>
      %cst_60 = arith.constant 0.000000e+00 : f32
      %148 = vector.broadcast %cst_60 : f32 to vector<16x128xf32>
      %149 = arith.cmpf ogt, %147, %148 : vector<16x128xf32>
      %150 = arith.extui %149 : vector<16x128xi1> to vector<16x128xi32>
      %151 = arith.sitofp %150 : vector<16x128xi32> to vector<16x128xf32>
      %152 = arith.mulf %151, %146 : vector<16x128xf32>
      %153 = arith.subf %142, %152 : vector<16x128xf32>
      %154 = arith.mulf %54, %84 : vector<16x128xf32>
      %155 = arith.mulf %57, %151 : vector<16x128xf32>
      %156 = arith.addf %154, %155 : vector<16x128xf32>
      %157 = arith.truncf %151 : vector<16x128xf32> to vector<16x128xbf16>
      %158 = arith.index_cast %c0_i32_38 : i32 to index
      %c0_61 = arith.constant 0 : index
      %c0_62 = arith.constant 0 : index
      %159 = vector.load %arg11[%158, %c0_61, %c0_62] : memref<4x16x128xbf16, #tpu.memory_space<vmem>>, vector<1x16x128xbf16>
      %160 = vector.shape_cast %159 : vector<1x16x128xbf16> to vector<16x128xbf16>
      %161 = vector.shape_cast %157 : vector<16x128xbf16> to vector<1x16x128xbf16>
      tpu.vector_store %arg11[%158, %c0_61, %c0_62], %161 {strides = array<i32>} : memref<4x16x128xbf16, #tpu.memory_space<vmem>>, vector<1x16x128xbf16>,
      %c1_i32 = arith.constant 1 : i32
      %c16_i32_63 = arith.constant 16 : i32
      %162 = arith.muli %c1_i32, %c16_i32_63 : i32
      %163 = tpu.assume_multiple %162, 16 : i32
      %164 = arith.index_cast %163 : i32 to index
      %c0_64 = arith.constant 0 : index
      %165 = vector.load %arg15[%164, %c0_64] : memref<64x32xf32, #tpu.memory_space<vmem>>, vector<16x32xf32>
      %166 = arith.truncf %105 : vector<16x32xf32> to vector<16x32xbf16>
      %c0_65 = arith.constant 0 : index
      %c0_66 = arith.constant 0 : index
      %167 = vector.load %arg4[%c0_65, %c0_66] : memref<32x32xbf16, #tpu.memory_space<vmem>>, vector<32x32xbf16>
      %cst_67 = arith.constant dense<0.000000e+00> : vector<16x32xf32>
      %168 = tpu.matmul %166, %167, %cst_67 {dimension_numbers = #tpu.dot_dimension_numbers<[1], [0], [0], [1], [0, 0, 1, 1], [], []>} : vector<16x32xbf16>, vector<32x32xbf16>, vector<16x32xf32> -> vector<16x32xf32>
      %169 = arith.addf %165, %168 : vector<16x32xf32>
      %170 = arith.addf %169, %12 : vector<16x32xf32>
      %171 = arith.mulf %107, %14 : vector<16x32xf32>
      %172 = arith.mulf %16, %170 : vector<16x32xf32>
      %173 = arith.addf %171, %172 : vector<16x32xf32>
      %cst_68 = arith.constant 1.800000e+00 : f32
      %174 = vector.broadcast %cst_68 : f32 to vector<16x32xf32>
      %175 = arith.mulf %174, %110 : vector<16x32xf32>
      %cst_69 = arith.constant 0.00999999977 : f32
      %176 = vector.broadcast %cst_69 : f32 to vector<16x32xf32>
      %177 = arith.addf %176, %175 : vector<16x32xf32>
      %178 = arith.subf %173, %177 : vector<16x32xf32>
      %cst_70 = arith.constant 0.000000e+00 : f32
      %179 = vector.broadcast %cst_70 : f32 to vector<16x32xf32>
      %180 = arith.cmpf ogt, %178, %179 : vector<16x32xf32>
      %181 = arith.extui %180 : vector<16x32xi1> to vector<16x32xi32>
      %182 = arith.sitofp %181 : vector<16x32xi32> to vector<16x32xf32>
      %183 = arith.mulf %182, %177 : vector<16x32xf32>
      %184 = arith.subf %173, %183 : vector<16x32xf32>
      %185 = arith.mulf %18, %110 : vector<16x32xf32>
      %186 = arith.mulf %20, %182 : vector<16x32xf32>
      %187 = arith.addf %185, %186 : vector<16x32xf32>
      %188 = arith.truncf %182 : vector<16x32xf32> to vector<16x32xbf16>
      %c0_71 = arith.constant 0 : index
      %c0_72 = arith.constant 0 : index
      %189 = vector.load %arg6[%c0_71, %c0_72] : memref<32x32xbf16, #tpu.memory_space<vmem>>, vector<32x32xbf16>
      %cst_73 = arith.constant dense<0.000000e+00> : vector<16x32xf32>
      %190 = tpu.matmul %188, %189, %cst_73 {dimension_numbers = #tpu.dot_dimension_numbers<[1], [0], [0], [1], [0, 0, 1, 1], [], []>} : vector<16x32xbf16>, vector<32x32xbf16>, vector<16x32xf32> -> vector<16x32xf32>
      %191 = arith.truncf %130 : vector<16x32xf32> to vector<16x32xbf16>
      %c0_74 = arith.constant 0 : index
      %c0_75 = arith.constant 0 : index
      %192 = vector.load %arg7[%c0_74, %c0_75] : memref<32x32xbf16, #tpu.memory_space<vmem>>, vector<32x32xbf16>
      %cst_76 = arith.constant dense<0.000000e+00> : vector<16x32xf32>
      %193 = tpu.matmul %191, %192, %cst_76 {dimension_numbers = #tpu.dot_dimension_numbers<[1], [0], [0], [1], [0, 0, 1, 1], [], []>} : vector<16x32xbf16>, vector<32x32xbf16>, vector<16x32xf32> -> vector<16x32xf32>
      %194 = arith.addf %190, %193 : vector<16x32xf32>
      %195 = arith.addf %194, %33 : vector<16x32xf32>
      %196 = arith.mulf %132, %35 : vector<16x32xf32>
      %197 = arith.mulf %37, %195 : vector<16x32xf32>
      %198 = arith.addf %196, %197 : vector<16x32xf32>
      %cst_77 = arith.constant 1.800000e+00 : f32
      %199 = vector.broadcast %cst_77 : f32 to vector<16x32xf32>
      %200 = arith.mulf %199, %135 : vector<16x32xf32>
      %cst_78 = arith.constant 0.00999999977 : f32
      %201 = vector.broadcast %cst_78 : f32 to vector<16x32xf32>
      %202 = arith.addf %201, %200 : vector<16x32xf32>
      %203 = arith.subf %198, %202 : vector<16x32xf32>
      %cst_79 = arith.constant 0.000000e+00 : f32
      %204 = vector.broadcast %cst_79 : f32 to vector<16x32xf32>
      %205 = arith.cmpf ogt, %203, %204 : vector<16x32xf32>
      %206 = arith.extui %205 : vector<16x32xi1> to vector<16x32xi32>
      %207 = arith.sitofp %206 : vector<16x32xi32> to vector<16x32xf32>
      %208 = arith.mulf %207, %202 : vector<16x32xf32>
      %209 = arith.subf %198, %208 : vector<16x32xf32>
      %210 = arith.mulf %39, %135 : vector<16x32xf32>
      %211 = arith.mulf %41, %207 : vector<16x32xf32>
      %212 = arith.addf %210, %211 : vector<16x32xf32>
      %213 = arith.truncf %207 : vector<16x32xf32> to vector<16x32xbf16>
      %c0_80 = arith.constant 0 : index
      %c0_81 = arith.constant 0 : index
      %214 = vector.load %arg9[%c0_80, %c0_81] : memref<32x128xbf16, #tpu.memory_space<vmem>>, vector<32x128xbf16>
      %cst_82 = arith.constant dense<0.000000e+00> : vector<16x128xf32>
      %215 = tpu.matmul %213, %214, %cst_82 {dimension_numbers = #tpu.dot_dimension_numbers<[1], [0], [0], [1], [0, 0, 1, 1], [], []>} : vector<16x32xbf16>, vector<32x128xbf16>, vector<16x128xf32> -> vector<16x128xf32>
      %216 = arith.addf %215, %45 : vector<16x128xf32>
      %217 = arith.mulf %153, %48 : vector<16x128xf32>
      %218 = arith.mulf %51, %216 : vector<16x128xf32>
      %219 = arith.addf %217, %218 : vector<16x128xf32>
      %cst_83 = arith.constant 1.800000e+00 : f32
      %220 = vector.broadcast %cst_83 : f32 to vector<16x128xf32>
      %221 = arith.mulf %220, %156 : vector<16x128xf32>
      %cst_84 = arith.constant 0.00999999977 : f32
      %222 = vector.broadcast %cst_84 : f32 to vector<16x128xf32>
      %223 = arith.addf %222, %221 : vector<16x128xf32>
      %224 = arith.subf %219, %223 : vector<16x128xf32>
      %cst_85 = arith.constant 0.000000e+00 : f32
      %225 = vector.broadcast %cst_85 : f32 to vector<16x128xf32>
      %226 = arith.cmpf ogt, %224, %225 : vector<16x128xf32>
      %227 = arith.extui %226 : vector<16x128xi1> to vector<16x128xi32>
      %228 = arith.sitofp %227 : vector<16x128xi32> to vector<16x128xf32>
      %229 = arith.mulf %228, %223 : vector<16x128xf32>
      %230 = arith.subf %219, %229 : vector<16x128xf32>
      %231 = arith.mulf %54, %156 : vector<16x128xf32>
      %232 = arith.mulf %57, %228 : vector<16x128xf32>
      %233 = arith.addf %231, %232 : vector<16x128xf32>
      %234 = arith.truncf %228 : vector<16x128xf32> to vector<16x128xbf16>
      %235 = arith.index_cast %c1_i32 : i32 to index
      %c0_86 = arith.constant 0 : index
      %c0_87 = arith.constant 0 : index
      %236 = vector.load %arg11[%235, %c0_86, %c0_87] : memref<4x16x128xbf16, #tpu.memory_space<vmem>>, vector<1x16x128xbf16>
      %237 = vector.shape_cast %236 : vector<1x16x128xbf16> to vector<16x128xbf16>
      %238 = vector.shape_cast %234 : vector<16x128xbf16> to vector<1x16x128xbf16>
      tpu.vector_store %arg11[%235, %c0_86, %c0_87], %238 {strides = array<i32>} : memref<4x16x128xbf16, #tpu.memory_space<vmem>>, vector<1x16x128xbf16>,
      %c2_i32 = arith.constant 2 : i32
      %c16_i32_88 = arith.constant 16 : i32
      %239 = arith.muli %c2_i32, %c16_i32_88 : i32
      %240 = tpu.assume_multiple %239, 16 : i32
      %241 = arith.index_cast %240 : i32 to index
      %c0_89 = arith.constant 0 : index
      %242 = vector.load %arg15[%241, %c0_89] : memref<64x32xf32, #tpu.memory_space<vmem>>, vector<16x32xf32>
      %243 = arith.truncf %182 : vector<16x32xf32> to vector<16x32xbf16>
      %c0_90 = arith.constant 0 : index
      %c0_91 = arith.constant 0 : index
      %244 = vector.load %arg4[%c0_90, %c0_91] : memref<32x32xbf16, #tpu.memory_space<vmem>>, vector<32x32xbf16>
      %cst_92 = arith.constant dense<0.000000e+00> : vector<16x32xf32>
      %245 = tpu.matmul %243, %244, %cst_92 {dimension_numbers = #tpu.dot_dimension_numbers<[1], [0], [0], [1], [0, 0, 1, 1], [], []>} : vector<16x32xbf16>, vector<32x32xbf16>, vector<16x32xf32> -> vector<16x32xf32>
      %246 = arith.addf %242, %245 : vector<16x32xf32>
      %247 = arith.addf %246, %12 : vector<16x32xf32>
      %248 = arith.mulf %184, %14 : vector<16x32xf32>
      %249 = arith.mulf %16, %247 : vector<16x32xf32>
      %250 = arith.addf %248, %249 : vector<16x32xf32>
      %cst_93 = arith.constant 1.800000e+00 : f32
      %251 = vector.broadcast %cst_93 : f32 to vector<16x32xf32>
      %252 = arith.mulf %251, %187 : vector<16x32xf32>
      %cst_94 = arith.constant 0.00999999977 : f32
      %253 = vector.broadcast %cst_94 : f32 to vector<16x32xf32>
      %254 = arith.addf %253, %252 : vector<16x32xf32>
      %255 = arith.subf %250, %254 : vector<16x32xf32>
      %cst_95 = arith.constant 0.000000e+00 : f32
      %256 = vector.broadcast %cst_95 : f32 to vector<16x32xf32>
      %257 = arith.cmpf ogt, %255, %256 : vector<16x32xf32>
      %258 = arith.extui %257 : vector<16x32xi1> to vector<16x32xi32>
      %259 = arith.sitofp %258 : vector<16x32xi32> to vector<16x32xf32>
      %260 = arith.mulf %259, %254 : vector<16x32xf32>
      %261 = arith.subf %250, %260 : vector<16x32xf32>
      %262 = arith.mulf %18, %187 : vector<16x32xf32>
      %263 = arith.mulf %20, %259 : vector<16x32xf32>
      %264 = arith.addf %262, %263 : vector<16x32xf32>
      %265 = arith.truncf %259 : vector<16x32xf32> to vector<16x32xbf16>
      %c0_96 = arith.constant 0 : index
      %c0_97 = arith.constant 0 : index
      %266 = vector.load %arg6[%c0_96, %c0_97] : memref<32x32xbf16, #tpu.memory_space<vmem>>, vector<32x32xbf16>
      %cst_98 = arith.constant dense<0.000000e+00> : vector<16x32xf32>
      %267 = tpu.matmul %265, %266, %cst_98 {dimension_numbers = #tpu.dot_dimension_numbers<[1], [0], [0], [1], [0, 0, 1, 1], [], []>} : vector<16x32xbf16>, vector<32x32xbf16>, vector<16x32xf32> -> vector<16x32xf32>
      %268 = arith.truncf %207 : vector<16x32xf32> to vector<16x32xbf16>
      %c0_99 = arith.constant 0 : index
      %c0_100 = arith.constant 0 : index
      %269 = vector.load %arg7[%c0_99, %c0_100] : memref<32x32xbf16, #tpu.memory_space<vmem>>, vector<32x32xbf16>
      %cst_101 = arith.constant dense<0.000000e+00> : vector<16x32xf32>
      %270 = tpu.matmul %268, %269, %cst_101 {dimension_numbers = #tpu.dot_dimension_numbers<[1], [0], [0], [1], [0, 0, 1, 1], [], []>} : vector<16x32xbf16>, vector<32x32xbf16>, vector<16x32xf32> -> vector<16x32xf32>
      %271 = arith.addf %267, %270 : vector<16x32xf32>
      %272 = arith.addf %271, %33 : vector<16x32xf32>
      %273 = arith.mulf %209, %35 : vector<16x32xf32>
      %274 = arith.mulf %37, %272 : vector<16x32xf32>
      %275 = arith.addf %273, %274 : vector<16x32xf32>
      %cst_102 = arith.constant 1.800000e+00 : f32
      %276 = vector.broadcast %cst_102 : f32 to vector<16x32xf32>
      %277 = arith.mulf %276, %212 : vector<16x32xf32>
      %cst_103 = arith.constant 0.00999999977 : f32
      %278 = vector.broadcast %cst_103 : f32 to vector<16x32xf32>
      %279 = arith.addf %278, %277 : vector<16x32xf32>
      %280 = arith.subf %275, %279 : vector<16x32xf32>
      %cst_104 = arith.constant 0.000000e+00 : f32
      %281 = vector.broadcast %cst_104 : f32 to vector<16x32xf32>
      %282 = arith.cmpf ogt, %280, %281 : vector<16x32xf32>
      %283 = arith.extui %282 : vector<16x32xi1> to vector<16x32xi32>
      %284 = arith.sitofp %283 : vector<16x32xi32> to vector<16x32xf32>
      %285 = arith.mulf %284, %279 : vector<16x32xf32>
      %286 = arith.subf %275, %285 : vector<16x32xf32>
      %287 = arith.mulf %39, %212 : vector<16x32xf32>
      %288 = arith.mulf %41, %284 : vector<16x32xf32>
      %289 = arith.addf %287, %288 : vector<16x32xf32>
      %290 = arith.truncf %284 : vector<16x32xf32> to vector<16x32xbf16>
      %c0_105 = arith.constant 0 : index
      %c0_106 = arith.constant 0 : index
      %291 = vector.load %arg9[%c0_105, %c0_106] : memref<32x128xbf16, #tpu.memory_space<vmem>>, vector<32x128xbf16>
      %cst_107 = arith.constant dense<0.000000e+00> : vector<16x128xf32>
      %292 = tpu.matmul %290, %291, %cst_107 {dimension_numbers = #tpu.dot_dimension_numbers<[1], [0], [0], [1], [0, 0, 1, 1], [], []>} : vector<16x32xbf16>, vector<32x128xbf16>, vector<16x128xf32> -> vector<16x128xf32>
      %293 = arith.addf %292, %45 : vector<16x128xf32>
      %294 = arith.mulf %230, %48 : vector<16x128xf32>
      %295 = arith.mulf %51, %293 : vector<16x128xf32>
      %296 = arith.addf %294, %295 : vector<16x128xf32>
      %cst_108 = arith.constant 1.800000e+00 : f32
      %297 = vector.broadcast %cst_108 : f32 to vector<16x128xf32>
      %298 = arith.mulf %297, %233 : vector<16x128xf32>
      %cst_109 = arith.constant 0.00999999977 : f32
      %299 = vector.broadcast %cst_109 : f32 to vector<16x128xf32>
      %300 = arith.addf %299, %298 : vector<16x128xf32>
      %301 = arith.subf %296, %300 : vector<16x128xf32>
      %cst_110 = arith.constant 0.000000e+00 : f32
      %302 = vector.broadcast %cst_110 : f32 to vector<16x128xf32>
      %303 = arith.cmpf ogt, %301, %302 : vector<16x128xf32>
      %304 = arith.extui %303 : vector<16x128xi1> to vector<16x128xi32>
      %305 = arith.sitofp %304 : vector<16x128xi32> to vector<16x128xf32>
      %306 = arith.mulf %305, %300 : vector<16x128xf32>
      %307 = arith.subf %296, %306 : vector<16x128xf32>
      %308 = arith.mulf %54, %233 : vector<16x128xf32>
      %309 = arith.mulf %57, %305 : vector<16x128xf32>
      %310 = arith.addf %308, %309 : vector<16x128xf32>
      %311 = arith.truncf %305 : vector<16x128xf32> to vector<16x128xbf16>
      %312 = arith.index_cast %c2_i32 : i32 to index
      %c0_111 = arith.constant 0 : index
      %c0_112 = arith.constant 0 : index
      %313 = vector.load %arg11[%312, %c0_111, %c0_112] : memref<4x16x128xbf16, #tpu.memory_space<vmem>>, vector<1x16x128xbf16>
      %314 = vector.shape_cast %313 : vector<1x16x128xbf16> to vector<16x128xbf16>
      %315 = vector.shape_cast %311 : vector<16x128xbf16> to vector<1x16x128xbf16>
      tpu.vector_store %arg11[%312, %c0_111, %c0_112], %315 {strides = array<i32>} : memref<4x16x128xbf16, #tpu.memory_space<vmem>>, vector<1x16x128xbf16>,
      %c3_i32 = arith.constant 3 : i32
      %c16_i32_113 = arith.constant 16 : i32
      %316 = arith.muli %c3_i32, %c16_i32_113 : i32
      %317 = tpu.assume_multiple %316, 16 : i32
      %318 = arith.index_cast %317 : i32 to index
      %c0_114 = arith.constant 0 : index
      %319 = vector.load %arg15[%318, %c0_114] : memref<64x32xf32, #tpu.memory_space<vmem>>, vector<16x32xf32>
      %320 = arith.truncf %259 : vector<16x32xf32> to vector<16x32xbf16>
      %c0_115 = arith.constant 0 : index
      %c0_116 = arith.constant 0 : index
      %321 = vector.load %arg4[%c0_115, %c0_116] : memref<32x32xbf16, #tpu.memory_space<vmem>>, vector<32x32xbf16>
      %cst_117 = arith.constant dense<0.000000e+00> : vector<16x32xf32>
      %322 = tpu.matmul %320, %321, %cst_117 {dimension_numbers = #tpu.dot_dimension_numbers<[1], [0], [0], [1], [0, 0, 1, 1], [], []>} : vector<16x32xbf16>, vector<32x32xbf16>, vector<16x32xf32> -> vector<16x32xf32>
      %323 = arith.addf %319, %322 : vector<16x32xf32>
      %324 = arith.addf %323, %12 : vector<16x32xf32>
      %325 = arith.mulf %261, %14 : vector<16x32xf32>
      %326 = arith.mulf %16, %324 : vector<16x32xf32>
      %327 = arith.addf %325, %326 : vector<16x32xf32>
      %cst_118 = arith.constant 1.800000e+00 : f32
      %328 = vector.broadcast %cst_118 : f32 to vector<16x32xf32>
      %329 = arith.mulf %328, %264 : vector<16x32xf32>
      %cst_119 = arith.constant 0.00999999977 : f32
      %330 = vector.broadcast %cst_119 : f32 to vector<16x32xf32>
      %331 = arith.addf %330, %329 : vector<16x32xf32>
      %332 = arith.subf %327, %331 : vector<16x32xf32>
      %cst_120 = arith.constant 0.000000e+00 : f32
      %333 = vector.broadcast %cst_120 : f32 to vector<16x32xf32>
      %334 = arith.cmpf ogt, %332, %333 : vector<16x32xf32>
      %335 = arith.extui %334 : vector<16x32xi1> to vector<16x32xi32>
      %336 = arith.sitofp %335 : vector<16x32xi32> to vector<16x32xf32>
      %337 = arith.mulf %336, %331 : vector<16x32xf32>
      %338 = arith.subf %327, %337 : vector<16x32xf32>
      %339 = arith.mulf %18, %264 : vector<16x32xf32>
      %340 = arith.mulf %20, %336 : vector<16x32xf32>
      %341 = arith.addf %339, %340 : vector<16x32xf32>
      %342 = arith.truncf %336 : vector<16x32xf32> to vector<16x32xbf16>
      %c0_121 = arith.constant 0 : index
      %c0_122 = arith.constant 0 : index
      %343 = vector.load %arg6[%c0_121, %c0_122] : memref<32x32xbf16, #tpu.memory_space<vmem>>, vector<32x32xbf16>
      %cst_123 = arith.constant dense<0.000000e+00> : vector<16x32xf32>
      %344 = tpu.matmul %342, %343, %cst_123 {dimension_numbers = #tpu.dot_dimension_numbers<[1], [0], [0], [1], [0, 0, 1, 1], [], []>} : vector<16x32xbf16>, vector<32x32xbf16>, vector<16x32xf32> -> vector<16x32xf32>
      %345 = arith.truncf %284 : vector<16x32xf32> to vector<16x32xbf16>
      %c0_124 = arith.constant 0 : index
      %c0_125 = arith.constant 0 : index
      %346 = vector.load %arg7[%c0_124, %c0_125] : memref<32x32xbf16, #tpu.memory_space<vmem>>, vector<32x32xbf16>
      %cst_126 = arith.constant dense<0.000000e+00> : vector<16x32xf32>
      %347 = tpu.matmul %345, %346, %cst_126 {dimension_numbers = #tpu.dot_dimension_numbers<[1], [0], [0], [1], [0, 0, 1, 1], [], []>} : vector<16x32xbf16>, vector<32x32xbf16>, vector<16x32xf32> -> vector<16x32xf32>
      %348 = arith.addf %344, %347 : vector<16x32xf32>
      %349 = arith.addf %348, %33 : vector<16x32xf32>
      %350 = arith.mulf %286, %35 : vector<16x32xf32>
      %351 = arith.mulf %37, %349 : vector<16x32xf32>
      %352 = arith.addf %350, %351 : vector<16x32xf32>
      %cst_127 = arith.constant 1.800000e+00 : f32
      %353 = vector.broadcast %cst_127 : f32 to vector<16x32xf32>
      %354 = arith.mulf %353, %289 : vector<16x32xf32>
      %cst_128 = arith.constant 0.00999999977 : f32
      %355 = vector.broadcast %cst_128 : f32 to vector<16x32xf32>
      %356 = arith.addf %355, %354 : vector<16x32xf32>
      %357 = arith.subf %352, %356 : vector<16x32xf32>
      %cst_129 = arith.constant 0.000000e+00 : f32
      %358 = vector.broadcast %cst_129 : f32 to vector<16x32xf32>
      %359 = arith.cmpf ogt, %357, %358 : vector<16x32xf32>
      %360 = arith.extui %359 : vector<16x32xi1> to vector<16x32xi32>
      %361 = arith.sitofp %360 : vector<16x32xi32> to vector<16x32xf32>
      %362 = arith.mulf %361, %356 : vector<16x32xf32>
      %363 = arith.subf %352, %362 : vector<16x32xf32>
      %364 = arith.mulf %39, %289 : vector<16x32xf32>
      %365 = arith.mulf %41, %361 : vector<16x32xf32>
      %366 = arith.addf %364, %365 : vector<16x32xf32>
      %367 = arith.truncf %361 : vector<16x32xf32> to vector<16x32xbf16>
      %c0_130 = arith.constant 0 : index
      %c0_131 = arith.constant 0 : index
      %368 = vector.load %arg9[%c0_130, %c0_131] : memref<32x128xbf16, #tpu.memory_space<vmem>>, vector<32x128xbf16>
      %cst_132 = arith.constant dense<0.000000e+00> : vector<16x128xf32>
      %369 = tpu.matmul %367, %368, %cst_132 {dimension_numbers = #tpu.dot_dimension_numbers<[1], [0], [0], [1], [0, 0, 1, 1], [], []>} : vector<16x32xbf16>, vector<32x128xbf16>, vector<16x128xf32> -> vector<16x128xf32>
      %370 = arith.addf %369, %45 : vector<16x128xf32>
      %371 = arith.mulf %307, %48 : vector<16x128xf32>
      %372 = arith.mulf %51, %370 : vector<16x128xf32>
      %373 = arith.addf %371, %372 : vector<16x128xf32>
      %cst_133 = arith.constant 1.800000e+00 : f32
      %374 = vector.broadcast %cst_133 : f32 to vector<16x128xf32>
      %375 = arith.mulf %374, %310 : vector<16x128xf32>
      %cst_134 = arith.constant 0.00999999977 : f32
      %376 = vector.broadcast %cst_134 : f32 to vector<16x128xf32>
      %377 = arith.addf %376, %375 : vector<16x128xf32>
      %378 = arith.subf %373, %377 : vector<16x128xf32>
      %cst_135 = arith.constant 0.000000e+00 : f32
      %379 = vector.broadcast %cst_135 : f32 to vector<16x128xf32>
      %380 = arith.cmpf ogt, %378, %379 : vector<16x128xf32>
      %381 = arith.extui %380 : vector<16x128xi1> to vector<16x128xi32>
      %382 = arith.sitofp %381 : vector<16x128xi32> to vector<16x128xf32>
      %383 = arith.mulf %382, %377 : vector<16x128xf32>
      %384 = arith.subf %373, %383 : vector<16x128xf32>
      %385 = arith.mulf %54, %310 : vector<16x128xf32>
      %386 = arith.mulf %57, %382 : vector<16x128xf32>
      %387 = arith.addf %385, %386 : vector<16x128xf32>
      %388 = arith.truncf %382 : vector<16x128xf32> to vector<16x128xbf16>
      %389 = arith.index_cast %c3_i32 : i32 to index
      %c0_136 = arith.constant 0 : index
      %c0_137 = arith.constant 0 : index
      %390 = vector.load %arg11[%389, %c0_136, %c0_137] : memref<4x16x128xbf16, #tpu.memory_space<vmem>>, vector<1x16x128xbf16>
      %391 = vector.shape_cast %390 : vector<1x16x128xbf16> to vector<16x128xbf16>
      %392 = vector.shape_cast %388 : vector<16x128xbf16> to vector<1x16x128xbf16>
      tpu.vector_store %arg11[%389, %c0_136, %c0_137], %392 {strides = array<i32>} : memref<4x16x128xbf16, #tpu.memory_space<vmem>>, vector<1x16x128xbf16>,
      %c4_i32 = arith.constant 4 : i32
      %c0_138 = arith.constant 0 : index
      %c0_139 = arith.constant 0 : index
      %c0_140 = arith.constant 0 : index
      %393 = vector.load %arg12[%c0_138, %c0_139, %c0_140] : memref<3x16x32xf32, #tpu.memory_space<vmem>>, vector<1x16x32xf32>
      %394 = vector.shape_cast %393 : vector<1x16x32xf32> to vector<16x32xf32>
      %395 = vector.shape_cast %338 : vector<16x32xf32> to vector<1x16x32xf32>
      tpu.vector_store %arg12[%c0_138, %c0_139, %c0_140], %395 {strides = array<i32>} : memref<3x16x32xf32, #tpu.memory_space<vmem>>, vector<1x16x32xf32>,
      %c1_141 = arith.constant 1 : index
      %c0_142 = arith.constant 0 : index
      %c0_143 = arith.constant 0 : index
      %396 = vector.load %arg12[%c1_141, %c0_142, %c0_143] : memref<3x16x32xf32, #tpu.memory_space<vmem>>, vector<1x16x32xf32>
      %397 = vector.shape_cast %396 : vector<1x16x32xf32> to vector<16x32xf32>
      %398 = vector.shape_cast %341 : vector<16x32xf32> to vector<1x16x32xf32>
      tpu.vector_store %arg12[%c1_141, %c0_142, %c0_143], %398 {strides = array<i32>} : memref<3x16x32xf32, #tpu.memory_space<vmem>>, vector<1x16x32xf32>,
      %c2_144 = arith.constant 2 : index
      %c0_145 = arith.constant 0 : index
      %c0_146 = arith.constant 0 : index
      %399 = vector.load %arg12[%c2_144, %c0_145, %c0_146] : memref<3x16x32xf32, #tpu.memory_space<vmem>>, vector<1x16x32xf32>
      %400 = vector.shape_cast %399 : vector<1x16x32xf32> to vector<16x32xf32>
      %401 = vector.shape_cast %336 : vector<16x32xf32> to vector<1x16x32xf32>
      tpu.vector_store %arg12[%c2_144, %c0_145, %c0_146], %401 {strides = array<i32>} : memref<3x16x32xf32, #tpu.memory_space<vmem>>, vector<1x16x32xf32>,
      %c0_147 = arith.constant 0 : index
      %c0_148 = arith.constant 0 : index
      %c0_149 = arith.constant 0 : index
      %402 = vector.load %arg13[%c0_147, %c0_148, %c0_149] : memref<3x16x32xf32, #tpu.memory_space<vmem>>, vector<1x16x32xf32>
      %403 = vector.shape_cast %402 : vector<1x16x32xf32> to vector<16x32xf32>
      %404 = vector.shape_cast %363 : vector<16x32xf32> to vector<1x16x32xf32>
      tpu.vector_store %arg13[%c0_147, %c0_148, %c0_149], %404 {strides = array<i32>} : memref<3x16x32xf32, #tpu.memory_space<vmem>>, vector<1x16x32xf32>,
      %c1_150 = arith.constant 1 : index
      %c0_151 = arith.constant 0 : index
      %c0_152 = arith.constant 0 : index
      %405 = vector.load %arg13[%c1_150, %c0_151, %c0_152] : memref<3x16x32xf32, #tpu.memory_space<vmem>>, vector<1x16x32xf32>
      %406 = vector.shape_cast %405 : vector<1x16x32xf32> to vector<16x32xf32>
      %407 = vector.shape_cast %366 : vector<16x32xf32> to vector<1x16x32xf32>
      tpu.vector_store %arg13[%c1_150, %c0_151, %c0_152], %407 {strides = array<i32>} : memref<3x16x32xf32, #tpu.memory_space<vmem>>, vector<1x16x32xf32>,
      %c2_153 = arith.constant 2 : index
      %c0_154 = arith.constant 0 : index
      %c0_155 = arith.constant 0 : index
      %408 = vector.load %arg13[%c2_153, %c0_154, %c0_155] : memref<3x16x32xf32, #tpu.memory_space<vmem>>, vector<1x16x32xf32>
      %409 = vector.shape_cast %408 : vector<1x16x32xf32> to vector<16x32xf32>
      %410 = vector.shape_cast %361 : vector<16x32xf32> to vector<1x16x32xf32>
      tpu.vector_store %arg13[%c2_153, %c0_154, %c0_155], %410 {strides = array<i32>} : memref<3x16x32xf32, #tpu.memory_space<vmem>>, vector<1x16x32xf32>,
      %c0_156 = arith.constant 0 : index
      %c0_157 = arith.constant 0 : index
      %c0_158 = arith.constant 0 : index
      %411 = vector.load %arg14[%c0_156, %c0_157, %c0_158] : memref<2x16x128xf32, #tpu.memory_space<vmem>>, vector<1x16x128xf32>
      %412 = vector.shape_cast %411 : vector<1x16x128xf32> to vector<16x128xf32>
      %413 = vector.shape_cast %384 : vector<16x128xf32> to vector<1x16x128xf32>
      tpu.vector_store %arg14[%c0_156, %c0_157, %c0_158], %413 {strides = array<i32>} : memref<2x16x128xf32, #tpu.memory_space<vmem>>, vector<1x16x128xf32>,
      %c1_159 = arith.constant 1 : index
      %c0_160 = arith.constant 0 : index
      %c0_161 = arith.constant 0 : index
      %414 = vector.load %arg14[%c1_159, %c0_160, %c0_161] : memref<2x16x128xf32, #tpu.memory_space<vmem>>, vector<1x16x128xf32>
      %415 = vector.shape_cast %414 : vector<1x16x128xf32> to vector<16x128xf32>
      %416 = vector.shape_cast %387 : vector<16x128xf32> to vector<1x16x128xf32>
      tpu.vector_store %arg14[%c1_159, %c0_160, %c0_161], %416 {strides = array<i32>} : memref<2x16x128xf32, #tpu.memory_space<vmem>>, vector<1x16x128xf32>,
    } else {
    }
    return
  }
  func.func @transform_0(%arg0: i32, %arg1: i32) -> (i32, i32, i32, i32) {
    %c0_i32 = arith.constant 0 : i32
    %c0_i32_0 = arith.constant 0 : i32
    %c0_i32_1 = arith.constant 0 : i32
    return %arg0, %arg1, %c0_i32, %c0_i32_0 : i32, i32, i32, i32
  }
  func.func @transform_1(%arg0: i32, %arg1: i32) -> (i32, i32) {
    %c0_i32 = arith.constant 0 : i32
    %c0_i32_0 = arith.constant 0 : i32
    %c0_i32_1 = arith.constant 0 : i32
    return %c0_i32, %c0_i32_0 : i32, i32
  }
  func.func @transform_2(%arg0: i32, %arg1: i32) -> (i32, i32) {
    %c0_i32 = arith.constant 0 : i32
    %c0_i32_0 = arith.constant 0 : i32
    %c0_i32_1 = arith.constant 0 : i32
    return %c0_i32, %c0_i32_0 : i32, i32
  }
  func.func @transform_3(%arg0: i32, %arg1: i32) -> (i32, i32) {
    %c0_i32 = arith.constant 0 : i32
    %c0_i32_0 = arith.constant 0 : i32
    %c0_i32_1 = arith.constant 0 : i32
    return %c0_i32, %c0_i32_0 : i32, i32
  }
  func.func @transform_4(%arg0: i32, %arg1: i32) -> (i32, i32) {
    %c0_i32 = arith.constant 0 : i32
    %c0_i32_0 = arith.constant 0 : i32
    %c0_i32_1 = arith.constant 0 : i32
    return %c0_i32, %c0_i32_0 : i32, i32
  }
  func.func @transform_5(%arg0: i32, %arg1: i32) -> (i32, i32) {
    %c0_i32 = arith.constant 0 : i32
    %c0_i32_0 = arith.constant 0 : i32
    %c0_i32_1 = arith.constant 0 : i32
    return %c0_i32, %c0_i32_0 : i32, i32
  }
  func.func @transform_6(%arg0: i32, %arg1: i32) -> (i32, i32) {
    %c0_i32 = arith.constant 0 : i32
    %c0_i32_0 = arith.constant 0 : i32
    %c0_i32_1 = arith.constant 0 : i32
    return %c0_i32, %c0_i32_0 : i32, i32
  }
  func.func @transform_7(%arg0: i32, %arg1: i32) -> (i32, i32) {
    %c0_i32 = arith.constant 0 : i32
    %c0_i32_0 = arith.constant 0 : i32
    %c0_i32_1 = arith.constant 0 : i32
    return %c0_i32, %c0_i32_0 : i32, i32
  }
  func.func @transform_8(%arg0: i32, %arg1: i32) -> (i32, i32) {
    %c0_i32 = arith.constant 0 : i32
    %c0_i32_0 = arith.constant 0 : i32
    %c0_i32_1 = arith.constant 0 : i32
    return %c0_i32, %c0_i32_0 : i32, i32
  }
  func.func @transform_9(%arg0: i32, %arg1: i32) -> (i32, i32, i32) {
    %c0_i32 = arith.constant 0 : i32
    %c0_i32_0 = arith.constant 0 : i32
    return %arg1, %arg0, %c0_i32 : i32, i32, i32
  }
}

</mosaic_0001>

<bundles_post_ra>
// kernel: tpu_custom_call.1
= control target key start
LH: loop header
LB: loop body
LE: loop exit
PB: predicated region body
PF: predicated region fallthrough
CT: control target
= control target key end

     0   :  { %14 = vsyncpa [#allocation7], 0  ;;  %s5466_s0 = inlined_call_operand.vmem [shape: bf16[1,2,64,16], index: 0, kind: input, shape index: {}]   ;;  %s5467_s1 = inlined_call_operand.vmem [shape: bf16[16,32], index: 1, kind: input, shape index: {}]   ;;  %s5468_s2 = inlined_call_operand.vmem [shape: bf16[32,32], index: 2, kind: input, shape index: {}]   ;;  %s5469_s3 = inlined_call_operand.vmem [shape: f32[8,32], index: 3, kind: input, shape index: {}]   ;;  %s5470_s4 = inlined_call_operand.vmem [shape: bf16[32,32], index: 4, kind: input, shape index: {}]   ;;  %s5471_s5 = inlined_call_operand.vmem [shape: bf16[32,32], index: 5, kind: input, shape index: {}]   ;;  %s5472_s6 = inlined_call_operand.vmem [shape: f32[8,32], index: 6, kind: input, shape index: {}]   ;;  %s5473_s7 = inlined_call_operand.vmem [shape: bf16[32,128], index: 7, kind: input, shape index: {}]   ;;  %s5474_s8 = inlined_call_operand.vmem [shape: f32[8,128], index: 8, kind: input, shape index: {}]   ;;  %s5475_s9 = inlined_call_operand.hbm [shape: bf16[8,16,128], index: 9, kind: output, shape index: {}]  }
   0x1   :  { %16 = vsyncpa [#allocation7 + $0x1], 0  ;;  %s4173_s30 = smov 0   ;;  %s4175_s10 = smov 0  }
   0x2   :  { %s4177_s11 = smov 0   ;;  %s4179_s12 = smov 0  }
   0x3   :  { %s4181_s13 = smov 0   ;;  %s4183_s14 = smov 0  }
   0x4 LB: > { %s3317_s15 = sadd.s32 4294967295, %s4114_s14   ;;  %s3318_s16 = sadd.s32 4294967294, %s4114_s14   ;;  %s4114_s14 = sphi %s4183_s14, %s22_s14   ;;  %s4110_s13 = sphi %s4181_s13, %s5482_s13   ;;  %s4106_s12 = sphi %s4179_s12, %s5481_s12   ;;  %s4102_s11 = sphi %s4177_s11, %s5480_s11   ;;  %s4098_s10 = sphi %s4175_s10, %s5479_s10   ;;  %s4094_s30 = sphi %s4173_s30, %s5478_s30  }
   0x5   : > { %s31_s17 = sadd.s32 1, %s4110_s13  ;;  %s239_s18 = sadd.s32 1, %s4102_s11 }
   0x6   : > { %p32_p0 = scmp.ge.s32.totalorder %s31_s17, 2  ;;  %p249_p1 = scmp.ne.s32.totalorder %s4102_s11, %s4098_s10 }
   0x7   : > { %p250_p2 = scmp.eq.s32.totalorder %s3317_s15, 1  ;;  %p255_p3 = scmp.ne.s32.totalorder %s4098_s10, %s4094_s30 }
   0x8   : > { %s5484_s17 = smov (%p32_p0, %s31_s17), 0  ;;  %p256_p5 = scmp.eq.s32.totalorder %s3318_s16, 1 }
   0x9   : > { %p4213_p4 = por %p250_p2, %p249_p1  ;;  %s234_s20 = ssub.s32 %s4110_s13, %s5484_s17 }
   0xa   : > { %p3321_p6 = scmp.ge.s32.totalorder %s4114_s14, 1  ;;  %p237_p7 = scmp.eq.s32.totalorder %s234_s20, 0 }
   0xb   : > { %p4220_p8 = por %p256_p5, %p255_p3  ;;  %p310_p9 = scmp.lt.s32.totalorder %s4114_s14, 3 }
   0xc   : > { %s4226_s22 = scalar_select %p237_p7, %s4102_s11, %s239_s18  }
   0xd   : > { %p311_p10 = pnand %p3321_p6, %p310_p9 }
   0xe   : > { %s347_s23 = sand.u32 (!%p311_p10), 1, %s4098_s10   ;;  %v362_v0 = vld [vmem:[%s5469_s3] sm:$0xff] (!%p311_p10)  ;;  %v367_v1 = vlaneseq (!%p311_p10)  ;;  %p352_p11 = scmp.lt.s32.totalorder (!%p311_p10), %s4106_s12, 1  ;;  %vm477_vm0 = vcmask (!%p311_p10), 130048   ;;  %vm555_vm1 = vcmask (!%p311_p10), 261120  }
   0xf   : > { %314 = sbr.rel (%p311_p10) target bundleno = 2868 (0xb34), region = 56  ;;  %v391_v2 = vld [vmem:[%s5472_s6] sm:$0xff] (!%p311_p10)  ;;  %s4238_s28 = sshll.u32 (!%p311_p10), %s347_s23, 5  ;;  %v364_v3 = vrot.slane (!%p311_p10), %v362_v0, 1 }
  0x10   : > { %v393_v4 = vrot.slane (!%p311_p10), %v391_v2, 1  ;;  %v3971_v5 = vld [vmem:[%s5467_s1] sm:$0xff] (!%p311_p10)   ;;  %v368_v6 = vshrl.u32 (!%p311_p10), %v367_v1, 7  ;;  %s4295_s29 = scalar_lea.vmem (!%p311_p10), [#allocation6], %s4238_s28  ;;  %p3334_p12 = scmp.ne.s32.totalorder (!%p311_p10), %s4106_s12, 0 }
  0x11   : > { %v366_v7 = vadd.f32 (!%p311_p10), %v364_v3, %v362_v0  ;;  %3658 = vmatprep.subr.bf16.mxu0 (!%p311_p10), %v3971_v5  ;;  %3908 = vmatprep.subr.bf16.mxu1 (!%p311_p10), %v3971_v5  ;;  %v420_v19 = vld [vmem:[%s5474_s8] sm:$0xff] (!%p311_p10) }
  0x12   : > { %v395_v8 = vadd.f32 (!%p311_p10), %v393_v4, %v391_v2  ;;  %v369_v9 = vsub.s32 (!%p311_p10), 0, %v368_v6  ;;  %v377_v10 = vsub.s32 (!%p311_p10), 2, %v368_v6  ;;  %v381_v11 = vsub.s32 (!%p311_p10), 3, %v368_v6  ;;  %3659 = vmatpush3.bf16.msra.mxu0 (!%p311_p10), %v3971_v5  ;;  %3909 = vmatpush3.bf16.msra.mxu1 (!%p311_p10), %v3971_v5 }
  0x13   : > { %v385_v12 = vsub.s32 (!%p311_p10), 4, %v368_v6  ;;  %v389_v13 = vsub.s32 (!%p311_p10), 5, %v368_v6  ;;  %v427_v14 = vsub.s32 (!%p311_p10), 1, %v368_v6 }
  0x14   : > { %v370_v15 = vrot.slane (!%p311_p10), %v362_v0, %v369_v9  ;;  %v4244_v16 = vrot.slane (!%p311_p10), %v366_v7, %v369_v9  ;;  %v4246_v17 = vrot.slane (!%p311_p10), %v362_v0, %v377_v10  ;;  %v4248_v18 = vrot.slane (!%p311_p10), %v362_v0, %v381_v11 }
  0x15   : > { %v4256_v20 = vrot.slane (!%p311_p10), %v362_v0, %v385_v12  ;;  %v4258_v21 = vrot.slane (!%p311_p10), %v362_v0, %v389_v13  ;;  %v4260_v22 = vrot.slane (!%p311_p10), %v391_v2, %v369_v9  ;;  %v4262_v23 = vrot.slane (!%p311_p10), %v395_v8, %v369_v9 }
  0x16   : > { %s353_s16 = scalar_select %p352_p11, %s4106_s12, 1  ;;  %v4264_v25 = vrot.slane %v391_v2, %v377_v10  ;;  %v4266_v26 = vrot.slane %v391_v2, %v381_v11  ;;  %v4268_v27 = vrot.slane %v391_v2, %v385_v12  ;;  %v4270_v28 = vrot.slane %v391_v2, %v389_v13 }
  0x17   : > { %v4272_v30 = vrot.slane %v420_v19, %v369_v9  ;;  %v4274_v31 = vrot.slane %v420_v19, %v427_v14  ;;  %v4276_v32 = vrot.slane %v420_v19, %v377_v10  ;;  %v4278_v33 = vrot.slane %v420_v19, %v381_v11  ;;  %v3976_v45 = vld [vmem:[%s5470_s4] sm:$0xff] (!%p3334_p12)   ;;  %v3977_v47 = vld [vmem:[%s5470_s4 + $0x8] sm:$0xff] (!%p3334_p12)  }
  0x18   : > { %s3514_s18 = sshll.u32 %s353_s16, 5  ;;  %v4281_v35 = vrot.slane %v420_v19, %v385_v12  ;;  %v4116_v46 = vmov (!%p3334_p12), 0.0   ;;  %vm4117_vm2 = vmmov (!%p3334_p12), 0   ;;  %v572_v52 = vmul.f32 (!%p3334_p12), 0.0, %v4246_v17  ;;  %v3978_v59 = vld [vmem:[%s5468_s2] sm:$0xff] (!%p3334_p12)   ;;  %v3979_v63 = vld [vmem:[%s5468_s2 + $0x8] sm:$0xff] (!%p3334_p12)  }
  0x19   : > { %s358_s27 = scalar_lea.vmem %s5466_s0, %s3514_s18  ;;  %3668 = vmatprep.subr.bf16.mxu0 (!%p3334_p12), %v4116_v46  ;;  %3676 = vmatprep.subr.bf16.mxu1 (!%p3334_p12), %v4116_v46  ;;  %v3980_v0 = vld [vmem:[%s5473_s7] sm:$0xff] (!%p3334_p12)   ;;  %v3981_v1 = vld [vmem:[%s5473_s7 + $0x8] sm:$0xff] (!%p3334_p12)   ;;  %v655_v7 = vmul.f32 (!%p3334_p12), 0.0, %v4264_v25  ;;  %v589_v9 = vmul.f32 (!%p3334_p12), 0.0, %v4256_v20 }
  0x1a   : > { %v3972_v24 = vld [vmem:[%s358_s27] sm:$0xff]   ;;  %v3973_v29 = vld [vmem:[%s358_s27 + $0x10] sm:$0xff]   ;;  %v3974_v34 = vld [vmem:[%s358_s27 + $0x8] sm:$0xff]  }
  0x1b   : > { %3660 = vmatprep.mubr.msk.bf16.mxu0 %vm477_vm0, %v3972_v24  ;;  %3664 = vmatprep.mubr.msk.bf16.mxu1 %vm477_vm0, %v3973_v29  ;;  %v3975_v36 = vld [vmem:[%s358_s27 + $0x18] sm:$0xff]   ;;  %v3983_v2 = vld [vmem:[%s5470_s4] sm:$0xff] (!%p3334_p12)   ;;  %v3985_v3 = vld [vmem:[%s5470_s4 + $0x8] sm:$0xff] (!%p3334_p12)  }
  0x1c   : > { %3661 = vmatmul.mubr.msk.bf16.vlgmr.msra.gmra.mrb[0].mxu0 %vm477_vm0, %v3974_v34  ;;  %3665 = vmatmul.mubr.msk.bf16.vlgmr.msra.gmra.mrb[0].mxu1 %vm477_vm0, %v3975_v36 }
  0x1d   : > { %3669 = vmatpush3.bf16.msra.mxu0 (!%p3334_p12), %v3976_v45  ;;  %3672 = vmatprep.mubr.msk.bf16.mxu0 (!%p3334_p12), %vm4117_vm2, %v4116_v46 }
  0x1e   : > { %3670 = vmatprep.subr.bf16.mxu0 (!%p3334_p12), %v4116_v46  ;;  %3680 = vmatprep.mubr.msk.bf16.mxu1 (!%p3334_p12), %vm4117_vm2, %v4116_v46 }
  0x1f   : > { %3677 = vmatpush3.bf16.msra.mxu1 (!%p3334_p12), %v3980_v0 }
  0x20   : > { %3678 = vmatprep.subr.bf16.mxu1 (!%p3334_p12), %v4116_v46 }
  0x21   : > { %3671 = vmatpush3.bf16.msra.mxu0 (!%p3334_p12), %v3977_v47 }
  0x22   : > { %3684 = vmatprep.subr.bf16.mxu0 (!%p3334_p12), %v4116_v46 }
  0x23   : > { %3679 = vmatpush3.bf16.msra.mxu1 (!%p3334_p12), %v3981_v1 }
  0x24   : > { %3692 = vmatprep.subr.bf16.mxu1 (!%p3334_p12), %v4116_v46 }
  0xed   : > { %567 = sbr.rel (%p3334_p12) target bundleno = 1434 (0x59a), region = 60 }
  0xef   : > { %v3662_v37 = vpop.f32.mrb[0].mxu0  ;;  %v3666_v38 = vpop.f32.mrb[0].mxu1 }
  0xf0   : > { %558 = vst.msk [vmem:[#allocation5 + $0x10] sm:$0xff] %vm555_vm1, %v3662_v37  ;;  %v524_v39 = vpop.f32.mrb[1].mxu0  ;;  %562 = vst.msk [vmem:[#allocation5 + $0x30] sm:$0xff] %vm555_vm1, %v3666_v38  ;;  %v540_v40 = vpop.f32.mrb[1].mxu1 }
  0xf1   : > { %556 = vst.msk [vmem:[#allocation5] sm:$0xff] %vm555_vm1, %v524_v39  ;;  %v3663_v41 = vpop.f32.mrb[2].mxu0  ;;  %560 = vst.msk [vmem:[#allocation5 + $0x20] sm:$0xff] %vm555_vm1, %v540_v40  ;;  %v3667_v42 = vpop.f32.mrb[2].mxu1 }
  0xf2   : > { %559 = vst.msk [vmem:[#allocation5 + $0x18] sm:$0xff] %vm555_vm1, %v3663_v41  ;;  %v527_v43 = vpop.f32.mrb[3].mxu0  ;;  %563 = vst.msk [vmem:[#allocation5 + $0x38] sm:$0xff] %vm555_vm1, %v3667_v42  ;;  %v543_v44 = vpop.f32.mrb[3].mxu1 }
  0xf3   : > { %557 = vst.msk [vmem:[#allocation5 + $0x8] sm:$0xff] %vm555_vm1, %v527_v43  ;;  %561 = vst.msk [vmem:[#allocation5 + $0x28] sm:$0xff] %vm555_vm1, %v543_v44 }
  0xf7   : > { %v771_v34 = vld [vmem:[#allocation5 + $0x10] sm:$0xff] }
  0xf8   : > { %v568_v48 = vld [vmem:[#allocation5] sm:$0xff] }
  0xf9   : > { %v570_v50 = vadd.f32 %v568_v48, %v370_v15 }
  0xfa   : > { %v569_v49 = vld [vmem:[#allocation5 + $0x8] sm:$0xff] }
  0xfb   : > { %v571_v51 = vadd.f32 %v569_v49, %v370_v15  ;;  %v573_v53 = vmul.f32 %v570_v50, %v4248_v18 }
  0xfd   : > { %v574_v54 = vmul.f32 %v571_v51, %v4248_v18  ;;  %v4315_v55 = vadd.f32 %v573_v53, %v572_v52 }
  0xff   : > { %v4317_v56 = vadd.f32 %v574_v54, %v572_v52  ;;  %v3335_v57 = vadd.f32 -0.01, %v4315_v55 }
 0x101   : > { %v3336_v58 = vadd.f32 -0.01, %v4317_v56  ;;  %vm579_vm3 = vcmp.gt.f32.partialorder %v3335_v57, 0.0 }
 0x102   : > { %v3337_v60 = vsel %vm579_vm3, 1.0, %v4116_v46 }
 0x103   : > { %vm580_vm4 = vcmp.gt.f32.partialorder %v3336_v58, 0.0  ;;  %v590_v5 = vmul.f32 %v3337_v60, %v4258_v21  ;;  %v585_v14 = vmul.f32 0.01, %v3337_v60 }
 0x104   : > { %v3338_v61 = vsel %vm580_vm4, 1.0, %v4116_v46 }
 0x105   : > { %v594_v62 = vpack.c.bf16 %v3338_v61, %v3337_v60  ;;  %v591_v15 = vmul.f32 %v3338_v61, %v4258_v21  ;;  %v592_v29 = vadd.f32 %v590_v5, %v589_v9  ;;  %v586_v36 = vmul.f32 0.01, %v3338_v61  ;;  %v3982_v61 = vld [vmem:[%s5471_s5] sm:$0xff]  }
 0x106   : > { %v587_v39 = vsub.f32 %v4315_v55, %v585_v14 }
 0x107   : > { %3673 = vmatmul.mubr.msk.bf16.vlgmr.msra.gmra.mrb[0].mxu0 %vm555_vm1, %v594_v62  ;;  %v593_v41 = vadd.f32 %v591_v15, %v589_v9  ;;  %v840_v44 = vmul.f32 1.8, %v592_v29  ;;  %v588_v48 = vsub.f32 %v4317_v56, %v586_v36 }
 0x108   : > { %3685 = vmatpush3.bf16.msra.mxu0 %v3978_v59  ;;  %3688 = vmatprep.mubr.msk.bf16.mxu0 %vm4117_vm2, %v4116_v46  ;;  %v834_v52 = vmul.f32 %v587_v39, %v4246_v17 }
 0x109   : > { %3686 = vmatprep.subr.bf16.mxu0 %v4116_v46  ;;  %v841_v57 = vmul.f32 1.8, %v593_v41  ;;  %v842_v60 = vadd.f32 0.01, %v840_v44  ;;  %v3993_v44 = vld [vmem:[%s5470_s4 + $0x8] sm:$0xff]  }
 0x10c   : > { %3687 = vmatpush3.bf16.msra.mxu0 %v3979_v63  ;;  %v835_v63 = vmul.f32 %v588_v48, %v4246_v17 }
 0x10d   : > { %3700 = vmatprep.subr.bf16.mxu0 %v4116_v46 }
 0x10f   : > { %3689 = vmatmul.mubr.msk.bf16.vlgmr.msra.gmra.mrb[4].mxu0 %vm555_vm1, %v594_v62 }
 0x110   : > { %3704 = vmatprep.mubr.msk.bf16.mxu0 %vm4117_vm2, %v4116_v46  ;;  %3701 = vmatpush3.bf16.msra.mxu0 %v3983_v2 }
 0x111   : > { %3702 = vmatprep.subr.bf16.mxu0 %v4116_v46 }
 0x114   : > { %3703 = vmatpush3.bf16.msra.mxu0 %v3985_v3 }
 0x115   : > { %3716 = vmatprep.subr.bf16.mxu0 %v4116_v46 }
 0x1da   : > { %v648_v4 = vpop.f32.mrb[0].mxu0 }
 0x1db   : > { %v649_v6 = vadd.f32 %v648_v4, %v4260_v22  ;;  %v3674_v8 = vpop.f32.mrb[1].mxu0  ;;  %v843_v4 = vadd.f32 0.01, %v841_v57 }
 0x1dc   : > { %v651_v10 = vpop.f32.mrb[2].mxu0  ;;  %v856_v8 = vmul.f32 %v592_v29, %v4256_v20 }
 0x1dd   : > { %v656_v11 = vmul.f32 %v649_v6, %v4266_v26  ;;  %v652_v12 = vadd.f32 %v651_v10, %v4260_v22  ;;  %v3675_v13 = vpop.f32.mrb[3].mxu0  ;;  %v772_v22 = vld [vmem:[#allocation5 + $0x18] sm:$0xff]  ;;  %v3984_v6 = vld [vmem:[%s5471_s5 + $0x8] sm:$0xff]  }
 0x1de   : > { %v857_v13 = vmul.f32 %v593_v41, %v4256_v20  ;;  %v3987_v41 = vld [vmem:[%s5468_s2 + $0x8] sm:$0xff]  }
 0x1df   : > { %v4360_v19 = vadd.f32 %v656_v11, %v655_v7  ;;  %v657_v24 = vmul.f32 %v652_v12, %v4266_v26 }
 0x1e1   : > { %v3342_v37 = vadd.f32 -0.01, %v4360_v19  ;;  %v4364_v38 = vadd.f32 %v657_v24, %v655_v7  ;;  %v3986_v24 = vld [vmem:[%s5468_s2] sm:$0xff]  }
 0x1e2   : > { %v823_v40 = vpop.f32.mrb[4].mxu0 }
 0x1e3   : > { %vm662_vm5 = vcmp.gt.f32.partialorder %v3342_v37, 0.0  ;;  %v3343_v42 = vadd.f32 -0.01, %v4364_v38  ;;  %v830_v43 = vadd.f32 %v823_v40, %v771_v34  ;;  %v3690_v45 = vpop.f32.mrb[5].mxu0 }
 0x1e4   : > { %v4369_v47 = vsel %vm662_vm5, 1.0, %v4116_v46  ;;  %v826_v49 = vpop.f32.mrb[6].mxu0 }
 0x1e5   : > { %v4373_v50 = vmul.f32 0.01, %v4369_v47  ;;  %vm663_vm6 = vcmp.gt.f32.partialorder %v3343_v42, 0.0  ;;  %v832_v51 = vadd.f32 %v830_v43, %v4244_v16  ;;  %v3691_v53 = vpop.f32.mrb[7].mxu0  ;;  %v831_v55 = vadd.f32 %v826_v49, %v772_v22  ;;  %v3988_v22 = vld [vmem:[%s5473_s7] sm:$0xff]   ;;  %v3989_v42 = vld [vmem:[%s5473_s7 + $0x8] sm:$0xff]  }
 0x1e6   : > { %v4378_v54 = vsel %vm663_vm6, 1.0, %v4116_v46  ;;  %v3991_v43 = vld [vmem:[%s5470_s4] sm:$0xff]   ;;  %v738_v49 = vmul.f32 0.0, %v4274_v31 }
 0x1e7   : > { %v670_v58 = vsub.f32 %v4360_v19, %v4373_v50  ;;  %v4383_v56 = vmul.f32 0.01, %v4378_v54  ;;  %v836_v59 = vmul.f32 %v832_v51, %v4248_v18  ;;  %v833_v62 = vadd.f32 %v831_v55, %v4244_v16 }
 0x1e8   : > { %v677_v0 = vpack.c.bf16 %v4378_v54, %v4369_v47 }
 0x1e9   : > { %v671_v1 = vsub.f32 %v4364_v38, %v4383_v56  ;;  %v4395_v2 = vadd.f32 %v836_v59, %v834_v52  ;;  %v837_v3 = vmul.f32 %v833_v62, %v4248_v18  ;;  %v672_v62 = vmul.f32 0.0, %v4268_v27 }
 0x1ea   : > { %3681 = vmatmul.mubr.msk.bf16.vlgmr.msra.gmra.mrb[0].mxu1 %vm555_vm1, %v677_v0 }
 0x1eb   : > { %v844_v5 = vsub.f32 %v4395_v2, %v842_v60  ;;  %3693 = vmatpush3.bf16.msra.mxu1 %v3982_v61  ;;  %3696 = vmatprep.mubr.msk.bf16.mxu1 %vm4117_vm2, %v4116_v46  ;;  %v4405_v7 = vadd.f32 %v837_v3, %v835_v63  ;;  %v673_v61 = vmul.f32 %v4369_v47, %v4270_v28 }
 0x1ec   : > { %3694 = vmatprep.subr.bf16.mxu1 %v4116_v46  ;;  %v674_v3 = vmul.f32 %v4378_v54, %v4270_v28 }
 0x1ed   : > { %vm846_vm7 = vcmp.gt.f32.partialorder %v844_v5, 0.0  ;;  %v845_v10 = vsub.f32 %v4405_v7, %v843_v4 }
 0x1ee   : > { %v3358_v9 = vsel %vm846_vm7, 1.0, %v4116_v46 }
 0x1ef   : > { %v4411_v11 = vmul.f32 %v3358_v9, %v842_v60  ;;  %v858_v12 = vmul.f32 %v3358_v9, %v4258_v21  ;;  %3695 = vmatpush3.bf16.msra.mxu1 %v3984_v6  ;;  %vm847_vm8 = vcmp.gt.f32.partialorder %v845_v10, 0.0  ;;  %v675_v10 = vadd.f32 %v673_v61, %v672_v62 }
 0x1f0   : > { %3708 = vmatprep.subr.bf16.mxu1 %v4116_v46  ;;  %v3359_v15 = vsel %vm847_vm8, 1.0, %v4116_v46 }
 0x1f1   : > { %v854_v14 = vsub.f32 %v4395_v2, %v4411_v11  ;;  %v4422_v29 = vadd.f32 %v858_v12, %v856_v8  ;;  %v4424_v34 = vmul.f32 %v3359_v15, %v843_v4  ;;  %v859_v36 = vmul.f32 %v3359_v15, %v4258_v21 }
 0x1f2   : > { %3697 = vmatmul.mubr.msk.bf16.vlgmr.msra.gmra.mrb[4].mxu1 %vm555_vm1, %v677_v0  ;;  %v862_v37 = vpack.c.bf16 %v3359_v15, %v3358_v9  ;;  %v1004_v38 = vmul.f32 %v675_v10, %v4268_v27 }
 0x1f3   : > { %3712 = vmatprep.mubr.msk.bf16.mxu1 %vm4117_vm2, %v4116_v46  ;;  %v855_v39 = vsub.f32 %v4405_v7, %v4424_v34  ;;  %v4433_v40 = vadd.f32 %v859_v36, %v857_v13  ;;  %3709 = vmatpush3.bf16.msra.mxu1 %v3988_v22  ;;  %v676_v36 = vadd.f32 %v674_v3, %v672_v62 }
 0x1f4   : > { %3705 = vmatmul.mubr.msk.bf16.vlgmr.msra.gmra.mrb[8].mxu0 %vm555_vm1, %v862_v37  ;;  %3710 = vmatprep.subr.bf16.mxu1 %v4116_v46  ;;  %v983_v62 = vmul.f32 %v671_v1, %v4264_v25  ;;  %v1174_v1 = vmul.f32 %v854_v14, %v4246_v17 }
 0x1f5   : > { %3717 = vmatpush3.bf16.msra.mxu0 %v3986_v24  ;;  %3720 = vmatprep.mubr.msk.bf16.mxu0 %vm4117_vm2, %v4116_v46  ;;  %v1175_v11 = vmul.f32 %v855_v39, %v4246_v17 }
 0x1f6   : > { %3718 = vmatprep.subr.bf16.mxu0 %v4116_v46 }
 0x1f7   : > { %3711 = vmatpush3.bf16.msra.mxu1 %v3989_v42 }
 0x1f8   : > { %3724 = vmatprep.subr.bf16.mxu1 %v4116_v46 }
 0x1f9   : > { %3719 = vmatpush3.bf16.msra.mxu0 %v3987_v41 }
 0x1fa   : > { %3732 = vmatprep.subr.bf16.mxu0 %v4116_v46 }
 0x1fc   : > { %3721 = vmatmul.mubr.msk.bf16.vlgmr.msra.gmra.mrb[12].mxu0 %vm555_vm1, %v862_v37 }
 0x1fd   : > { %3736 = vmatprep.mubr.msk.bf16.mxu0 %vm4117_vm2, %v4116_v46  ;;  %3733 = vmatpush3.bf16.msra.mxu0 %v3991_v43 }
 0x1fe   : > { %3734 = vmatprep.subr.bf16.mxu0 %v4116_v46 }
 0x201   : > { %3735 = vmatpush3.bf16.msra.mxu0 %v3993_v44 }
 0x202   : > { %3748 = vmatprep.subr.bf16.mxu0 %v4116_v46 }
 0x2bd   : > { %v731_v45 = vpop.f32.mrb[0].mxu1 }
 0x2be   : > { %v732_v48 = vadd.f32 %v731_v45, %v4272_v30  ;;  %v3682_v51 = vpop.f32.mrb[1].mxu1  ;;  %v988_v45 = vmul.f32 1.8, %v675_v10 }
 0x2bf   : > { %v734_v52 = vpop.f32.mrb[2].mxu1  ;;  %v982_v51 = vmul.f32 %v670_v58, %v4264_v25 }
 0x2c0   : > { %v739_v53 = vmul.f32 %v732_v48, %v4276_v32  ;;  %v735_v55 = vadd.f32 %v734_v52, %v4272_v30  ;;  %v3683_v57 = vpop.f32.mrb[3].mxu1  ;;  %v990_v61 = vadd.f32 0.01, %v988_v45  ;;  %v1181_v45 = vmul.f32 1.8, %v4433_v40 }
 0x2c1   : > { %v1111_v57 = vld [vmem:[#allocation5 + $0x20] sm:$0xff] }
 0x2c2   : > { %v4465_v59 = vadd.f32 %v739_v53, %v738_v49  ;;  %v740_v60 = vmul.f32 %v735_v55, %v4276_v32  ;;  %v989_v55 = vmul.f32 1.8, %v676_v36  ;;  %v1183_v7 = vadd.f32 0.01, %v1181_v45  ;;  %v3999_v45 = vld [vmem:[%s5470_s4] sm:$0xff]  }
 0x2c4   : > { %v3349_v63 = vadd.f32 -0.01, %v4465_v59  ;;  %v4472_v0 = vadd.f32 %v740_v60, %v738_v49 }
 0x2c5   : > { %v917_v4 = vpop.f32.mrb[4].mxu1 }
 0x2c6   : > { %vm745_vm9 = vcmp.gt.f32.partialorder %v3349_v63, 0.0  ;;  %v3350_v5 = vadd.f32 -0.01, %v4472_v0  ;;  %v3698_v6 = vpop.f32.mrb[5].mxu1 }
 0x2c7   : > { %v4478_v8 = vsel %vm745_vm9, 1.0, %v4116_v46  ;;  %v920_v9 = vpop.f32.mrb[6].mxu1  ;;  %v973_v47 = vpop.f32.mrb[8].mxu0  ;;  %v991_v6 = vadd.f32 0.01, %v989_v55 }
 0x2c8   : > { %v4481_v12 = vmul.f32 0.01, %v4478_v8  ;;  %vm746_vm10 = vcmp.gt.f32.partialorder %v3350_v5, 0.0  ;;  %v974_v13 = vadd.f32 %v973_v47, %v917_v4  ;;  %v3699_v15 = vpop.f32.mrb[7].mxu1  ;;  %v3706_v24 = vpop.f32.mrb[9].mxu0  ;;  %v1112_v4 = vld [vmem:[#allocation5 + $0x28] sm:$0xff] }
 0x2c9   : > { %v4484_v54 = vsel %vm746_vm10, 1.0, %v4116_v46  ;;  %v976_v37 = vpop.f32.mrb[10].mxu0 }
 0x2ca   : > { %v753_v41 = vsub.f32 %v4465_v59, %v4481_v12  ;;  %v4489_v22 = vmul.f32 0.01, %v4484_v54  ;;  %v3534_v42 = vpack.c.bf16 %v4484_v54, %v4478_v8  ;;  %v3707_v43 = vpop.f32.mrb[11].mxu0  ;;  %v980_v44 = vadd.f32 %v974_v13, %v4262_v23 }
 0x2cb   : > { %v977_v48 = vadd.f32 %v976_v37, %v920_v9  ;;  %v1180_v9 = vmul.f32 1.8, %v4422_v29  ;;  %v1005_v37 = vmul.f32 %v676_v36, %v4268_v27  ;;  %v3990_v36 = vld [vmem:[%s5471_s5] sm:$0xff]  }
 0x2cc   : > { %v754_v49 = vsub.f32 %v4472_v0, %v4489_v22  ;;  %3535 = vst [vmem:[%s4295_s29] sm:$0xff] %v3534_v42   ;;  %v984_v52 = vmul.f32 %v980_v44, %v4266_v26 }
 0x2cd   : > { %v981_v53 = vadd.f32 %v977_v48, %v4262_v23 }
 0x2ce   : > { %v4503_v60 = vadd.f32 %v984_v52, %v982_v51  ;;  %v1182_v51 = vadd.f32 0.01, %v1180_v9 }
 0x2cf   : > { %v985_v63 = vmul.f32 %v981_v53, %v4266_v26  ;;  %v1163_v3 = vpop.f32.mrb[12].mxu0 }
 0x2d0   : > { %v1170_v19 = vadd.f32 %v1163_v3, %v1111_v57  ;;  %v3722_v50 = vpop.f32.mrb[13].mxu0  ;;  %v992_v58 = vsub.f32 %v4503_v60, %v990_v61 }
 0x2d1   : > { %v4511_v5 = vadd.f32 %v985_v63, %v983_v62  ;;  %v1166_v47 = vpop.f32.mrb[14].mxu0 }
 0x2d2   : > { %v1172_v13 = vadd.f32 %v1170_v19, %v4244_v16  ;;  %v1171_v15 = vadd.f32 %v1166_v47, %v1112_v4  ;;  %v3723_v24 = vpop.f32.mrb[15].mxu0  ;;  %vm994_vm11 = vcmp.gt.f32.partialorder %v992_v58, 0.0  ;;  %v3992_v19 = vld [vmem:[%s5471_s5 + $0x8] sm:$0xff]   ;;  %v3994_v47 = vld [vmem:[%s5468_s2] sm:$0xff]  }
 0x2d3   : > { %v993_v56 = vsub.f32 %v4511_v5, %v991_v6  ;;  %v3366_v42 = vsel %vm994_vm11, 1.0, %v4116_v46 }
 0x2d4   : > { %v1176_v43 = vmul.f32 %v1172_v13, %v4248_v18  ;;  %v1173_v44 = vadd.f32 %v1171_v15, %v4244_v16  ;;  %v4526_v48 = vmul.f32 %v3366_v42, %v990_v61  ;;  %v1006_v10 = vmul.f32 %v3366_v42, %v4270_v28 }
 0x2d5   : > { %vm995_vm12 = vcmp.gt.f32.partialorder %v993_v56, 0.0  ;;  %v1196_v13 = vmul.f32 %v4422_v29, %v4256_v20  ;;  %v1197_v15 = vmul.f32 %v4433_v40, %v4256_v20  ;;  %v3995_v40 = vld [vmem:[%s5468_s2 + $0x8] sm:$0xff]  }
 0x2d6   : > { %v3367_v52 = vsel %vm995_vm12, 1.0, %v4116_v46  ;;  %v4530_v2 = vadd.f32 %v1176_v43, %v1174_v1  ;;  %v1177_v14 = vmul.f32 %v1173_v44, %v4248_v18  ;;  %v1002_v53 = vsub.f32 %v4503_v60, %v4526_v48  ;;  %v3996_v43 = vld [vmem:[%s5473_s7] sm:$0xff]   ;;  %v3997_v44 = vld [vmem:[%s5473_s7 + $0x8] sm:$0xff]  }
 0x2d7   : > { %v4542_v55 = vmul.f32 %v3367_v52, %v991_v6  ;;  %v1007_v57 = vmul.f32 %v3367_v52, %v4270_v28  ;;  %v1010_v61 = vpack.c.bf16 %v3367_v52, %v3366_v42  ;;  %v4548_v34 = vadd.f32 %v1006_v10, %v1004_v38  ;;  %v4001_v10 = vld [vmem:[%s5470_s4 + $0x8] sm:$0xff]  }
 0x2d8   : > { %v1184_v62 = vsub.f32 %v4530_v2, %v1182_v51  ;;  %v4546_v63 = vadd.f32 %v1177_v14, %v1175_v11  ;;  %v755_v52 = vmul.f32 0.0, %v4278_v33  ;;  %v757_v11 = vmul.f32 %v4484_v54, %v4281_v35 }
 0x2d9   : > { %v1003_v39 = vsub.f32 %v4511_v5, %v4542_v55  ;;  %3713 = vmatmul.mubr.msk.bf16.vlgmr.msra.gmra.mrb[8].mxu1 %vm555_vm1, %v1010_v61  ;;  %v4553_v3 = vadd.f32 %v1007_v57, %v1005_v37 }
 0x2da   : > { %vm1186_vm13 = vcmp.gt.f32.partialorder %v1184_v62, 0.0  ;;  %v1185_v4 = vsub.f32 %v4546_v63, %v1183_v7  ;;  %3725 = vmatpush3.bf16.msra.mxu1 %v3990_v36  ;;  %3728 = vmatprep.mubr.msk.bf16.mxu1 %vm4117_vm2, %v4116_v46  ;;  %v759_v36 = vadd.f32 %v757_v11, %v755_v52 }
 0x2db   : > { %v3380_v50 = vsel %vm1186_vm13, 1.0, %v4116_v46  ;;  %3726 = vmatprep.subr.bf16.mxu1 %v4116_v46 }
 0x2dc   : > { %v4563_v58 = vmul.f32 %v3380_v50, %v1182_v51  ;;  %v1198_v6 = vmul.f32 %v3380_v50, %v4258_v21  ;;  %vm1187_vm14 = vcmp.gt.f32.partialorder %v1185_v4, 0.0  ;;  %v756_v51 = vmul.f32 %v4478_v8, %v4281_v35 }
 0x2dd   : > { %v3381_v9 = vsel %vm1187_vm14, 1.0, %v4116_v46 }
 0x2de   : > { %v1194_v24 = vsub.f32 %v4530_v2, %v4563_v58  ;;  %v4576_v38 = vmul.f32 %v3381_v9, %v1183_v7  ;;  %v1199_v56 = vmul.f32 %v3381_v9, %v4258_v21  ;;  %3727 = vmatpush3.bf16.msra.mxu1 %v3992_v19  ;;  %v1202_v1 = vpack.c.bf16 %v3381_v9, %v3380_v50 }
 0x2df   : > { %3740 = vmatprep.subr.bf16.mxu1 %v4116_v46  ;;  %v4580_v37 = vadd.f32 %v1198_v6, %v1196_v13  ;;  %v758_v14 = vadd.f32 %v756_v51, %v755_v52  ;;  %v1071_v19 = vmul.f32 %v753_v41, %v4274_v31  ;;  %v1078_v6 = vmul.f32 1.8, %v759_v36 }
 0x2e0   : > { %v1195_v42 = vsub.f32 %v4546_v63, %v4576_v38  ;;  %3737 = vmatmul.mubr.msk.bf16.vlgmr.msra.gmra.mrb[16].mxu0 %vm555_vm1, %v1202_v1  ;;  %v4585_v29 = vadd.f32 %v1199_v56, %v1197_v15  ;;  %v1072_v13 = vmul.f32 %v754_v49, %v4274_v31  ;;  %v1094_v52 = vmul.f32 %v759_v36, %v4278_v33 }
 0x2e1   : > { %3729 = vmatmul.mubr.msk.bf16.vlgmr.msra.gmra.mrb[12].mxu1 %vm555_vm1, %v1010_v61  ;;  %3749 = vmatpush3.bf16.msra.mxu0 %v3994_v47  ;;  %v1077_v62 = vmul.f32 1.8, %v758_v14  ;;  %v1080_v12 = vadd.f32 0.01, %v1078_v6  ;;  %v1093_v49 = vmul.f32 %v758_v14, %v4278_v33 }
 0x2e2   : > { %3750 = vmatprep.subr.bf16.mxu0 %v4116_v46  ;;  %3752 = vmatprep.mubr.msk.bf16.mxu0 %vm4117_vm2, %v4116_v46 }
 0x2e3   : > { %3744 = vmatprep.mubr.msk.bf16.mxu1 %vm4117_vm2, %v4116_v46  ;;  %3741 = vmatpush3.bf16.msra.mxu1 %v3996_v43  ;;  %v1079_v47 = vadd.f32 0.01, %v1077_v62 }
 0x2e4   : > { %3742 = vmatprep.subr.bf16.mxu1 %v4116_v46 }
 0x2e5   : > { %3751 = vmatpush3.bf16.msra.mxu0 %v3995_v40 }
 0x2e6   : > { %3764 = vmatprep.subr.bf16.mxu0 %v4116_v46 }
 0x2e7   : > { %3743 = vmatpush3.bf16.msra.mxu1 %v3997_v44 }
 0x2e8   : > { %3753 = vmatmul.mubr.msk.bf16.vlgmr.msra.gmra.mrb[20].mxu0 %vm555_vm1, %v1202_v1  ;;  %3756 = vmatprep.subr.bf16.mxu1 %v4116_v46 }
 0x2e9   : > { %3768 = vmatprep.mubr.msk.bf16.mxu0 %vm4117_vm2, %v4116_v46  ;;  %3765 = vmatpush3.bf16.msra.mxu0 %v3999_v45 }
 0x2ea   : > { %3766 = vmatprep.subr.bf16.mxu0 %v4116_v46 }
 0x2ed   : > { %3767 = vmatpush3.bf16.msra.mxu0 %v4001_v10 }
 0x3ac   : > { %v1064_v57 = vpop.f32.mrb[8].mxu1 }
 0x3ad   : > { %v1065_v61 = vadd.f32 %v1064_v57, %v4272_v30  ;;  %v3714_v7 = vpop.f32.mrb[9].mxu1 }
 0x3ae   : > { %v1067_v4 = vpop.f32.mrb[10].mxu1 }
 0x3af   : > { %v1073_v8 = vmul.f32 %v1065_v61, %v4276_v32  ;;  %v1068_v50 = vadd.f32 %v1067_v4, %v4272_v30  ;;  %v3715_v9 = vpop.f32.mrb[11].mxu1  ;;  %v1328_v4 = vmul.f32 1.8, %v4548_v34 }
 0x3b0   : > { %v1451_v9 = vld [vmem:[#allocation5 + $0x30] sm:$0xff] }
 0x3b1   : > { %v4627_v54 = vadd.f32 %v1073_v8, %v1071_v19  ;;  %v1074_v15 = vmul.f32 %v1068_v50, %v4276_v32  ;;  %v1329_v8 = vmul.f32 1.8, %v4553_v3  ;;  %v1330_v48 = vadd.f32 0.01, %v1328_v4 }
 0x3b3   : > { %v1081_v56 = vsub.f32 %v4627_v54, %v1079_v47  ;;  %v4635_v59 = vadd.f32 %v1074_v15, %v1072_v13  ;;  %v1313_v41 = vpop.f32.mrb[16].mxu0 }
 0x3b4   : > { %v1257_v1 = vpop.f32.mrb[12].mxu1  ;;  %v3738_v40 = vpop.f32.mrb[17].mxu0 }
 0x3b5   : > { %vm1083_vm15 = vcmp.gt.f32.partialorder %v1081_v56, 0.0  ;;  %v1082_v43 = vsub.f32 %v4635_v59, %v1080_v12  ;;  %v1314_v44 = vadd.f32 %v1313_v41, %v1257_v1  ;;  %v3730_v45 = vpop.f32.mrb[13].mxu1  ;;  %v1316_v10 = vpop.f32.mrb[18].mxu0  ;;  %v1452_v40 = vld [vmem:[#allocation5 + $0x38] sm:$0xff] }
 0x3b6   : > { %v3371_v51 = vsel %vm1083_vm15, 1.0, %v4116_v46  ;;  %v1260_v0 = vpop.f32.mrb[14].mxu1  ;;  %v3739_v22 = vpop.f32.mrb[19].mxu0 }
 0x3b7   : > { %v4641_v11 = vmul.f32 %v3371_v51, %v1079_v47  ;;  %v1095_v57 = vmul.f32 %v3371_v51, %v4281_v35  ;;  %vm1084_vm0 = vcmp.gt.f32.partialorder %v1082_v43, 0.0  ;;  %v1320_v61 = vadd.f32 %v1314_v44, %v4262_v23  ;;  %v3731_v62 = vpop.f32.mrb[15].mxu1 }
 0x3b8   : > { %v3372_v7 = vsel %vm1084_vm0, 1.0, %v4116_v46  ;;  %v1317_v19 = vadd.f32 %v1316_v10, %v1260_v0  ;;  %v1322_v47 = vmul.f32 %v1002_v53, %v4264_v25  ;;  %v1331_v10 = vadd.f32 0.01, %v1329_v8 }
 0x3b9   : > { %v1091_v14 = vsub.f32 %v4627_v54, %v4641_v11  ;;  %v4650_v36 = vmul.f32 %v3372_v7, %v1080_v12  ;;  %v1096_v50 = vmul.f32 %v3372_v7, %v4281_v35  ;;  %v3537_v6 = vpack.c.bf16 %v3372_v7, %v3371_v51 }
 0x3ba   : > { %v1324_v13 = vmul.f32 %v1320_v61, %v4266_v26  ;;  %v1321_v15 = vadd.f32 %v1317_v19, %v4262_v23  ;;  %v4659_v56 = vadd.f32 %v1095_v57, %v1093_v49  ;;  %v1323_v12 = vmul.f32 %v1003_v39, %v4264_v25 }
 0x3bb   : > { %v1092_v41 = vsub.f32 %v4635_v59, %v4650_v36  ;;  %3557 = vst [vmem:[%s4295_s29 + $0x8] sm:$0xff] %v3537_v6   ;;  %v1503_v1 = vpop.f32.mrb[20].mxu0  ;;  %v4668_v43 = vadd.f32 %v1096_v50, %v1094_v52  ;;  %v1520_v51 = vmul.f32 1.8, %v4580_v37  ;;  %v1514_v52 = vmul.f32 %v1194_v24, %v4246_v17 }
 0x3bc   : > { %v4670_v60 = vadd.f32 %v1324_v13, %v1322_v47  ;;  %v1325_v53 = vmul.f32 %v1321_v15, %v4266_v26  ;;  %v1510_v44 = vadd.f32 %v1503_v1, %v1451_v9  ;;  %v3754_v45 = vpop.f32.mrb[21].mxu0  ;;  %v1521_v19 = vmul.f32 1.8, %v4585_v29  ;;  %v3998_v1 = vld [vmem:[%s5471_s5] sm:$0xff]  }
 0x3bd   : > { %v1506_v0 = vpop.f32.mrb[22].mxu0  ;;  %v1522_v4 = vadd.f32 0.01, %v1520_v51  ;;  %v1344_v8 = vmul.f32 %v4548_v34, %v4268_v27  ;;  %v1515_v6 = vmul.f32 %v1195_v42, %v4246_v17  ;;  %v1345_v47 = vmul.f32 %v4553_v3, %v4268_v27 }
 0x3be   : > { %v1332_v22 = vsub.f32 %v4670_v60, %v1330_v48  ;;  %v4675_v49 = vadd.f32 %v1325_v53, %v1323_v12  ;;  %v1512_v5 = vadd.f32 %v1510_v44, %v4244_v16  ;;  %v1511_v55 = vadd.f32 %v1506_v0, %v1452_v40  ;;  %v3755_v39 = vpop.f32.mrb[23].mxu0  ;;  %v4000_v0 = vld [vmem:[%s5471_s5 + $0x8] sm:$0xff]  }
 0x3bf   : > { %v1523_v63 = vadd.f32 0.01, %v1521_v19  ;;  %v1537_v39 = vmul.f32 %v4585_v29, %v4256_v20  ;;  %v4002_v29 = vld [vmem:[%s5473_s7] sm:$0xff]  }
 0x3c0   : > { %vm1334_vm3 = vcmp.gt.f32.partialorder %v1332_v22, 0.0  ;;  %v1333_v57 = vsub.f32 %v4675_v49, %v1331_v10  ;;  %v1516_v61 = vmul.f32 %v1512_v5, %v4248_v18  ;;  %v1513_v62 = vadd.f32 %v1511_v55, %v4244_v16 }
 0x3c1   : > { %v3388_v7 = vsel %vm1334_vm3, 1.0, %v4116_v46 }
 0x3c2   : > { %v4689_v50 = vmul.f32 %v3388_v7, %v1330_v48  ;;  %v1346_v2 = vmul.f32 %v3388_v7, %v4270_v28  ;;  %vm1335_vm4 = vcmp.gt.f32.partialorder %v1333_v57, 0.0  ;;  %v1518_v58 = vadd.f32 %v1516_v61, %v1514_v52 }
 0x3c3   : > { %v3389_v24 = vsel %vm1335_vm4, 1.0, %v4116_v46  ;;  %v1517_v9 = vmul.f32 %v1513_v62, %v4248_v18 }
 0x3c4   : > { %v1342_v34 = vsub.f32 %v4670_v60, %v4689_v50  ;;  %v4702_v13 = vmul.f32 %v3389_v24, %v1331_v10  ;;  %v1347_v15 = vmul.f32 %v3389_v24, %v4270_v28  ;;  %v1524_v12 = vsub.f32 %v1518_v58, %v1522_v4 }
 0x3c5   : > { %v1519_v40 = vadd.f32 %v1517_v9, %v1515_v6  ;;  %v1350_v38 = vpack.c.bf16 %v3389_v24, %v3388_v7  ;;  %v4708_v42 = vadd.f32 %v1346_v2, %v1344_v8  ;;  %v1536_v10 = vmul.f32 %v4580_v37, %v4256_v20  ;;  %v4003_v7 = vld [vmem:[%s5473_s7 + $0x8] sm:$0xff]  }
 0x3c6   : > { %v1343_v3 = vsub.f32 %v4675_v49, %v4702_v13  ;;  %vm1526_vm5 = vcmp.gt.f32.partialorder %v1524_v12, 0.0  ;;  %v4712_v48 = vadd.f32 %v1347_v15, %v1345_v47  ;;  %v1417_v8 = vmul.f32 1.8, %v4659_v56 }
 0x3c7   : > { %v3402_v53 = vsel %vm1526_vm5, 1.0, %v4116_v46  ;;  %v1525_v44 = vsub.f32 %v1519_v40, %v1523_v63  ;;  %3745 = vmatmul.mubr.msk.bf16.vlgmr.msra.gmra.mrb[16].mxu1 %vm555_vm1, %v1350_v38  ;;  %v1411_v24 = vmul.f32 %v1091_v14, %v4274_v31  ;;  %v1418_v47 = vmul.f32 1.8, %v4668_v43 }
 0x3c8   : > { %v1532_v45 = vmul.f32 %v3402_v53, %v1522_v4  ;;  %v1538_v51 = vmul.f32 %v3402_v53, %v4258_v21  ;;  %1796 = vst.msk [vmem:[#allocation2 + $0x20] sm:$0xff] %vm555_vm1, %v3402_v53  ;;  %3757 = vmatpush3.bf16.msra.mxu1 %v3998_v1  ;;  %3760 = vmatprep.mubr.msk.bf16.mxu1 %vm4117_vm2, %v4116_v46  ;;  %v1419_v1 = vadd.f32 0.01, %v1417_v8 }
 0x3c9   : > { %vm1527_vm6 = vcmp.gt.f32.partialorder %v1525_v44, 0.0  ;;  %3758 = vmatprep.subr.bf16.mxu1 %v4116_v46  ;;  %v1420_v14 = vadd.f32 0.01, %v1418_v47  ;;  %v1685_v13 = vmul.f32 %v4712_v48, %v4268_v27 }
 0x3ca   : > { %v1534_v22 = vsub.f32 %v1518_v58, %v1532_v45  ;;  %v1540_v5 = vadd.f32 %v1538_v51, %v1536_v10  ;;  %v3403_v55 = vsel %vm1527_vm6, 1.0, %v4116_v46 }
 0x3cb   : > { %v1533_v37 = vmul.f32 %v3403_v55, %v1523_v63  ;;  %v1539_v52 = vmul.f32 %v3403_v55, %v4258_v21  ;;  %1797 = vst.msk [vmem:[#allocation2 + $0x28] sm:$0xff] %vm555_vm1, %v3403_v55  ;;  %v1542_v57 = vpack.c.bf16 %v3403_v55, %v3402_v53 }
 0x3cc   : > { %1790 = vst.msk [vmem:[#allocation2] sm:$0xff] %vm555_vm1, %v1534_v22  ;;  %1793 = vst.msk [vmem:[#allocation2 + $0x10] sm:$0xff] %vm555_vm1, %v1540_v5  ;;  %3759 = vmatpush3.bf16.msra.mxu1 %v4000_v0  ;;  %v1434_v5 = vmul.f32 %v4668_v43, %v4278_v33 }
 0x3cd   : > { %v1535_v61 = vsub.f32 %v1519_v40, %v1533_v37  ;;  %v1541_v62 = vadd.f32 %v1539_v52, %v1537_v39  ;;  %3769 = vmatmul.mubr.msk.bf16.vlgmr.msra.gmra.mrb[24].mxu0 %vm555_vm1, %v1542_v57  ;;  %3772 = vmatprep.subr.bf16.mxu1 %v4116_v46  ;;  %v1412_v40 = vmul.f32 %v1092_v41, %v4274_v31 }
 0x3ce   : > { %v1433_v41 = vmul.f32 %v4659_v56, %v4278_v33  ;;  %v1668_v56 = vmul.f32 1.8, %v4708_v42 }
 0x3cf   : > { %1791 = vst.msk [vmem:[#allocation2 + $0x8] sm:$0xff] %vm555_vm1, %v1535_v61  ;;  %1794 = vst.msk [vmem:[#allocation2 + $0x18] sm:$0xff] %vm555_vm1, %v1541_v62  ;;  %3761 = vmatmul.mubr.msk.bf16.vlgmr.msra.gmra.mrb[20].mxu1 %vm555_vm1, %v1350_v38  ;;  %v1662_v61 = vmul.f32 %v1342_v34, %v4264_v25 }
 0x3d0   : > { %3776 = vmatprep.mubr.msk.bf16.mxu1 %vm4117_vm2, %v4116_v46  ;;  %3773 = vmatpush3.bf16.msra.mxu1 %v4002_v29  ;;  %v1670_v34 = vadd.f32 0.01, %v1668_v56 }
 0x3d1   : > { %3774 = vmatprep.subr.bf16.mxu1 %v4116_v46 }
 0x3d4   : > { %3775 = vmatpush3.bf16.msra.mxu1 %v4003_v7 }
 0x49a   : > { %v1404_v4 = vpop.f32.mrb[16].mxu1 }
 0x49b   : > { %v1405_v19 = vadd.f32 %v1404_v4, %v4272_v30  ;;  %v3746_v2 = vpop.f32.mrb[17].mxu1 }
 0x49c   : > { %v1407_v58 = vpop.f32.mrb[18].mxu1  ;;  %v1669_v2 = vmul.f32 1.8, %v4712_v48 }
 0x49d   : > { %v1413_v6 = vmul.f32 %v1405_v19, %v4276_v32  ;;  %v1408_v9 = vadd.f32 %v1407_v58, %v4272_v30  ;;  %v3747_v15 = vpop.f32.mrb[19].mxu1 }
 0x49f   : > { %v4756_v12 = vadd.f32 %v1413_v6, %v1411_v24  ;;  %v1414_v63 = vmul.f32 %v1408_v9, %v4276_v32  ;;  %v1663_v6 = vmul.f32 %v1343_v3, %v4264_v25 }
 0x4a0   : > { %v1653_v38 = vpop.f32.mrb[24].mxu0 }
 0x4a1   : > { %v1421_v54 = vsub.f32 %v4756_v12, %v1419_v1  ;;  %v4764_v11 = vadd.f32 %v1414_v63, %v1412_v40  ;;  %v3770_v53 = vpop.f32.mrb[25].mxu0 }
 0x4a2   : > { %v1597_v44 = vpop.f32.mrb[20].mxu1  ;;  %v1656_v45 = vpop.f32.mrb[26].mxu0 }
 0x4a3   : > { %vm1423_vm2 = vcmp.gt.f32.partialorder %v1421_v54, 0.0  ;;  %v1422_v10 = vsub.f32 %v4764_v11, %v1420_v14  ;;  %v1654_v51 = vadd.f32 %v1653_v38, %v1597_v44  ;;  %v3762_v0 = vpop.f32.mrb[21].mxu1  ;;  %v3771_v22 = vpop.f32.mrb[27].mxu0  ;;  %v1684_v38 = vmul.f32 %v4708_v42, %v4268_v27 }
 0x4a4   : > { %v3393_v59 = vsel %vm1423_vm2, 1.0, %v4116_v46  ;;  %v1600_v36 = vpop.f32.mrb[22].mxu1 }
 0x4a5   : > { %v1429_v55 = vmul.f32 %v3393_v59, %v1419_v1  ;;  %v1435_v37 = vmul.f32 %v3393_v59, %v4281_v35  ;;  %vm1424_vm7 = vcmp.gt.f32.partialorder %v1422_v10, 0.0  ;;  %v1660_v39 = vadd.f32 %v1654_v51, %v4262_v23  ;;  %v3763_v52 = vpop.f32.mrb[23].mxu1 }
 0x4a6   : > { %v3394_v57 = vsel %vm1424_vm7, 1.0, %v4116_v46  ;;  %v1657_v62 = vadd.f32 %v1656_v45, %v1600_v36 }
 0x4a7   : > { %v1431_v43 = vsub.f32 %v4756_v12, %v1429_v55  ;;  %v1430_v29 = vmul.f32 %v3394_v57, %v1420_v14  ;;  %v1436_v7 = vmul.f32 %v3394_v57, %v4281_v35  ;;  %v3540_v4 = vpack.c.bf16 %v3394_v57, %v3393_v59 }
 0x4a8   : > { %v1664_v19 = vmul.f32 %v1660_v39, %v4266_v26  ;;  %v1661_v8 = vadd.f32 %v1657_v62, %v4262_v23  ;;  %v1437_v58 = vadd.f32 %v1435_v37, %v1433_v41  ;;  %v1671_v12 = vadd.f32 0.01, %v1669_v2 }
 0x4a9   : > { %v1432_v24 = vsub.f32 %v4764_v11, %v1430_v29  ;;  %3558 = vst [vmem:[%s4295_s29 + $0x10] sm:$0xff] %v3540_v4   ;;  %v1438_v60 = vadd.f32 %v1436_v7, %v1434_v5  ;;  %v1751_v59 = vmul.f32 %v1431_v43, %v4274_v31 }
 0x4aa   : > { %v1666_v50 = vadd.f32 %v1664_v19, %v1662_v61  ;;  %v1665_v9 = vmul.f32 %v1661_v8, %v4266_v26  ;;  %v1757_v51 = vmul.f32 1.8, %v1437_v58  ;;  %v1773_v4 = vmul.f32 %v1437_v58, %v4278_v33 }
 0x4ab   : > { %v1758_v5 = vmul.f32 1.8, %v1438_v60  ;;  %v1752_v52 = vmul.f32 %v1432_v24, %v4274_v31  ;;  %v1774_v2 = vmul.f32 %v1438_v60, %v4278_v33 }
 0x4ac   : > { %v1672_v47 = vsub.f32 %v1666_v50, %v1670_v34  ;;  %v1667_v15 = vadd.f32 %v1665_v9, %v1663_v6  ;;  %v1759_v39 = vadd.f32 0.01, %v1757_v51 }
 0x4ad   : > { %v1760_v62 = vadd.f32 0.01, %v1758_v5 }
 0x4ae   : > { %vm1674_vm8 = vcmp.gt.f32.partialorder %v1672_v47, 0.0  ;;  %v1673_v1 = vsub.f32 %v1667_v15, %v1671_v12 }
 0x4af   : > { %v3410_v40 = vsel %vm1674_vm8, 1.0, %v4116_v46 }
 0x4b0   : > { %v1680_v63 = vmul.f32 %v3410_v40, %v1670_v34  ;;  %v1686_v54 = vmul.f32 %v3410_v40, %v4270_v28  ;;  %1804 = vst.msk [vmem:[#allocation3 + $0x20] sm:$0xff] %vm555_vm1, %v3410_v40  ;;  %vm1675_vm9 = vcmp.gt.f32.partialorder %v1673_v1, 0.0 }
 0x4b1   : > { %v3411_v49 = vsel %vm1675_vm9, 1.0, %v4116_v46 }
 0x4b2   : > { %v1682_v3 = vsub.f32 %v1666_v50, %v1680_v63  ;;  %v1688_v11 = vadd.f32 %v1686_v54, %v1684_v38  ;;  %v1681_v14 = vmul.f32 %v3411_v49, %v1671_v12  ;;  %v1687_v53 = vmul.f32 %v3411_v49, %v4270_v28  ;;  %1805 = vst.msk [vmem:[#allocation3 + $0x28] sm:$0xff] %vm555_vm1, %v3411_v49 }
 0x4b3   : > { %v1690_v44 = vpack.c.bf16 %v3411_v49, %v3410_v40 }
 0x4b4   : > { %1798 = vst.msk [vmem:[#allocation3] sm:$0xff] %vm555_vm1, %v1682_v3  ;;  %1801 = vst.msk [vmem:[#allocation3 + $0x10] sm:$0xff] %vm555_vm1, %v1688_v11  ;;  %v1683_v42 = vsub.f32 %v1667_v15, %v1681_v14  ;;  %v1689_v45 = vadd.f32 %v1687_v53, %v1685_v13 }
 0x4b5   : > { %3777 = vmatmul.mubr.msk.bf16.vlgmr.msra.gmra.mrb[24].mxu1 %vm555_vm1, %v1690_v44 }
 0x4b6   : > { %1799 = vst.msk [vmem:[#allocation3 + $0x8] sm:$0xff] %vm555_vm1, %v1683_v42  ;;  %1802 = vst.msk [vmem:[#allocation3 + $0x18] sm:$0xff] %vm555_vm1, %v1689_v45 }
 0x588   : > { %v1744_v48 = vpop.f32.mrb[24].mxu1 }
 0x589   : > { %v1745_v10 = vadd.f32 %v1744_v48, %v4272_v30  ;;  %v3778_v0 = vpop.f32.mrb[25].mxu1 }
 0x58a   : > { %v1747_v22 = vpop.f32.mrb[26].mxu1 }
 0x58b   : > { %v1753_v36 = vmul.f32 %v1745_v10, %v4276_v32  ;;  %v1748_v41 = vadd.f32 %v1747_v22, %v4272_v30  ;;  %v3779_v55 = vpop.f32.mrb[27].mxu1 }
 0x58d   : > { %v1755_v37 = vadd.f32 %v1753_v36, %v1751_v59  ;;  %v1754_v57 = vmul.f32 %v1748_v41, %v4276_v32 }
 0x58f   : > { %v1761_v61 = vsub.f32 %v1755_v37, %v1759_v39  ;;  %v1756_v56 = vadd.f32 %v1754_v57, %v1752_v52 }
 0x591   : > { %vm1763_vm10 = vcmp.gt.f32.partialorder %v1761_v61, 0.0  ;;  %v1762_v29 = vsub.f32 %v1756_v56, %v1760_v62 }
 0x592   : > { %v3415_v7 = vsel %vm1763_vm10, 1.0, %v4116_v46 }
 0x593   : > { %v1769_v43 = vmul.f32 %v3415_v7, %v1759_v39  ;;  %v1775_v19 = vmul.f32 %v3415_v7, %v4281_v35  ;;  %vm1764_vm11 = vcmp.gt.f32.partialorder %v1762_v29, 0.0 }
 0x594   : > { %v3416_v8 = vsel %vm1764_vm11, 1.0, %v4116_v46 }
 0x595   : > { %v1771_v24 = vsub.f32 %v1755_v37, %v1769_v43  ;;  %v1777_v50 = vadd.f32 %v1775_v19, %v1773_v4  ;;  %v1770_v34 = vmul.f32 %v3416_v8, %v1760_v62  ;;  %v1776_v6 = vmul.f32 %v3416_v8, %v4281_v35 }
 0x596   : > { %v3543_v9 = vpack.c.bf16 %v3416_v8, %v3415_v7 }
 0x597   : > { %1806 = vst [vmem:[#allocation4] sm:$0xff] %v1771_v24  ;;  %1809 = vst [vmem:[#allocation4 + $0x10] sm:$0xff] %v1777_v50  ;;  %v1772_v47 = vsub.f32 %v1756_v56, %v1770_v34  ;;  %v1778_v15 = vadd.f32 %v1776_v6, %v1774_v2 }
 0x598   : > { %3559 = vst [vmem:[%s4295_s29 + $0x18] sm:$0xff] %v3543_v9  }
 0x599   : > { %1807 = vst [vmem:[#allocation4 + $0x8] sm:$0xff] %v1772_v47  ;;  %1810 = vst [vmem:[#allocation4 + $0x18] sm:$0xff] %v1778_v15 }
 0x59a PF: > { %p3421_p13 = scmp.le.s32.totalorder %s4106_s12, 0 }
 0x59b   : > { %v4004_v46 = vld [vmem:[%s5468_s2] sm:$0xff] (!%p3421_p13)   ;;  %v4118_v58 = vmov (!%p3421_p13), 0.0   ;;  %v4005_v60 = vld [vmem:[%s5468_s2 + $0x8] sm:$0xff] (!%p3421_p13)   ;;  %vm4119_vm12 = vmmov (!%p3421_p13), 0   ;;  %v1829_v49 = vld [vmem:[#allocation3 + $0x20] sm:$0xff] (!%p3421_p13) }
 0x59c   : > { %1814 = sbr.rel (%p3421_p13) target bundleno = 2843 (0xb1b), region = 64  ;;  %3780 = vmatprep.subr.bf16.mxu0 (!%p3421_p13), %v4118_v58  ;;  %3788 = vmatprep.subr.bf16.mxu1 (!%p3421_p13), %v4118_v58  ;;  %v1821_v12 = vld [vmem:[#allocation2 + $0x20] sm:$0xff] (!%p3421_p13)  ;;  %v1822_v1 = vld [vmem:[#allocation2 + $0x28] sm:$0xff] (!%p3421_p13)  ;;  %v1830_v13 = vld [vmem:[#allocation3 + $0x28] sm:$0xff] (!%p3421_p13) }
 0x59d   : > { %3781 = vmatpush3.bf16.msra.mxu0 (!%p3421_p13), %v4004_v46  ;;  %3784 = vmatprep.mubr.msk.bf16.mxu0 (!%p3421_p13), %vm4119_vm12, %v4118_v58  ;;  %v1838_v40 = vpack.c.bf16 (!%p3421_p13), %v1822_v1, %v1821_v12  ;;  %v4006_v63 = vld [vmem:[%s5471_s5] sm:$0xff] (!%p3421_p13)   ;;  %v4008_v54 = vld [vmem:[%s5471_s5 + $0x8] sm:$0xff] (!%p3421_p13)   ;;  %v1936_v11 = vpack.c.bf16 (!%p3421_p13), %v1830_v13, %v1829_v49  ;;  %v4857_v14 = vld [vmem:[#allocation2 + $0x10] sm:$0xff] (!%p3421_p13) }
 0x59e   : > { %3782 = vmatprep.subr.bf16.mxu0 (!%p3421_p13), %v4118_v58  ;;  %3792 = vmatprep.mubr.msk.bf16.mxu1 (!%p3421_p13), %vm4119_vm12, %v4118_v58  ;;  %v4007_v38 = vld [vmem:[%s5470_s4] sm:$0xff] (!%p3421_p13)   ;;  %v4009_v3 = vld [vmem:[%s5470_s4 + $0x8] sm:$0xff] (!%p3421_p13)   ;;  %v4859_v45 = vld [vmem:[#allocation2 + $0x18] sm:$0xff] (!%p3421_p13)  ;;  %v1909_v51 = vmul.f32 (!%p3421_p13), 1.8, %v4857_v14 }
 0x59f   : > { %3789 = vmatpush3.bf16.msra.mxu1 (!%p3421_p13), %v4006_v63  ;;  %v1836_v53 = vld [vmem:[#allocation5] sm:$0xff] (!%p3421_p13)  ;;  %v1816_v22 = vld [vmem:[#allocation2 + $0x8] sm:$0xff] (!%p3421_p13)  ;;  %v1910_v55 = vmul.f32 (!%p3421_p13), 1.8, %v4859_v45  ;;  %v1823_v49 = vld [vmem:[#allocation3] sm:$0xff] (!%p3421_p13) }
 0x5a0   : > { %3790 = vmatprep.subr.bf16.mxu1 (!%p3421_p13), %v4118_v58  ;;  %v1815_v44 = vld [vmem:[#allocation2] sm:$0xff] (!%p3421_p13)  ;;  %v1837_v48 = vld [vmem:[#allocation5 + $0x8] sm:$0xff] (!%p3421_p13)  ;;  %v1911_v52 = vadd.f32 (!%p3421_p13), 0.01, %v1909_v51  ;;  %v1904_v61 = vmul.f32 (!%p3421_p13), %v1816_v22, %v4246_v17  ;;  %v1925_v51 = vmul.f32 (!%p3421_p13), %v4857_v14, %v4256_v20  ;;  %v2055_v22 = vmul.f32 (!%p3421_p13), %v1823_v49, %v4264_v25 }
 0x5a1   : > { %3783 = vmatpush3.bf16.msra.mxu0 (!%p3421_p13), %v4005_v60  ;;  %v1903_v41 = vmul.f32 (!%p3421_p13), %v1815_v44, %v4246_v17  ;;  %v1912_v29 = vadd.f32 (!%p3421_p13), 0.01, %v1910_v55  ;;  %v4010_v24 = vld [vmem:[%s5468_s2] sm:$0xff] (!%p3421_p13)   ;;  %v4011_v47 = vld [vmem:[%s5468_s2 + $0x8] sm:$0xff] (!%p3421_p13)   ;;  %v1926_v14 = vmul.f32 (!%p3421_p13), %v4859_v45, %v4256_v20 }
 0x5a2   : > { %3796 = vmatprep.subr.bf16.mxu0 (!%p3421_p13), %v4118_v58  ;;  %v4012_v1 = vld [vmem:[%s5473_s7] sm:$0xff] (!%p3421_p13)  }
 0x5a3   : > { %3791 = vmatpush3.bf16.msra.mxu1 %v4008_v54  ;;  %v4015_v63 = vld [vmem:[%s5470_s4] sm:$0xff]  }
 0x5a4   : > { %3785 = vmatmul.mubr.msk.bf16.vlgmr.msra.gmra.mrb[0].mxu0 %vm555_vm1, %v1838_v40  ;;  %3804 = vmatprep.subr.bf16.mxu1 %v4118_v58  ;;  %v4013_v40 = vld [vmem:[%s5473_s7 + $0x8] sm:$0xff]   ;;  %v4915_v54 = vld [vmem:[#allocation3 + $0x10] sm:$0xff] }
 0x5a5   : > { %3800 = vmatprep.mubr.msk.bf16.mxu0 %vm4119_vm12, %v4118_v58  ;;  %3797 = vmatpush3.bf16.msra.mxu0 %v4007_v38  ;;  %v4017_v38 = vld [vmem:[%s5470_s4 + $0x8] sm:$0xff]  }
 0x5a6   : > { %3798 = vmatprep.subr.bf16.mxu0 %v4118_v58  ;;  %3793 = vmatmul.mubr.msk.bf16.vlgmr.msra.gmra.mrb[0].mxu1 %vm555_vm1, %v1936_v11 }
 0x5a7   : > { %3808 = vmatprep.mubr.msk.bf16.mxu1 %vm4119_vm12, %v4118_v58  ;;  %3805 = vmatpush3.bf16.msra.mxu1 %v4012_v1 }
 0x5a8   : > { %3806 = vmatprep.subr.bf16.mxu1 %v4118_v58 }
 0x5a9   : > { %3799 = vmatpush3.bf16.msra.mxu0 %v4009_v3  ;;  %v4917_v3 = vld [vmem:[#allocation3 + $0x18] sm:$0xff] }
 0x5aa   : > { %3812 = vmatprep.subr.bf16.mxu0 %v4118_v58 }
 0x5ab   : > { %3807 = vmatpush3.bf16.msra.mxu1 %v4013_v40 }
 0x5ac   : > { %3820 = vmatprep.subr.bf16.mxu1 %v4118_v58 }
 0x677   : > { %v1892_v42 = vpop.f32.mrb[0].mxu0 }
 0x678   : > { %v1899_v10 = vadd.f32 %v1892_v42, %v1836_v53  ;;  %v3786_v0 = vpop.f32.mrb[1].mxu0  ;;  %v2061_v53 = vmul.f32 1.8, %v4915_v54 }
 0x679   : > { %v1895_v59 = vpop.f32.mrb[2].mxu0  ;;  %v1990_v15 = vpop.f32.mrb[0].mxu1 }
 0x67a   : > { %v1901_v36 = vadd.f32 %v1899_v10, %v4244_v16  ;;  %v1900_v5 = vadd.f32 %v1895_v59, %v1837_v48  ;;  %v3787_v37 = vpop.f32.mrb[3].mxu0  ;;  %v3794_v46 = vpop.f32.mrb[1].mxu1  ;;  %v1824_v48 = vld [vmem:[#allocation3 + $0x8] sm:$0xff]  ;;  %v2063_v55 = vadd.f32 0.01, %v2061_v53 }
 0x67b   : > { %v1993_v60 = vpop.f32.mrb[2].mxu1 }
 0x67c   : > { %v1905_v39 = vmul.f32 %v1901_v36, %v4248_v18  ;;  %v1902_v57 = vadd.f32 %v1900_v5, %v4244_v16  ;;  %v3795_v12 = vpop.f32.mrb[3].mxu1  ;;  %v2062_v36 = vmul.f32 1.8, %v4917_v3 }
 0x67e   : > { %v4868_v56 = vadd.f32 %v1905_v39, %v1903_v41  ;;  %v1906_v62 = vmul.f32 %v1902_v57, %v4248_v18  ;;  %v2056_v39 = vmul.f32 %v1824_v48, %v4264_v25 }
 0x680   : > { %v1913_v7 = vsub.f32 %v4868_v56, %v1911_v52  ;;  %v4872_v43 = vadd.f32 %v1906_v62, %v1904_v61  ;;  %v2183_v61 = vld [vmem:[#allocation5 + $0x10] sm:$0xff] }
 0x682   : > { %vm1915_vm13 = vcmp.gt.f32.partialorder %v1913_v7, 0.0  ;;  %v1914_v4 = vsub.f32 %v4872_v43, %v1912_v29  ;;  %v2064_v7 = vadd.f32 0.01, %v2062_v36 }
 0x683   : > { %v3425_v19 = vsel %vm1915_vm13, 1.0, %v4118_v58 }
 0x684   : > { %v4876_v8 = vmul.f32 %v3425_v19, %v1911_v52  ;;  %vm1916_vm14 = vcmp.gt.f32.partialorder %v1914_v4, 0.0  ;;  %v1927_v42 = vmul.f32 %v3425_v19, %v4258_v21 }
 0x685   : > { %v3426_v2 = vsel %vm1916_vm14, 1.0, %v4118_v58 }
 0x686   : > { %v1923_v50 = vsub.f32 %v4868_v56, %v4876_v8  ;;  %v4884_v34 = vmul.f32 %v3426_v2, %v1912_v29  ;;  %v1931_v6 = vpack.c.bf16 %v3426_v2, %v3425_v19  ;;  %v1928_v52 = vmul.f32 %v3426_v2, %v4258_v21  ;;  %v2184_v19 = vld [vmem:[#allocation5 + $0x18] sm:$0xff]  ;;  %v4014_v56 = vld [vmem:[%s5471_s5] sm:$0xff]  }
 0x687   : > { %v1929_v57 = vadd.f32 %v1927_v42, %v1925_v51 }
 0x688   : > { %v1924_v9 = vsub.f32 %v4872_v43, %v4884_v34  ;;  %3801 = vmatmul.mubr.msk.bf16.vlgmr.msra.gmra.mrb[4].mxu0 %vm555_vm1, %v1931_v6  ;;  %v1930_v2 = vadd.f32 %v1928_v52, %v1926_v14  ;;  %v2246_v49 = vmul.f32 %v1923_v50, %v4246_v17  ;;  %v4016_v43 = vld [vmem:[%s5471_s5 + $0x8] sm:$0xff]  }
 0x689   : > { %3813 = vmatpush3.bf16.msra.mxu0 %v4010_v24  ;;  %3816 = vmatprep.mubr.msk.bf16.mxu0 %vm4119_vm12, %v4118_v58  ;;  %v2252_v46 = vmul.f32 1.8, %v1929_v57 }
 0x68a   : > { %3814 = vmatprep.subr.bf16.mxu0 %v4118_v58  ;;  %v2247_v8 = vmul.f32 %v1924_v9, %v4246_v17 }
 0x68b   : > { %v2254_v51 = vadd.f32 0.01, %v2252_v46  ;;  %v4021_v46 = vld [vmem:[%s5473_s7 + $0x8] sm:$0xff]  }
 0x68d   : > { %3815 = vmatpush3.bf16.msra.mxu0 %v4011_v47 }
 0x68e   : > { %3828 = vmatprep.subr.bf16.mxu0 %v4118_v58 }
 0x690   : > { %3817 = vmatmul.mubr.msk.bf16.vlgmr.msra.gmra.mrb[8].mxu0 %vm555_vm1, %v1931_v6 }
 0x691   : > { %3832 = vmatprep.mubr.msk.bf16.mxu0 %vm4119_vm12, %v4118_v58  ;;  %3829 = vmatpush3.bf16.msra.mxu0 %v4015_v63 }
 0x692   : > { %3830 = vmatprep.subr.bf16.mxu0 %v4118_v58 }
 0x695   : > { %3831 = vmatpush3.bf16.msra.mxu0 %v4017_v38 }
 0x696   : > { %3844 = vmatprep.subr.bf16.mxu0 %v4118_v58 }
 0x75b   : > { %v2046_v13 = vpop.f32.mrb[4].mxu0 }
 0x75c   : > { %v2047_v11 = vadd.f32 %v2046_v13, %v1990_v15  ;;  %v3802_v44 = vpop.f32.mrb[5].mxu0 }
 0x75d   : > { %v2049_v10 = vpop.f32.mrb[6].mxu0  ;;  %v2253_v44 = vmul.f32 1.8, %v1930_v2 }
 0x75e   : > { %v2053_v0 = vadd.f32 %v2047_v11, %v4262_v23  ;;  %v2050_v59 = vadd.f32 %v2049_v10, %v1993_v60  ;;  %v3803_v41 = vpop.f32.mrb[7].mxu0 }
 0x75f   : > { %v2255_v41 = vadd.f32 0.01, %v2253_v44 }
 0x760   : > { %v2057_v5 = vmul.f32 %v2053_v0, %v4266_v26  ;;  %v2054_v37 = vadd.f32 %v2050_v59, %v4262_v23 }
 0x762   : > { %v4932_v62 = vadd.f32 %v2057_v5, %v2055_v22  ;;  %v2058_v29 = vmul.f32 %v2054_v37, %v4266_v26  ;;  %v2268_v37 = vmul.f32 %v1929_v57, %v4256_v20  ;;  %v2269_v57 = vmul.f32 %v1930_v2, %v4256_v20  ;;  %v4023_v2 = vld [vmem:[%s5470_s4] sm:$0xff]  }
 0x763   : > { %v2235_v4 = vpop.f32.mrb[8].mxu0 }
 0x764   : > { %v2065_v24 = vsub.f32 %v4932_v62, %v2063_v55  ;;  %v4936_v6 = vadd.f32 %v2058_v29, %v2056_v39  ;;  %v2242_v47 = vadd.f32 %v2235_v4, %v2183_v61  ;;  %v3818_v15 = vpop.f32.mrb[9].mxu0  ;;  %v4018_v61 = vld [vmem:[%s5468_s2] sm:$0xff]  }
 0x765   : > { %v2238_v60 = vpop.f32.mrb[10].mxu0  ;;  %v4020_v15 = vld [vmem:[%s5473_s7] sm:$0xff]  }
 0x766   : > { %vm2067_vm15 = vcmp.gt.f32.partialorder %v2065_v24, 0.0  ;;  %v2066_v12 = vsub.f32 %v4936_v6, %v2064_v7  ;;  %v2244_v45 = vadd.f32 %v2242_v47, %v4244_v16  ;;  %v2243_v1 = vadd.f32 %v2238_v60, %v2184_v19  ;;  %v3819_v40 = vpop.f32.mrb[11].mxu0  ;;  %v4019_v47 = vld [vmem:[%s5468_s2 + $0x8] sm:$0xff]  }
 0x767   : > { %v4941_v63 = vsel %vm2067_vm15, 1.0, %v4118_v58  ;;  %v4025_v60 = vld [vmem:[%s5470_s4 + $0x8] sm:$0xff]  }
 0x768   : > { %v4944_v38 = vmul.f32 %v4941_v63, %v2063_v55  ;;  %vm2068_vm0 = vcmp.gt.f32.partialorder %v2066_v12, 0.0  ;;  %v2248_v13 = vmul.f32 %v2244_v45, %v4248_v18  ;;  %v2245_v53 = vadd.f32 %v2243_v1, %v4244_v16  ;;  %v5037_v12 = vld [vmem:[#allocation4 + $0x10] sm:$0xff]  ;;  %v1831_v45 = vld [vmem:[#allocation4] sm:$0xff]  ;;  %v5039_v1 = vld [vmem:[#allocation4 + $0x18] sm:$0xff] }
 0x769   : > { %v4952_v11 = vsel %vm2068_vm0, 1.0, %v4118_v58  ;;  %v2150_v40 = vmul.f32 1.8, %v5037_v12  ;;  %v2144_v44 = vmul.f32 %v1831_v45, %v4274_v31 }
 0x76a   : > { %v2075_v42 = vsub.f32 %v4932_v62, %v4944_v38  ;;  %v4958_v48 = vmul.f32 %v4952_v11, %v2064_v7  ;;  %v4960_v10 = vadd.f32 %v2248_v13, %v2246_v49  ;;  %v2249_v50 = vmul.f32 %v2245_v53, %v4248_v18  ;;  %v1832_v13 = vld [vmem:[#allocation4 + $0x8] sm:$0xff] }
 0x76b   : > { %v2083_v0 = vpack.c.bf16 %v4952_v11, %v4941_v63 }
 0x76c   : > { %v2076_v22 = vsub.f32 %v4936_v6, %v4958_v48  ;;  %v2256_v59 = vsub.f32 %v4960_v10, %v2254_v51  ;;  %v4975_v36 = vadd.f32 %v2249_v50, %v2247_v8 }
 0x76d   : > { %3809 = vmatmul.mubr.msk.bf16.vlgmr.msra.gmra.mrb[4].mxu1 %vm555_vm1, %v2083_v0 }
 0x76e   : > { %vm2258_vm3 = vcmp.gt.f32.partialorder %v2256_v59, 0.0  ;;  %3821 = vmatpush3.bf16.msra.mxu1 %v4014_v56  ;;  %3824 = vmatprep.mubr.msk.bf16.mxu1 %vm4119_vm12, %v4118_v58  ;;  %v2257_v9 = vsub.f32 %v4975_v36, %v2255_v41  ;;  %v2151_v56 = vmul.f32 1.8, %v5039_v1 }
 0x76f   : > { %v3445_v34 = vsel %vm2258_vm3, 1.0, %v4118_v58  ;;  %3822 = vmatprep.subr.bf16.mxu1 %v4118_v58 }
 0x770   : > { %v4986_v5 = vmul.f32 %v3445_v34, %v2254_v51  ;;  %v2270_v55 = vmul.f32 %v3445_v34, %v4258_v21  ;;  %vm2259_vm4 = vcmp.gt.f32.partialorder %v2257_v9, 0.0  ;;  %v2077_v9 = vmul.f32 %v4915_v54, %v4268_v27 }
 0x771   : > { %v3446_v52 = vsel %vm2259_vm4, 1.0, %v4118_v58 }
 0x772   : > { %v2266_v39 = vsub.f32 %v4960_v10, %v4986_v5  ;;  %3823 = vmatpush3.bf16.msra.mxu1 %v4016_v43  ;;  %v4996_v14 = vadd.f32 %v2270_v55, %v2268_v37  ;;  %v4998_v29 = vmul.f32 %v3446_v52, %v2255_v41  ;;  %v2271_v7 = vmul.f32 %v3446_v52, %v4258_v21 }
 0x773   : > { %v2274_v4 = vpack.c.bf16 %v3446_v52, %v3445_v34  ;;  %3836 = vmatprep.subr.bf16.mxu1 %v4118_v58  ;;  %v2145_v41 = vmul.f32 %v1832_v13, %v4274_v31  ;;  %v2079_v34 = vmul.f32 %v4941_v63, %v4270_v28  ;;  %v2153_v52 = vadd.f32 0.01, %v2151_v56 }
 0x774   : > { %v2267_v19 = vsub.f32 %v4975_v36, %v4998_v29  ;;  %v5007_v24 = vadd.f32 %v2271_v7, %v2269_v57  ;;  %v2078_v7 = vmul.f32 %v4917_v3, %v4268_v27 }
 0x775   : > { %3825 = vmatmul.mubr.msk.bf16.vlgmr.msra.gmra.mrb[8].mxu1 %vm555_vm1, %v2083_v0  ;;  %3833 = vmatmul.mubr.msk.bf16.vlgmr.msra.gmra.mrb[12].mxu0 %vm555_vm1, %v2274_v4  ;;  %v2152_v0 = vadd.f32 0.01, %v2150_v40  ;;  %v2081_v63 = vadd.f32 %v2079_v34, %v2077_v9 }
 0x776   : > { %3845 = vmatpush3.bf16.msra.mxu0 %v4018_v61  ;;  %3848 = vmatprep.mubr.msk.bf16.mxu0 %vm4119_vm12, %v4118_v58  ;;  %v2080_v61 = vmul.f32 %v4952_v11, %v4270_v28  ;;  %v2587_v5 = vmul.f32 %v2267_v19, %v4246_v17 }
 0x777   : > { %3846 = vmatprep.subr.bf16.mxu0 %v4118_v58  ;;  %3840 = vmatprep.mubr.msk.bf16.mxu1 %vm4119_vm12, %v4118_v58  ;;  %v2400_v56 = vmul.f32 1.8, %v2081_v63  ;;  %v2416_v6 = vmul.f32 %v2081_v63, %v4268_v27 }
 0x778   : > { %3837 = vmatpush3.bf16.msra.mxu1 %v4020_v15  ;;  %v2082_v40 = vadd.f32 %v2080_v61, %v2078_v7 }
 0x779   : > { %3838 = vmatprep.subr.bf16.mxu1 %v4118_v58  ;;  %v2402_v7 = vadd.f32 0.01, %v2400_v56 }
 0x77a   : > { %3847 = vmatpush3.bf16.msra.mxu0 %v4019_v47  ;;  %v2401_v9 = vmul.f32 1.8, %v2082_v40 }
 0x77b   : > { %3860 = vmatprep.subr.bf16.mxu0 %v4118_v58 }
 0x77c   : > { %3839 = vmatpush3.bf16.msra.mxu1 %v4021_v46 }
 0x77d   : > { %3849 = vmatmul.mubr.msk.bf16.vlgmr.msra.gmra.mrb[16].mxu0 %vm555_vm1, %v2274_v4  ;;  %3852 = vmatprep.subr.bf16.mxu1 %v4118_v58 }
 0x77e   : > { %3864 = vmatprep.mubr.msk.bf16.mxu0 %vm4119_vm12, %v4118_v58  ;;  %3861 = vmatpush3.bf16.msra.mxu0 %v4023_v2 }
 0x77f   : > { %3862 = vmatprep.subr.bf16.mxu0 %v4118_v58 }
 0x782   : > { %3863 = vmatpush3.bf16.msra.mxu0 %v4025_v60 }
 0x783   : > { %3876 = vmatprep.subr.bf16.mxu0 %v4118_v58 }
 0x840   : > { %v2137_v49 = vpop.f32.mrb[4].mxu1 }
 0x841   : > { %v2138_v53 = vadd.f32 %v2137_v49, %v4272_v30  ;;  %v3810_v51 = vpop.f32.mrb[5].mxu1 }
 0x842   : > { %v2140_v8 = vpop.f32.mrb[6].mxu1 }
 0x843   : > { %v2146_v50 = vmul.f32 %v2138_v53, %v4276_v32  ;;  %v2141_v59 = vadd.f32 %v2140_v8, %v4272_v30  ;;  %v3811_v43 = vpop.f32.mrb[7].mxu1 }
 0x845   : > { %v5052_v55 = vadd.f32 %v2146_v50, %v2144_v44  ;;  %v2147_v37 = vmul.f32 %v2141_v59, %v4276_v32 }
 0x847   : > { %v2154_v4 = vsub.f32 %v5052_v55, %v2152_v0  ;;  %v5060_v57 = vadd.f32 %v2147_v37, %v2145_v41  ;;  %v2394_v41 = vmul.f32 %v2075_v42, %v4264_v25  ;;  %v2523_v37 = vld [vmem:[#allocation5 + $0x20] sm:$0xff]  ;;  %v2524_v42 = vld [vmem:[#allocation5 + $0x28] sm:$0xff] }
 0x848   : > { %v2329_v47 = vpop.f32.mrb[8].mxu1  ;;  %v2385_v15 = vpop.f32.mrb[12].mxu0 }
 0x849   : > { %vm2156_vm5 = vcmp.gt.f32.partialorder %v2154_v4, 0.0  ;;  %v2155_v54 = vsub.f32 %v5060_v57, %v2153_v52  ;;  %v2386_v46 = vadd.f32 %v2385_v15, %v2329_v47  ;;  %v3826_v2 = vpop.f32.mrb[9].mxu1  ;;  %v3834_v60 = vpop.f32.mrb[13].mxu0  ;;  %v2395_v4 = vmul.f32 %v2076_v22, %v4264_v25 }
 0x84a   : > { %v5064_v45 = vsel %vm2156_vm5, 1.0, %v4118_v58  ;;  %v2332_v11 = vpop.f32.mrb[10].mxu1  ;;  %v2388_v49 = vpop.f32.mrb[14].mxu0  ;;  %v2403_v2 = vadd.f32 0.01, %v2401_v9  ;;  %v2586_v22 = vmul.f32 %v2266_v39, %v4246_v17 }
 0x84b   : > { %v5067_v3 = vmul.f32 %v5064_v45, %v2152_v0  ;;  %vm2157_vm6 = vcmp.gt.f32.partialorder %v2155_v54, 0.0  ;;  %v2392_v13 = vadd.f32 %v2386_v46, %v4262_v23  ;;  %v3827_v53 = vpop.f32.mrb[11].mxu1  ;;  %v3835_v44 = vpop.f32.mrb[15].mxu0  ;;  %v2389_v8 = vadd.f32 %v2388_v49, %v2332_v11 }
 0x84c   : > { %v5071_v51 = vsel %vm2157_vm6, 1.0, %v4118_v58  ;;  %v2592_v60 = vmul.f32 1.8, %v4996_v14  ;;  %v2417_v44 = vmul.f32 %v2082_v40, %v4268_v27  ;;  %v4022_v40 = vld [vmem:[%s5471_s5] sm:$0xff]  }
 0x84d   : > { %v2164_v50 = vsub.f32 %v5052_v55, %v5067_v3  ;;  %v5076_v59 = vmul.f32 %v5071_v51, %v2153_v52  ;;  %v3546_v0 = vpack.c.bf16 %v5071_v51, %v5064_v45  ;;  %v2396_v43 = vmul.f32 %v2392_v13, %v4266_v26 }
 0x84e   : > { %v2393_v34 = vadd.f32 %v2389_v8, %v4262_v23 }
 0x84f   : > { %v2165_v61 = vsub.f32 %v5060_v57, %v5076_v59  ;;  %3547 = vst [vmem:[%s4295_s29] sm:$0xff] %v3546_v0   ;;  %v5089_v52 = vadd.f32 %v2396_v43, %v2394_v41  ;;  %v2593_v41 = vmul.f32 1.8, %v5007_v24 }
 0x850   : > { %v2397_v62 = vmul.f32 %v2393_v34, %v4266_v26  ;;  %v2575_v38 = vpop.f32.mrb[16].mxu0  ;;  %v2594_v34 = vadd.f32 0.01, %v2592_v60 }
 0x851   : > { %v2582_v47 = vadd.f32 %v2575_v38, %v2523_v37  ;;  %v3850_v15 = vpop.f32.mrb[17].mxu0  ;;  %v2404_v54 = vsub.f32 %v5089_v52, %v2402_v7  ;;  %v2595_v36 = vadd.f32 0.01, %v2593_v41  ;;  %v4028_v41 = vld [vmem:[%s5473_s7] sm:$0xff]  }
 0x852   : > { %v5097_v46 = vadd.f32 %v2397_v62, %v2395_v4  ;;  %v2578_v11 = vpop.f32.mrb[18].mxu0 }
 0x853   : > { %v2584_v49 = vadd.f32 %v2582_v47, %v4244_v16  ;;  %v2583_v13 = vadd.f32 %v2578_v11, %v2524_v42  ;;  %v3851_v53 = vpop.f32.mrb[19].mxu0  ;;  %vm2406_vm2 = vcmp.gt.f32.partialorder %v2404_v54, 0.0  ;;  %v4024_v54 = vld [vmem:[%s5471_s5 + $0x8] sm:$0xff]  }
 0x854   : > { %v2405_v48 = vsub.f32 %v5097_v46, %v2403_v2  ;;  %v3453_v56 = vsel %vm2406_vm2, 1.0, %v4118_v58  ;;  %v2608_v53 = vmul.f32 %v4996_v14, %v4256_v20 }
 0x855   : > { %v2588_v8 = vmul.f32 %v2584_v49, %v4248_v18  ;;  %v2585_v0 = vadd.f32 %v2583_v13, %v4244_v16  ;;  %v5112_v43 = vmul.f32 %v3453_v56, %v2402_v7  ;;  %v2418_v63 = vmul.f32 %v3453_v56, %v4270_v28  ;;  %v4026_v13 = vld [vmem:[%s5468_s2] sm:$0xff]  }
 0x856   : > { %vm2407_vm7 = vcmp.gt.f32.partialorder %v2405_v48, 0.0 }
 0x857   : > { %v3454_v9 = vsel %vm2407_vm7, 1.0, %v4118_v58  ;;  %v5116_v10 = vadd.f32 %v2588_v8, %v2586_v22  ;;  %v2589_v39 = vmul.f32 %v2585_v0, %v4248_v18  ;;  %v2414_v37 = vsub.f32 %v5089_v52, %v5112_v43 }
 0x858   : > { %v5128_v7 = vmul.f32 %v3454_v9, %v2403_v2  ;;  %v2419_v4 = vmul.f32 %v3454_v9, %v4270_v28  ;;  %v2422_v62 = vpack.c.bf16 %v3454_v9, %v3453_v56  ;;  %v5134_v29 = vadd.f32 %v2418_v63, %v2416_v6  ;;  %v4029_v63 = vld [vmem:[%s5473_s7 + $0x8] sm:$0xff]  }
 0x859   : > { %v2596_v38 = vsub.f32 %v5116_v10, %v2594_v34  ;;  %v5132_v42 = vadd.f32 %v2589_v39, %v2587_v5  ;;  %v2609_v6 = vmul.f32 %v5007_v24, %v4256_v20  ;;  %v4027_v24 = vld [vmem:[%s5468_s2 + $0x8] sm:$0xff]   ;;  %v2168_v5 = vmul.f32 %v5064_v45, %v4281_v35 }
 0x85a   : > { %v2415_v19 = vsub.f32 %v5097_v46, %v5128_v7  ;;  %3841 = vmatmul.mubr.msk.bf16.vlgmr.msra.gmra.mrb[12].mxu1 %vm555_vm1, %v2422_v62  ;;  %v5139_v47 = vadd.f32 %v2419_v4, %v2417_v44  ;;  %v4033_v9 = vld [vmem:[%s5470_s4 + $0x8] sm:$0xff]   ;;  %v2166_v39 = vmul.f32 %v5037_v12, %v4278_v33  ;;  %v2167_v4 = vmul.f32 %v5039_v1, %v4278_v33 }
 0x85b   : > { %vm2598_vm8 = vcmp.gt.f32.partialorder %v2596_v38, 0.0  ;;  %v2597_v15 = vsub.f32 %v5132_v42, %v2595_v36  ;;  %3853 = vmatpush3.bf16.msra.mxu1 %v4022_v40  ;;  %3856 = vmatprep.mubr.msk.bf16.mxu1 %vm4119_vm12, %v4118_v58  ;;  %v2169_v40 = vmul.f32 %v5071_v51, %v4281_v35  ;;  %v2483_v45 = vmul.f32 %v2164_v50, %v4274_v31 }
 0x85c   : > { %v3467_v2 = vsel %vm2598_vm8, 1.0, %v4118_v58  ;;  %3854 = vmatprep.subr.bf16.mxu1 %v4118_v58 }
 0x85d   : > { %v5149_v60 = vmul.f32 %v3467_v2, %v2594_v34  ;;  %v2610_v11 = vmul.f32 %v3467_v2, %v4258_v21  ;;  %vm2599_vm9 = vcmp.gt.f32.partialorder %v2597_v15, 0.0  ;;  %v4031_v34 = vld [vmem:[%s5470_s4] sm:$0xff]   ;;  %v2171_v38 = vadd.f32 %v2169_v40, %v2167_v4 }
 0x85e   : > { %v3468_v49 = vsel %vm2599_vm9, 1.0, %v4118_v58 }
 0x85f   : > { %v2606_v48 = vsub.f32 %v5116_v10, %v5149_v60  ;;  %v5162_v22 = vmul.f32 %v3468_v49, %v2595_v36  ;;  %v2611_v44 = vmul.f32 %v3468_v49, %v4258_v21  ;;  %3855 = vmatpush3.bf16.msra.mxu1 %v4024_v54  ;;  %v2614_v56 = vpack.c.bf16 %v3468_v49, %v3467_v2 }
 0x860   : > { %3868 = vmatprep.subr.bf16.mxu1 %v4118_v58  ;;  %v5166_v8 = vadd.f32 %v2610_v11, %v2608_v53  ;;  %v2490_v49 = vmul.f32 1.8, %v2171_v38  ;;  %v2506_v40 = vmul.f32 %v2171_v38, %v4278_v33 }
 0x861   : > { %v2607_v0 = vsub.f32 %v5132_v42, %v5162_v22  ;;  %3865 = vmatmul.mubr.msk.bf16.vlgmr.msra.gmra.mrb[20].mxu0 %vm555_vm1, %v2614_v56  ;;  %v5171_v14 = vadd.f32 %v2611_v44, %v2609_v6  ;;  %v2484_v6 = vmul.f32 %v2165_v61, %v4274_v31 }
 0x862   : > { %3857 = vmatmul.mubr.msk.bf16.vlgmr.msra.gmra.mrb[16].mxu1 %vm555_vm1, %v2422_v62  ;;  %3877 = vmatpush3.bf16.msra.mxu0 %v4026_v13  ;;  %v2170_v62 = vadd.f32 %v2168_v5, %v2166_v39  ;;  %v2492_v3 = vadd.f32 0.01, %v2490_v49 }
 0x863   : > { %3878 = vmatprep.subr.bf16.mxu0 %v4118_v58  ;;  %3880 = vmatprep.mubr.msk.bf16.mxu0 %vm4119_vm12, %v4118_v58 }
 0x864   : > { %3872 = vmatprep.mubr.msk.bf16.mxu1 %vm4119_vm12, %v4118_v58  ;;  %3869 = vmatpush3.bf16.msra.mxu1 %v4028_v41  ;;  %v2489_v54 = vmul.f32 1.8, %v2170_v62  ;;  %v2505_v61 = vmul.f32 %v2170_v62, %v4278_v33 }
 0x865   : > { %3870 = vmatprep.subr.bf16.mxu1 %v4118_v58 }
 0x866   : > { %3879 = vmatpush3.bf16.msra.mxu0 %v4027_v24  ;;  %v2491_v53 = vadd.f32 0.01, %v2489_v54 }
 0x867   : > { %3892 = vmatprep.subr.bf16.mxu0 %v4118_v58 }
 0x868   : > { %3871 = vmatpush3.bf16.msra.mxu1 %v4029_v63 }
 0x869   : > { %3881 = vmatmul.mubr.msk.bf16.vlgmr.msra.gmra.mrb[24].mxu0 %vm555_vm1, %v2614_v56  ;;  %3884 = vmatprep.subr.bf16.mxu1 %v4118_v58 }
 0x86a   : > { %3896 = vmatprep.mubr.msk.bf16.mxu0 %vm4119_vm12, %v4118_v58  ;;  %3893 = vmatpush3.bf16.msra.mxu0 %v4031_v34 }
 0x86b   : > { %3894 = vmatprep.subr.bf16.mxu0 %v4118_v58 }
 0x86e   : > { %3895 = vmatpush3.bf16.msra.mxu0 %v4033_v9 }
 0x92d   : > { %v2476_v36 = vpop.f32.mrb[12].mxu1 }
 0x92e   : > { %v2477_v15 = vadd.f32 %v2476_v36, %v4272_v30  ;;  %v3842_v2 = vpop.f32.mrb[13].mxu1 }
 0x92f   : > { %v2479_v11 = vpop.f32.mrb[14].mxu1 }
 0x930   : > { %v2485_v12 = vmul.f32 %v2477_v15, %v4276_v32  ;;  %v2480_v51 = vadd.f32 %v2479_v11, %v4272_v30  ;;  %v3843_v13 = vpop.f32.mrb[15].mxu1  ;;  %v2740_v11 = vmul.f32 1.8, %v5134_v29 }
 0x931   : > { %v2863_v13 = vld [vmem:[#allocation5 + $0x30] sm:$0xff] }
 0x932   : > { %v5216_v1 = vadd.f32 %v2485_v12, %v2483_v45  ;;  %v2486_v44 = vmul.f32 %v2480_v51, %v4276_v32  ;;  %v2741_v12 = vmul.f32 1.8, %v5139_v47  ;;  %v2742_v43 = vadd.f32 0.01, %v2740_v11 }
 0x934   : > { %v2493_v56 = vsub.f32 %v5216_v1, %v2491_v53  ;;  %v5224_v55 = vadd.f32 %v2486_v44, %v2484_v6  ;;  %v2725_v50 = vpop.f32.mrb[20].mxu0 }
 0x935   : > { %v2669_v24 = vpop.f32.mrb[16].mxu1  ;;  %v3866_v41 = vpop.f32.mrb[21].mxu0 }
 0x936   : > { %vm2495_vm10 = vcmp.gt.f32.partialorder %v2493_v56, 0.0  ;;  %v2494_v63 = vsub.f32 %v5224_v55, %v2492_v3  ;;  %v2726_v34 = vadd.f32 %v2725_v50, %v2669_v24  ;;  %v3858_v9 = vpop.f32.mrb[17].mxu1  ;;  %v2728_v5 = vpop.f32.mrb[22].mxu0  ;;  %v2864_v41 = vld [vmem:[#allocation5 + $0x38] sm:$0xff] }
 0x937   : > { %v3458_v39 = vsel %vm2495_vm10, 1.0, %v4118_v58  ;;  %v2672_v57 = vpop.f32.mrb[18].mxu1  ;;  %v3867_v59 = vpop.f32.mrb[23].mxu0 }
 0x938   : > { %v5230_v4 = vmul.f32 %v3458_v39, %v2491_v53  ;;  %v2507_v36 = vmul.f32 %v3458_v39, %v4281_v35  ;;  %vm2496_vm11 = vcmp.gt.f32.partialorder %v2494_v63, 0.0  ;;  %v2732_v15 = vadd.f32 %v2726_v34, %v4262_v23  ;;  %v3859_v54 = vpop.f32.mrb[19].mxu1 }
 0x939   : > { %v3459_v2 = vsel %vm2496_vm11, 1.0, %v4118_v58  ;;  %v2729_v45 = vadd.f32 %v2728_v5, %v2672_v57  ;;  %v2734_v53 = vmul.f32 %v2414_v37, %v4264_v25  ;;  %v2743_v5 = vadd.f32 0.01, %v2741_v12 }
 0x93a   : > { %v2503_v62 = vsub.f32 %v5216_v1, %v5230_v4  ;;  %v5239_v38 = vmul.f32 %v3459_v2, %v2492_v3  ;;  %v2508_v51 = vmul.f32 %v3459_v2, %v4281_v35  ;;  %v3549_v49 = vpack.c.bf16 %v3459_v2, %v3458_v39 }
 0x93b   : > { %v2736_v6 = vmul.f32 %v2732_v15, %v4266_v26  ;;  %v2733_v44 = vadd.f32 %v2729_v45, %v4262_v23  ;;  %v5248_v56 = vadd.f32 %v2507_v36, %v2505_v61  ;;  %v2735_v3 = vmul.f32 %v2415_v19, %v4264_v25 }
 0x93c   : > { %v2504_v50 = vsub.f32 %v5224_v55, %v5239_v38  ;;  %3560 = vst [vmem:[%s4295_s29 + $0x8] sm:$0xff] %v3549_v49   ;;  %v2915_v24 = vpop.f32.mrb[24].mxu0  ;;  %v5257_v63 = vadd.f32 %v2508_v51, %v2506_v40  ;;  %v2932_v39 = vmul.f32 1.8, %v5166_v8  ;;  %v2926_v40 = vmul.f32 %v2606_v48, %v4246_v17 }
 0x93d   : > { %v5259_v52 = vadd.f32 %v2736_v6, %v2734_v53  ;;  %v2737_v37 = vmul.f32 %v2733_v44, %v4266_v26  ;;  %v2922_v34 = vadd.f32 %v2915_v24, %v2863_v13  ;;  %v3882_v9 = vpop.f32.mrb[25].mxu0  ;;  %v2933_v45 = vmul.f32 1.8, %v5171_v14 }
 0x93e   : > { %v2918_v57 = vpop.f32.mrb[26].mxu0  ;;  %v2934_v11 = vadd.f32 0.01, %v2932_v39  ;;  %v2756_v12 = vmul.f32 %v5134_v29, %v4268_v27  ;;  %v2757_v13 = vmul.f32 %v5139_v47, %v4268_v27  ;;  %v4032_v9 = vld [vmem:[%s5471_s5 + $0x8] sm:$0xff]  }
 0x93f   : > { %v2744_v59 = vsub.f32 %v5259_v52, %v2742_v43  ;;  %v5264_v61 = vadd.f32 %v2737_v37, %v2735_v3  ;;  %v2924_v46 = vadd.f32 %v2922_v34, %v4244_v16  ;;  %v2923_v7 = vadd.f32 %v2918_v57, %v2864_v41  ;;  %v3883_v19 = vpop.f32.mrb[27].mxu0  ;;  %v4030_v3 = vld [vmem:[%s5471_s5] sm:$0xff]  }
 0x940   : > { %v2935_v42 = vadd.f32 0.01, %v2933_v45  ;;  %v2948_v37 = vmul.f32 %v5166_v8, %v4256_v20 }
 0x941   : > { %vm2746_vm13 = vcmp.gt.f32.partialorder %v2744_v59, 0.0  ;;  %v2745_v36 = vsub.f32 %v5264_v61, %v2743_v5  ;;  %v2928_v15 = vmul.f32 %v2924_v46, %v4248_v18  ;;  %v2925_v54 = vadd.f32 %v2923_v7, %v4244_v16 }
 0x942   : > { %v3475_v2 = vsel %vm2746_vm13, 1.0, %v4118_v58  ;;  %v2927_v16 = vmul.f32 %v2607_v0, %v4246_v17  ;;  %v2949_v59 = vmul.f32 %v5171_v14, %v4256_v20  ;;  %v4034_v20 = vld [vmem:[%s5473_s7] sm:$0xff]  }
 0x943   : > { %v5278_v51 = vmul.f32 %v3475_v2, %v2742_v43  ;;  %v2758_v10 = vmul.f32 %v3475_v2, %v4270_v28  ;;  %vm2747_vm14 = vcmp.gt.f32.partialorder %v2745_v36, 0.0  ;;  %v2930_v60 = vadd.f32 %v2928_v15, %v2926_v40 }
 0x944   : > { %v3476_v48 = vsel %vm2747_vm14, 1.0, %v4118_v58  ;;  %v2929_v49 = vmul.f32 %v2925_v54, %v4248_v18  ;;  %v2829_v15 = vmul.f32 1.8, %v5248_v56 }
 0x945   : > { %v2754_v29 = vsub.f32 %v5259_v52, %v5278_v51  ;;  %v5291_v53 = vmul.f32 %v3476_v48, %v2743_v5  ;;  %v2759_v6 = vmul.f32 %v3476_v48, %v4270_v28  ;;  %v2936_v44 = vsub.f32 %v2930_v60, %v2934_v11 }
 0x946   : > { %v2931_v24 = vadd.f32 %v2929_v49, %v2927_v16  ;;  %v2762_v17 = vpack.c.bf16 %v3476_v48, %v3475_v2  ;;  %v5297_v22 = vadd.f32 %v2758_v10, %v2756_v12  ;;  %v2830_v10 = vmul.f32 1.8, %v5257_v63 }
 0x947   : > { %v2755_v18 = vsub.f32 %v5264_v61, %v5291_v53  ;;  %vm2938_vm15 = vcmp.gt.f32.partialorder %v2936_v44, 0.0  ;;  %v5301_v47 = vadd.f32 %v2759_v6, %v2757_v13  ;;  %v2831_v16 = vadd.f32 0.01, %v2829_v15 }
 0x948   : > { %v3489_v0 = vsel %vm2938_vm15, 1.0, %v4118_v58  ;;  %v2937_v41 = vsub.f32 %v2931_v24, %v2935_v42  ;;  %3873 = vmatmul.mubr.msk.bf16.vlgmr.msra.gmra.mrb[20].mxu1 %vm555_vm1, %v2762_v17  ;;  %v2824_v49 = vmul.f32 %v2504_v50, %v4274_v31  ;;  %v2845_v50 = vmul.f32 %v5248_v56, %v4278_v33 }
 0x949   : > { %v2944_v43 = vmul.f32 %v3489_v0, %v2934_v11  ;;  %v2950_v34 = vmul.f32 %v3489_v0, %v4258_v21  ;;  %3206 = vst.msk [vmem:[#allocation2 + $0x20] sm:$0xff] %vm555_vm1, %v3489_v0  ;;  %3885 = vmatpush3.bf16.msra.mxu1 %v4030_v3  ;;  %3888 = vmatprep.mubr.msk.bf16.mxu1 %vm4119_vm12, %v4118_v58  ;;  %v3080_v56 = vmul.f32 1.8, %v5297_v22 }
 0x94a   : > { %vm2939_vm0 = vcmp.gt.f32.partialorder %v2937_v41, 0.0  ;;  %3886 = vmatprep.subr.bf16.mxu1 %v4118_v58  ;;  %v2823_v11 = vmul.f32 %v2503_v62, %v4274_v31  ;;  %v2832_v62 = vadd.f32 0.01, %v2830_v10  ;;  %v3096_v10 = vmul.f32 %v5297_v22, %v4268_v27 }
 0x94b   : > { %v2946_v5 = vsub.f32 %v2930_v60, %v2944_v43  ;;  %v2952_v39 = vadd.f32 %v2950_v34, %v2948_v37  ;;  %v3490_v57 = vsel %vm2939_vm0, 1.0, %v4118_v58  ;;  %v2846_v43 = vmul.f32 %v5257_v63, %v4278_v33 }
 0x94c   : > { %v2945_v8 = vmul.f32 %v3490_v57, %v2935_v42  ;;  %v2951_v46 = vmul.f32 %v3490_v57, %v4258_v21  ;;  %3207 = vst.msk [vmem:[#allocation2 + $0x28] sm:$0xff] %vm555_vm1, %v3490_v57  ;;  %v2954_v7 = vpack.c.bf16 %v3490_v57, %v3489_v0  ;;  %v4035_v21 = vld [vmem:[%s5473_s7 + $0x8] sm:$0xff]   ;;  %v3074_v57 = vmul.f32 %v2754_v29, %v4264_v25 }
 0x94d   : > { %3202 = vst.msk [vmem:[#allocation2] sm:$0xff] %vm555_vm1, %v2946_v5  ;;  %3204 = vst.msk [vmem:[#allocation2 + $0x10] sm:$0xff] %vm555_vm1, %v2952_v39  ;;  %3887 = vmatpush3.bf16.msra.mxu1 %v4032_v9  ;;  %v3082_v29 = vadd.f32 0.01, %v3080_v56 }
 0x94e   : > { %v2947_v19 = vsub.f32 %v2931_v24, %v2945_v8  ;;  %v2953_v40 = vadd.f32 %v2951_v46, %v2949_v59  ;;  %3897 = vmatmul.mubr.msk.bf16.vlgmr.msra.gmra.mrb[28].mxu0 %vm555_vm1, %v2954_v7  ;;  %3900 = vmatprep.subr.bf16.mxu1 %v4118_v58 }
 0x950   : > { %3203 = vst.msk [vmem:[#allocation2 + $0x8] sm:$0xff] %vm555_vm1, %v2947_v19  ;;  %3205 = vst.msk [vmem:[#allocation2 + $0x18] sm:$0xff] %vm555_vm1, %v2953_v40  ;;  %3889 = vmatmul.mubr.msk.bf16.vlgmr.msra.gmra.mrb[24].mxu1 %vm555_vm1, %v2762_v17 }
 0x951   : > { %3904 = vmatprep.mubr.msk.bf16.mxu1 %vm4119_vm12, %v4118_v58  ;;  %3901 = vmatpush3.bf16.msra.mxu1 %v4034_v20  ;;  %v3081_v20 = vmul.f32 1.8, %v5301_v47 }
 0x952   : > { %3902 = vmatprep.subr.bf16.mxu1 %v4118_v58 }
 0x955   : > { %3903 = vmatpush3.bf16.msra.mxu1 %v4035_v21 }
 0xa1b   : > { %v2816_v14 = vpop.f32.mrb[20].mxu1 }
 0xa1c   : > { %v2817_v36 = vadd.f32 %v2816_v14, %v4272_v30  ;;  %v3874_v54 = vpop.f32.mrb[21].mxu1 }
 0xa1d   : > { %v2819_v2 = vpop.f32.mrb[22].mxu1 }
 0xa1e   : > { %v2825_v45 = vmul.f32 %v2817_v36, %v4276_v32  ;;  %v2820_v12 = vadd.f32 %v2819_v2, %v4272_v30  ;;  %v3875_v60 = vpop.f32.mrb[23].mxu1  ;;  %v3075_v36 = vmul.f32 %v2755_v18, %v4264_v25 }
 0xa20   : > { %v5345_v48 = vadd.f32 %v2825_v45, %v2823_v11  ;;  %v2826_v13 = vmul.f32 %v2820_v12, %v4276_v32  ;;  %v3083_v11 = vadd.f32 0.01, %v3081_v20 }
 0xa21   : > { %v3065_v6 = vpop.f32.mrb[28].mxu0 }
 0xa22   : > { %v2833_v1 = vsub.f32 %v5345_v48, %v2831_v16  ;;  %v5353_v4 = vadd.f32 %v2826_v13, %v2824_v49  ;;  %v3898_v44 = vpop.f32.mrb[29].mxu0 }
 0xa23   : > { %v3009_v3 = vpop.f32.mrb[24].mxu1  ;;  %v3068_v24 = vpop.f32.mrb[30].mxu0 }
 0xa24   : > { %vm2835_vm12 = vcmp.gt.f32.partialorder %v2833_v1, 0.0  ;;  %v2834_v42 = vsub.f32 %v5353_v4, %v2832_v62  ;;  %v3066_v17 = vadd.f32 %v3065_v6, %v3009_v3  ;;  %v3890_v0 = vpop.f32.mrb[25].mxu1  ;;  %v3899_v41 = vpop.f32.mrb[31].mxu0 }
 0xa25   : > { %v3480_v55 = vsel %vm2835_vm12, 1.0, %v4118_v58  ;;  %v3012_v38 = vpop.f32.mrb[26].mxu1 }
 0xa26   : > { %v2841_v37 = vmul.f32 %v3480_v55, %v2831_v16  ;;  %v2847_v34 = vmul.f32 %v3480_v55, %v4281_v35  ;;  %vm2836_vm3 = vcmp.gt.f32.partialorder %v2834_v42, 0.0  ;;  %v3072_v9 = vadd.f32 %v3066_v17, %v4262_v23  ;;  %v3891_v5 = vpop.f32.mrb[27].mxu1 }
 0xa27   : > { %v3481_v39 = vsel %vm2836_vm3, 1.0, %v4118_v58  ;;  %v3069_v8 = vadd.f32 %v3068_v24, %v3012_v38 }
 0xa28   : > { %v2843_v63 = vsub.f32 %v5345_v48, %v2841_v37  ;;  %v2842_v59 = vmul.f32 %v3481_v39, %v2832_v62  ;;  %v2848_v46 = vmul.f32 %v3481_v39, %v4281_v35  ;;  %v3552_v7 = vpack.c.bf16 %v3481_v39, %v3480_v55 }
 0xa29   : > { %v3076_v19 = vmul.f32 %v3072_v9, %v4266_v26  ;;  %v3073_v40 = vadd.f32 %v3069_v8, %v4262_v23  ;;  %v2849_v21 = vadd.f32 %v2847_v34, %v2845_v50 }
 0xa2a   : > { %v2844_v14 = vsub.f32 %v5353_v4, %v2842_v59  ;;  %3561 = vst [vmem:[%s4295_s29 + $0x10] sm:$0xff] %v3552_v7   ;;  %v2850_v52 = vadd.f32 %v2848_v46, %v2846_v43  ;;  %v3163_v1 = vmul.f32 %v2843_v63, %v4274_v31 }
 0xa2b   : > { %v3078_v51 = vadd.f32 %v3076_v19, %v3074_v57  ;;  %v3077_v15 = vmul.f32 %v3073_v40, %v4266_v26  ;;  %v3097_v26 = vmul.f32 %v5301_v47, %v4268_v27  ;;  %v3169_v13 = vmul.f32 1.8, %v2849_v21 }
 0xa2c   : > { %v3170_v44 = vmul.f32 1.8, %v2850_v52  ;;  %v3164_v17 = vmul.f32 %v2844_v14, %v4274_v31  ;;  %v3185_v34 = vmul.f32 %v2849_v21, %v4278_v33  ;;  %v3186_v31 = vmul.f32 %v2850_v52, %v4278_v33 }
 0xa2d   : > { %v3084_v54 = vsub.f32 %v3078_v51, %v3082_v29  ;;  %v3079_v2 = vadd.f32 %v3077_v15, %v3075_v36  ;;  %v3171_v42 = vadd.f32 0.01, %v3169_v13 }
 0xa2e   : > { %v3172_v38 = vadd.f32 0.01, %v3170_v44 }
 0xa2f   : > { %vm3086_vm4 = vcmp.gt.f32.partialorder %v3084_v54, 0.0  ;;  %v3085_v23 = vsub.f32 %v3079_v2, %v3083_v11 }
 0xa30   : > { %v3497_v45 = vsel %vm3086_vm4, 1.0, %v4118_v58 }
 0xa31   : > { %v3092_v12 = vmul.f32 %v3497_v45, %v3082_v29  ;;  %v3098_v60 = vmul.f32 %v3497_v45, %v4270_v28  ;;  %3212 = vst.msk [vmem:[#allocation3 + $0x20] sm:$0xff] %vm555_vm1, %v3497_v45  ;;  %vm3087_vm5 = vcmp.gt.f32.partialorder %v3085_v23, 0.0 }
 0xa32   : > { %v3498_v25 = vsel %vm3087_vm5, 1.0, %v4118_v58 }
 0xa33   : > { %v3094_v61 = vsub.f32 %v3078_v51, %v3092_v12  ;;  %v3100_v53 = vadd.f32 %v3098_v60, %v3096_v10  ;;  %v3093_v18 = vmul.f32 %v3498_v25, %v3083_v11  ;;  %v3099_v48 = vmul.f32 %v3498_v25, %v4270_v28  ;;  %3213 = vst.msk [vmem:[#allocation3 + $0x28] sm:$0xff] %vm555_vm1, %v3498_v25 }
 0xa34   : > { %v3102_v16 = vpack.c.bf16 %v3498_v25, %v3497_v45 }
 0xa35   : > { %3208 = vst.msk [vmem:[#allocation3] sm:$0xff] %vm555_vm1, %v3094_v61  ;;  %3210 = vst.msk [vmem:[#allocation3 + $0x10] sm:$0xff] %vm555_vm1, %v3100_v53  ;;  %v3095_v22 = vsub.f32 %v3079_v2, %v3093_v18  ;;  %v3101_v49 = vadd.f32 %v3099_v48, %v3097_v26 }
 0xa36   : > { %3905 = vmatmul.mubr.msk.bf16.vlgmr.msra.gmra.mrb[28].mxu1 %vm555_vm1, %v3102_v16 }
 0xa37   : > { %3209 = vst.msk [vmem:[#allocation3 + $0x8] sm:$0xff] %vm555_vm1, %v3095_v22  ;;  %3211 = vst.msk [vmem:[#allocation3 + $0x18] sm:$0xff] %vm555_vm1, %v3101_v49 }
 0xb09   : > { %v3156_v27 = vpop.f32.mrb[28].mxu1 }
 0xb0a   : > { %v3157_v47 = vadd.f32 %v3156_v27, %v4272_v30  ;;  %v3906_v28 = vpop.f32.mrb[29].mxu1 }
 0xb0b   : > { %v3159_v6 = vpop.f32.mrb[30].mxu1 }
 0xb0c   : > { %v3165_v4 = vmul.f32 %v3157_v47, %v4276_v32  ;;  %v3160_v62 = vadd.f32 %v3159_v6, %v4272_v30  ;;  %v3907_v3 = vpop.f32.mrb[31].mxu1 }
 0xb0e   : > { %v3167_v24 = vadd.f32 %v3165_v4, %v3163_v1  ;;  %v3166_v0 = vmul.f32 %v3160_v62, %v4276_v32 }
 0xb10   : > { %v3173_v41 = vsub.f32 %v3167_v24, %v3171_v42  ;;  %v3168_v55 = vadd.f32 %v3166_v0, %v3164_v17 }
 0xb12   : > { %vm3175_vm1 = vcmp.gt.f32.partialorder %v3173_v41, 0.0  ;;  %v3174_v50 = vsub.f32 %v3168_v55, %v3172_v38 }
 0xb13   : > { %v3502_v43 = vsel %vm3175_vm1, 1.0, %v4118_v58 }
 0xb14   : > { %v3181_v37 = vmul.f32 %v3502_v43, %v3171_v42  ;;  %v3187_v30 = vmul.f32 %v3502_v43, %v4281_v35  ;;  %vm3176_vm6 = vcmp.gt.f32.partialorder %v3174_v50, 0.0 }
 0xb15   : > { %v3503_v9 = vsel %vm3176_vm6, 1.0, %v4118_v58 }
 0xb16   : > { %v3183_v5 = vsub.f32 %v3167_v24, %v3181_v37  ;;  %v3189_v32 = vadd.f32 %v3187_v30, %v3185_v34  ;;  %v3182_v39 = vmul.f32 %v3503_v9, %v3172_v38  ;;  %v3188_v57 = vmul.f32 %v3503_v9, %v4281_v35 }
 0xb17   : > { %v3555_v56 = vpack.c.bf16 %v3503_v9, %v3502_v43 }
 0xb18   : > { %3214 = vst [vmem:[#allocation4] sm:$0xff] %v3183_v5  ;;  %3216 = vst [vmem:[#allocation4 + $0x10] sm:$0xff] %v3189_v32  ;;  %v3184_v8 = vsub.f32 %v3168_v55, %v3182_v39  ;;  %v3190_v63 = vadd.f32 %v3188_v57, %v3186_v31 }
 0xb19   : > { %3562 = vst [vmem:[%s4295_s29 + $0x18] sm:$0xff] %v3555_v56  }
 0xb1a   : > { %3215 = vst [vmem:[#allocation4 + $0x8] sm:$0xff] %v3184_v8  ;;  %3217 = vst [vmem:[#allocation4 + $0x18] sm:$0xff] %v3190_v63 }
 0xb1b PF: > { %s3532_s20 = sshll.u32 %s4106_s12, 9  ;;  %s3235_s26 = sshll.u32 %s4295_s29, 4  ;;  %s5416_s26 = int_to_ptr.vmem [resolvable:$true] %s3235_s26 }
 0xb1c   : > { %s5413_s25 = scalar_lea.hbm %s5475_s9, %s3532_s20  ;;  %s5420_s27 = scalar_lea.sflag [#allocation7], %s347_s23 }
 0xb1d   : > { %s4036_s15 = scalar_lea.vmem %s5416_s26, 512  ;;  %s4120_s12 = smov [#allocation6]  }
 0xb1e   : > { %p4037_p0 = scmp.ne.s32.totalorder %s5416_s26, %s4036_s15  ;;  %s4040_s16 = sshll.u32 %s4120_s12, 4  ;;  %s4041_s16 = int_to_ptr.vmem [resolvable:$false] %s4040_s16 }
 0xb1f   : > { %s4042_s18 = scalar_lea.vmem %s4041_s16, 1024  ;;  %p4043_p3 = scmp.lt.s32.totalorder %s5416_s26, %s4041_s16 }
 0xb20   : > { %p4038_p1 = pnand %p4037_p0, %p4213_p4  ;;  %p4044_p5 = scmp.lt.s32.totalorder %s4042_s18, %s4036_s15 }
 0xb22   : > { %p4039_p2 = pneg %p4038_p1  ;;  %p4045_p6 = por %p4044_p5, %p4043_p3 }
 0xb24   : > { %p4046_p7 = pnand %p4045_p6, %p4039_p2 }
 0xb26   : > { %4049 = shalt.err (!%p4046_p7)
}
 0xb27   : > { %s4050_s23 = scalar_lea.hbm %s5413_s25, 512  ;;  %s4054_s28 = scalar_lea.hbm %s5475_s9, 1024 }
 0xb28   : > { %p4051_p9 = scmp.ne.s32.totalorder %s5413_s25, %s4050_s23  ;;  %p4055_p12 = scmp.lt.u32.totalorder %s5413_s25, %s5475_s9 }
 0xb29   : > { %p4056_p13 = scmp.lt.u32.totalorder %s4054_s28, %s4050_s23  ;;  %p4058_p1 = scmp.lt.u32.totalorder %s4050_s23, %s5413_s25 }
 0xb2a   : > { %p4052_p10 = pnand %p4051_p9, %p4213_p4 }
 0xb2b   : > { %p4057_p0 = por %p4056_p13, %p4055_p12 }
 0xb2c   : > { %p4053_p11 = pneg %p4052_p10 }
 0xb2d   : > { %p4059_p2 = por %p4058_p1, %p4057_p0 }
 0xb2f   : > { %p4060_p3 = pnand %p4059_p2, %p4053_p11 }
 0xb31   : > { %4063 = shalt.err (!%p4060_p3)
}
 0xb32   : > { %s4121_s15 = smov 64   ;;  %s4122_s16 = smov 4  }
 0xb33   : > { %3910 = dma.vmem_to_hbm [thread:$0]  (%p4213_p4), %s5416_s26, 512, %s5413_s25, %s5420_s27, %s4121_s15, %s4121_s15, %s4122_s16  }
 0xb34 PF: > { %p3916_p5 = scmp.ge.s32.totalorder %s4114_s14, 2  ;;  %s3250_s18 = sand.u32 1, %s4094_s30  }
 0xb35   : > { %s3251_s23 = scalar_lea.sflag [#allocation7], %s3250_s18 }
 0xb36   : > { %p3913_p6 = pnand %p3916_p5, %p4220_p8 }
 0xb38   : > { %4089 = dma.done.wait (!%p3913_p6), %s3251_s23, 512  }
 0xb39   : > { %4091 = vsyncadd (!%p3913_p6), %s3251_s23, 4294966784  ;;  %s22_s14 = sadd.s32 1, %s4114_s14   ;;  %s5478_s30 = smov %s4098_s10 }
 0xb3a   : > { %p19_p7 = scmp.ge.s32.totalorder %s22_s14, 4   ;;  %s5479_s10 = smov %s4102_s11 }
 0xb3b   : > { %s5480_s11 = smov %s4226_s22  ;;  %s5481_s12 = smov %s4110_s13 }
 0xb3c   : > { %s5482_s13 = smov %s5484_s17  ;;  %21 = sbr.rel (!%p19_p7) target bundleno = 4 (0x4), region = 121 }
 0xb43   :  { %3256 = vsyncpa [#allocation7], 1 }
 0xb44   :  { %3258 = vsyncpa [#allocation7 + $0x1], 1 }

</bundles_post_ra>
